<compile_context>
chip_gen: v6e
topology: v6e:2x2x1
jax: 0.10.0
libtpu: 0.0.40
codegen_flags: <defaults>
</compile_context>

<pallas_src>
import functools

import jax
import jax.numpy as jnp
from jax import lax
from jax.experimental import pallas as pl
from jax.experimental.pallas import tpu as pltpu

_VMEM_LIMIT = 48 * 1024 * 1024          # <= v7x 64 MiB physical; plenty on v5e/v6e (128 MiB)
_LN_EPS = 1e-5                          # PyTorch nn.LayerNorm default
_NEG_BIG = -1e30


def _compiler(sem):
    return pltpu.CompilerParams(dimension_semantics=sem, vmem_limit_bytes=_VMEM_LIMIT)


def _pick_tile(dim, target, align):
    """Largest tile <= target that is a multiple of `align` and divides `dim`;
    falls back to the full dim (block == full array dim is always legal)."""
    if dim <= target or dim % align != 0:
        return dim
    t = (target // align) * align
    while t >= align:
        if dim % t == 0:
            return t
        t -= align
    return dim


def _head_group(n_head, hd):
    """Heads per attention grid step: make the lane dim (G*hd) a multiple of 128 when
    possible, else fall back to all heads."""
    g = max(1, 128 // hd)
    if g < n_head and n_head % g == 0 and (g * hd) % 128 == 0:
        return g
    return n_head


# ----------------------------- Pallas kernels ------------------------------

def _layernorm_f32(x, g, b):
    mean = jnp.mean(x, axis=-1, keepdims=True)
    xc = x - mean
    var = jnp.mean(xc * xc, axis=-1, keepdims=True)
    return (xc * lax.rsqrt(var + _LN_EPS)) * g + b


def _ln_linear_kernel(x_ref, g_ref, b_ref, w_ref, bias_ref, o_ref, xn_sc):
    # out = LayerNorm(x) @ W + bias.  LN in f32, computed once per row tile (column axis is
    # the fastest-varying, "arbitrary" grid axis), bf16 MXU operands, f32 accumulate.
    @pl.when(pl.program_id(1) == 0)
    def _():
        xn = _layernorm_f32(x_ref[...].astype(jnp.float32), g_ref[...], b_ref[...])
        xn_sc[...] = xn.astype(jnp.bfloat16)

    o_ref[...] = (
        jnp.dot(xn_sc[...], w_ref[...], preferred_element_type=jnp.float32) + bias_ref[...]
    ).astype(o_ref.dtype)


def _ln_logits_kernel(x_ref, g_ref, b_ref, w_ref, o_ref, xn_sc):
    # logits = LayerNorm(x) @ W_unembed  (W_unembed is the pre-transposed (D, V_pad) embedding,
    # no bias, LN cached across vocab tiles).
    @pl.when(pl.program_id(1) == 0)
    def _():
        xn = _layernorm_f32(x_ref[...].astype(jnp.float32), g_ref[...], b_ref[...])
        xn_sc[...] = xn.astype(jnp.bfloat16)

    o_ref[...] = jnp.dot(xn_sc[...], w_ref[...], preferred_element_type=jnp.float32)


def _linear_kernel(x_ref, w_ref, bias_ref, o_ref):
    o_ref[...] = (
        jnp.dot(x_ref[...].astype(jnp.bfloat16), w_ref[...],
                preferred_element_type=jnp.float32) + bias_ref[...]
    ).astype(o_ref.dtype)


def _linear_resid_kernel(x_ref, r_ref, w_ref, bias_ref, o_ref):
    # out = residual + x @ W + bias   (fuses the block's `x = x + attn(...)` add)
    o_ref[...] = (
        r_ref[...]
        + jnp.dot(x_ref[...].astype(jnp.bfloat16), w_ref[...],
                  preferred_element_type=jnp.float32)
        + bias_ref[...]
    )


def _gelu_tanh(h):
    # TODO(synk): PyTorch nn.GELU() defaults to the exact erf form; tanh approximation is
    # used here for a guaranteed Mosaic lowering (max abs diff ~3e-4).
    return 0.5 * h * (1.0 + jnp.tanh(0.7978845608028654 * (h + 0.044715 * h * h * h)))


def _ln_mlp_kernel(x_ref, g_ref, b_ref, w1_ref, b1_ref, w2_ref, b2_ref, o_ref,
                   xn_sc, acc_sc):
    # out = x + GELU(LayerNorm(x) @ W1 + b1) @ W2 + b2, reduction over the hidden dim.
    h = pl.program_id(1)

    @pl.when(h == 0)
    def _():
        xn = _layernorm_f32(x_ref[...].astype(jnp.float32), g_ref[...], b_ref[...])
        xn_sc[...] = xn.astype(jnp.bfloat16)
        acc_sc[...] = jnp.zeros_like(acc_sc)

    hid = jnp.dot(xn_sc[...], w1_ref[...], preferred_element_type=jnp.float32) + b1_ref[...]
    hid = _gelu_tanh(hid)
    acc_sc[...] += jnp.dot(hid.astype(jnp.bfloat16), w2_ref[...],
                           preferred_element_type=jnp.float32)

    @pl.when(h == pl.num_programs(1) - 1)
    def _():
        o_ref[...] = x_ref[...] + acc_sc[...] + b2_ref[...]


def _flash_attn_kernel(q_ref, k_ref, v_ref, o_ref, m_sc, l_sc, acc_sc,
                       *, G, hd, causal, tq, tk):
    # Flash-style attention over one (batch, head-group, q-tile) with the k-tile axis as the
    # innermost "arbitrary" reduction.  Softmax scale is already folded into the q weights.
    # TODO(synk): explicit attention_mask tensor / kv_cache incremental decode not implemented;
    # decoder self-attention uses the implied causal mask, cross-attention is unmasked.
    qi = pl.program_id(2)
    ki = pl.program_id(3)

    @pl.when(ki == 0)
    def _():
        m_sc[...] = jnp.full(m_sc.shape, _NEG_BIG, jnp.float32)
        l_sc[...] = jnp.zeros(l_sc.shape, jnp.float32)
        acc_sc[...] = jnp.zeros(acc_sc.shape, jnp.float32)

    def _compute():
        q = q_ref[0]                       # (tq, G*hd) bf16
        k = k_ref[0]                       # (tk, G*hd) bf16
        v = v_ref[0]                       # (tk, G*hd) bf16
        if causal:
            row = qi * tq + lax.broadcasted_iota(jnp.int32, (tq, tk), 0)
            col = ki * tk + lax.broadcasted_iota(jnp.int32, (tq, tk), 1)
            keep = col <= row
        for g in range(G):                 # static unroll over heads in the group
            sl = slice(g * hd, (g + 1) * hd)
            s = lax.dot_general(q[:, sl], k[:, sl], (((1,), (1,)), ((), ())),
                                preferred_element_type=jnp.float32)     # (tq, tk)
            if causal:
                s = jnp.where(keep, s, _NEG_BIG)
            m_prev = m_sc[g]
            m_new = jnp.maximum(m_prev, jnp.max(s, axis=-1, keepdims=True))
            alpha = jnp.exp(m_prev - m_new)
            # TODO(synk): bf16 exp is ~2x faster on v6e/v7x EUP; kept f32 for portability (v5e).
            p = jnp.exp(s - m_new)
            l_sc[g] = alpha * l_sc[g] + jnp.sum(p, axis=-1, keepdims=True)
            acc_sc[g] = alpha * acc_sc[g] + jnp.dot(p.astype(jnp.bfloat16), v[:, sl],
                                                    preferred_element_type=jnp.float32)
            m_sc[g] = m_new

    if causal:
        pl.when(qi * tq + (tq - 1) >= ki * tk)(_compute)   # skip fully-masked k tiles
    else:
        _compute()

    @pl.when(ki == pl.num_programs(3) - 1)
    def _():
        outs = [acc_sc[g] * pl.reciprocal(l_sc[g], approx=True) for g in range(G)]
        # One full-width lane-dense store of the whole head-group output.
        o_ref[0] = jnp.concatenate(outs, axis=-1).astype(o_ref.dtype)


# ----------------------------- kernel wrappers ------------------------------

def ln_linear(x, gamma, beta, w, bias, out_dtype=jnp.bfloat16):
    M, D = x.shape
    N = w.shape[1]
    tm = _pick_tile(M, 256, 8)
    tn = _pick_tile(N, 512, 128)
    return pl.pallas_call(
        _ln_linear_kernel,
        out_shape=jax.ShapeDtypeStruct((M, N), out_dtype),
        grid=(M // tm, N // tn),
        in_specs=[
            pl.BlockSpec((tm, D), lambda i, j: (i, 0)),
            pl.BlockSpec((1, D), lambda i, j: (0, 0)),
            pl.BlockSpec((1, D), lambda i, j: (0, 0)),
            pl.BlockSpec((D, tn), lambda i, j: (0, j)),
            pl.BlockSpec((1, tn), lambda i, j: (0, j)),
        ],
        out_specs=pl.BlockSpec((tm, tn), lambda i, j: (i, j)),
        scratch_shapes=[pltpu.VMEM((tm, D), jnp.bfloat16)],
        compiler_params=_compiler(("parallel", "arbitrary")),
    )(x, gamma.reshape(1, D), beta.reshape(1, D), w, bias.reshape(1, N))


def linear(x, w, bias, out_dtype=jnp.bfloat16):
    M, D = x.shape
    N = w.shape[1]
    tm = _pick_tile(M, 256, 8)
    tn = _pick_tile(N, 512, 128)
    return pl.pallas_call(
        _linear_kernel,
        out_shape=jax.ShapeDtypeStruct((M, N), out_dtype),
        grid=(M // tm, N // tn),
        in_specs=[
            pl.BlockSpec((tm, D), lambda i, j: (i, 0)),
            pl.BlockSpec((D, tn), lambda i, j: (0, j)),
            pl.BlockSpec((1, tn), lambda i, j: (0, j)),
        ],
        out_specs=pl.BlockSpec((tm, tn), lambda i, j: (i, j)),
        compiler_params=_compiler(("parallel", "parallel")),
    )(x, w, bias.reshape(1, N))


def linear_resid(x, resid, w, bias):
    M, D = x.shape
    N = w.shape[1]
    tm = _pick_tile(M, 256, 8)
    tn = _pick_tile(N, 512, 128)
    return pl.pallas_call(
        _linear_resid_kernel,
        out_shape=jax.ShapeDtypeStruct((M, N), jnp.float32),
        grid=(M // tm, N // tn),
        in_specs=[
            pl.BlockSpec((tm, D), lambda i, j: (i, 0)),
            pl.BlockSpec((tm, tn), lambda i, j: (i, j)),
            pl.BlockSpec((D, tn), lambda i, j: (0, j)),
            pl.BlockSpec((1, tn), lambda i, j: (0, j)),
        ],
        out_specs=pl.BlockSpec((tm, tn), lambda i, j: (i, j)),
        compiler_params=_compiler(("parallel", "parallel")),
    )(x, resid, w, bias.reshape(1, N))


def ln_mlp(x, gamma, beta, w1, b1, w2, b2):
    M, D = x.shape
    H4 = w1.shape[1]
    tm = _pick_tile(M, 256, 8)
    th = _pick_tile(H4, 1024, 128)
    return pl.pallas_call(
        _ln_mlp_kernel,
        out_shape=jax.ShapeDtypeStruct((M, D), jnp.float32),
        grid=(M // tm, H4 // th),                     # hidden (reduction) axis last
        in_specs=[
            pl.BlockSpec((tm, D), lambda i, h: (i, 0)),
            pl.BlockSpec((1, D), lambda i, h: (0, 0)),
            pl.BlockSpec((1, D), lambda i, h: (0, 0)),
            pl.BlockSpec((D, th), lambda i, h: (0, h)),
            pl.BlockSpec((1, th), lambda i, h: (0, h)),
            pl.BlockSpec((th, D), lambda i, h: (h, 0)),
            pl.BlockSpec((1, D), lambda i, h: (0, 0)),
        ],
        out_specs=pl.BlockSpec((tm, D), lambda i, h: (i, 0)),
        scratch_shapes=[pltpu.VMEM((tm, D), jnp.bfloat16),
                        pltpu.VMEM((tm, D), jnp.float32)],
        compiler_params=_compiler(("parallel", "arbitrary")),
    )(x, gamma.reshape(1, D), beta.reshape(1, D), w1, b1.reshape(1, H4), w2, b2.reshape(1, D))


def ln_logits(x, gamma, beta, w_unembed):
    # w_unembed: (D, V_pad), pre-transposed and 128-padded copy of the embedding table (bf16).
    M, D = x.shape
    Vp = w_unembed.shape[1]
    tm = _pick_tile(M, 256, 8)
    tv = _pick_tile(Vp, 2048, 128)
    return pl.pallas_call(
        _ln_logits_kernel,
        out_shape=jax.ShapeDtypeStruct((M, Vp), jnp.float32),
        grid=(M // tm, Vp // tv),
        in_specs=[
            pl.BlockSpec((tm, D), lambda i, j: (i, 0)),
            pl.BlockSpec((1, D), lambda i, j: (0, 0)),
            pl.BlockSpec((1, D), lambda i, j: (0, 0)),
            pl.BlockSpec((D, tv), lambda i, j: (0, j)),
        ],
        out_specs=pl.BlockSpec((tm, tv), lambda i, j: (i, j)),
        scratch_shapes=[pltpu.VMEM((tm, D), jnp.bfloat16)],
        compiler_params=_compiler(("parallel", "arbitrary")),
    )(x, gamma.reshape(1, D), beta.reshape(1, D), w_unembed)


def attention(q_arr, kv_arr, *, n_head, hd, G, causal, k_off, v_off, out_dtype=jnp.bfloat16):
    """Flash-style attention.  q_arr: (B, T, >=D) with head-group g in last-dim block index g.
    kv_arr: (B, S, ...) with K at block offset k_off + g and V at block offset v_off + g
    (blocks of width G*hd)."""
    B, T, _ = q_arr.shape
    S = kv_arr.shape[1]
    D = n_head * hd
    Ghd = G * hd
    NG = n_head // G
    tq = _pick_tile(T, 256, 8)
    tk = _pick_tile(S, 256, 128)   # TODO(synk): pad encoder length to a 128 multiple for best tiling
    kern = functools.partial(_flash_attn_kernel, G=G, hd=hd, causal=causal, tq=tq, tk=tk)
    return pl.pallas_call(
        kern,
        out_shape=jax.ShapeDtypeStruct((B, T, D), out_dtype),
        grid=(B, NG, T // tq, S // tk),
        in_specs=[
            pl.BlockSpec((1, tq, Ghd), lambda b, g, qi, ki: (b, qi, g)),
            pl.BlockSpec((1, tk, Ghd), lambda b, g, qi, ki: (b, ki, k_off + g)),
            pl.BlockSpec((1, tk, Ghd), lambda b, g, qi, ki: (b, ki, v_off + g)),
        ],
        out_specs=pl.BlockSpec((1, tq, Ghd), lambda b, g, qi, ki: (b, qi, g)),
        scratch_shapes=[pltpu.VMEM((G, tq, 1), jnp.float32),
                        pltpu.VMEM((G, tq, 1), jnp.float32),
                        pltpu.VMEM((G, tq, hd), jnp.float32)],
        compiler_params=_compiler(("parallel", "parallel", "parallel", "arbitrary")),
    )(q_arr, kv_arr, kv_arr)


# ------------------------------ model forward -------------------------------

def block_forward(x2, kv_c, p, n_head, hd, G, B, T):
    D = x2.shape[1]
    NG = n_head // G
    # causal self-attention (LN fused into the fused-QKV projection; scale folded into q weights)
    qkv = ln_linear(x2, p["attn_ln_g"], p["attn_ln_b"], p["attn_wqkv"], p["attn_bqkv"],
                    out_dtype=jnp.bfloat16).reshape(B, T, 3 * D)
    ao = attention(qkv, qkv, n_head=n_head, hd=hd, G=G, causal=True,
                   k_off=NG, v_off=2 * NG)
    x2 = linear_resid(ao.reshape(B * T, D), x2, p["attn_wo"], p["attn_bo"])
    # cross-attention (K/V of encoder states precomputed per layer in kv_c)
    qc = ln_linear(x2, p["cross_ln_g"], p["cross_ln_b"], p["cross_wq"], p["cross_bq"],
                   out_dtype=jnp.bfloat16).reshape(B, T, D)
    co = attention(qc, kv_c, n_head=n_head, hd=hd, G=G, causal=False,
                   k_off=0, v_off=NG)
    x2 = linear_resid(co.reshape(B * T, D), x2, p["cross_wo"], p["cross_bo"])
    # MLP (LN + GELU + residual fused; hidden-dim reduction grid)
    x2 = ln_mlp(x2, p["mlp_ln_g"], p["mlp_ln_b"], p["w1"], p["b1"], p["w2"], p["b2"])
    return x2


def text_decoder_forward(params, tokens, xc, *, n_head, inference=False):
    # TODO(synk): kv_cache incremental decoding / generate() loop are host-side control flow
    # and are not implemented (kv_cache=None, attention_mask=None path only).
    B, T = tokens.shape
    W_emb = params["embed_tokens"]                     # (n_vocab, D), bf16 (used for the gather)
    n_vocab, D = W_emb.shape
    hd = D // n_head
    G = _head_group(n_head, hd)

    x = jnp.take(W_emb, tokens, axis=0).astype(jnp.float32)    # embedding gather (glue)
    x = x + params["embed_positions"][:T]
    x2 = x.reshape(B * T, D)

    S = xc.shape[1]
    xc2 = xc.reshape(B * S, D)
    for p in params["blocks"]:
        # per-layer cross-attention K/V projection of encoder states ([K | V] layout, bf16)
        kv_c = linear(xc2, p["cross_wkv"], p["cross_bkv"],
                      out_dtype=jnp.bfloat16).reshape(B, S, 2 * D)
        x2 = block_forward(x2, kv_c, p, n_head, hd, G, B, T)

    x3 = x2.reshape(B, T, D)
    if inference:
        x3 = x3[:, -1:, :]
    rows = x3.shape[0] * x3.shape[1]
    logits = ln_logits(x3.reshape(rows, D), params["ln_post_g"], params["ln_post_b"],
                       params["unembed"])
    logits = logits[:, :n_vocab]                       # drop vocab padding
    logits = logits.reshape(x3.shape[0], x3.shape[1], n_vocab)
    if inference:
        logits = logits[:, 0, :]
    return logits


# ------------------------------- init / params ------------------------------

def init_params(key, n_vocab, n_ctx, d_model, n_head, n_layer, scale_exponent=-0.25):
    """Weights in math orientation (in, out) — a PyTorch port would transpose nn.Linear.weight.
    The attention softmax scale ((hd**-0.25) applied to both q and k, i.e. hd**-0.5 total) is
    folded into the q projection weights/biases."""
    hd = d_model // n_head
    scale = float(hd) ** scale_exponent
    scale2 = scale * scale
    keys = iter(jax.random.split(key, 8 + n_layer * 32))
    bf = jnp.bfloat16

    def nrm(shape, s=0.02):
        return (s * jax.random.normal(next(keys), shape)).astype(jnp.float32)

    ones = jnp.ones((d_model,), jnp.float32)
    zeros = jnp.zeros((d_model,), jnp.float32)

    blocks = []
    for _ in range(n_layer):
        # self-attention (k_proj has no bias); scale folded into q columns/bias
        wq, bq = nrm((d_model, d_model)), nrm((d_model,))
        wk = nrm((d_model, d_model))
        wv, bv = nrm((d_model, d_model)), nrm((d_model,))
        wo, bo = nrm((d_model, d_model)), nrm((d_model,))
        wqkv = jnp.concatenate([wq * scale2, wk, wv], axis=1)
        bqkv = jnp.concatenate([bq * scale2, zeros, bv], axis=0)
        # cross-attention (k_bias=True); scale folded into q
        cwq, cbq = nrm((d_model, d_model)), nrm((d_model,))
        cwk, cbk = nrm((d_model, d_model)), nrm((d_model,))
        cwv, cbv = nrm((d_model, d_model)), nrm((d_model,))
        cwo, cbo = nrm((d_model, d_model)), nrm((d_model,))
        cwkv = jnp.concatenate([cwk, cwv], axis=1)
        cbkv = jnp.concatenate([cbk, cbv], axis=0)
        blocks.append(dict(
            attn_ln_g=ones, attn_ln_b=zeros,
            attn_wqkv=wqkv.astype(bf), attn_bqkv=bqkv,
            attn_wo=wo.astype(bf), attn_bo=bo,
            cross_ln_g=ones, cross_ln_b=zeros,
            cross_wq=(cwq * scale2).astype(bf), cross_bq=cbq * scale2,
            cross_wkv=cwkv.astype(bf), cross_bkv=cbkv,
            cross_wo=cwo.astype(bf), cross_bo=cbo,
            mlp_ln_g=ones, mlp_ln_b=zeros,
            w1=nrm((d_model, 4 * d_model)).astype(bf), b1=nrm((4 * d_model,)),
            w2=nrm((4 * d_model, d_model)).astype(bf), b2=nrm((d_model,)),
        ))

    embed = nrm((n_vocab, d_model), s=0.1)
    v_pad = ((n_vocab + 127) // 128) * 128
    # one-time (D, V_pad) transposed, zero-padded copy for the tied-embedding logits path
    unembed = jnp.zeros((d_model, v_pad), jnp.float32).at[:, :n_vocab].set(embed.T)
    return dict(
        embed_tokens=embed.astype(bf),
        embed_positions=nrm((n_ctx, d_model), s=0.1),
        unembed=unembed.astype(bf),
        blocks=blocks,
        ln_post_g=ones, ln_post_b=zeros,
    )


# ---------------------------------- main -------------------------------------

if __name__ == "__main__":
    # Small but lane-aligned shapes: d_model=128 (head_dim=64, head group = 2 heads -> 128 lanes).
    n_vocab, n_ctx, d_model, n_head, n_layer = 96, 16, 128, 2, 2
    B, T, S_enc = 2, 8, 8

    key = jax.random.PRNGKey(0)
    kp, kt, kx = jax.random.split(key, 3)
    params = init_params(kp, n_vocab, n_ctx, d_model, n_head, n_layer)

    tokens = jax.random.randint(kt, (B, T), 0, n_vocab, dtype=jnp.int32)
    xc = (0.1 * jax.random.normal(kx, (B, S_enc, d_model))).astype(jnp.float32)

    fwd = jax.jit(functools.partial(text_decoder_forward, n_head=n_head))
    logits = jax.block_until_ready(fwd(params, tokens, xc))

    assert logits.shape == (B, T, n_vocab), logits.shape
    assert bool(jnp.all(jnp.isfinite(logits)))
    print("KERNEL_OK")
</pallas_src>

<mosaic_0001>
module attributes {stable_mosaic.version = 11 : i64} {
  func.func @_ln_linear_kernel(%arg0: i32, %arg1: i32, %arg2: memref<16x128xf32, #tpu.memory_space<vmem>>, %arg3: memref<1x128xf32, #tpu.memory_space<vmem>>, %arg4: memref<1x128xf32, #tpu.memory_space<vmem>>, %arg5: memref<128x384xbf16, #tpu.memory_space<vmem>>, %arg6: memref<1x384xf32, #tpu.memory_space<vmem>>, %arg7: memref<16x384xbf16, #tpu.memory_space<vmem>>, %arg8: memref<16x128xbf16, #tpu.memory_space<vmem>>) attributes {dimension_semantics = [#tpu.dimension_semantics<parallel>, #tpu.dimension_semantics<arbitrary>], iteration_bounds = array<i64: 1, 1>, scalar_prefetch = 0 : i64, scratch_operands = 1 : i64, tpu.core_type = #tpu.core_type<tc>, window_params = [{transform_indices = @transform_0, window_bounds = array<i64: 16, 128>}, {pipeline_mode = #tpu.pipeline_mode<synchronous>, transform_indices = @transform_1, window_bounds = array<i64: 1, 128>}, {pipeline_mode = #tpu.pipeline_mode<synchronous>, transform_indices = @transform_2, window_bounds = array<i64: 1, 128>}, {transform_indices = @transform_3, window_bounds = array<i64: 128, 384>}, {transform_indices = @transform_4, window_bounds = array<i64: 1, 384>}, {transform_indices = @transform_5, window_bounds = array<i64: 16, 384>}]} {
    %c0_i32 = arith.constant 0 : i32
    %0 = arith.cmpi eq, %arg1, %c0_i32 : i32
    %1 = arith.extui %0 : i1 to i32
    %c0_i32_0 = arith.constant 0 : i32
    %2 = arith.cmpi ne, %1, %c0_i32_0 : i32
    scf.if %2 {
      %c0_8 = arith.constant 0 : index
      %c0_9 = arith.constant 0 : index
      %11 = vector.load %arg2[%c0_8, %c0_9] : memref<16x128xf32, #tpu.memory_space<vmem>>, vector<16x128xf32>
      %c0_10 = arith.constant 0 : index
      %c0_11 = arith.constant 0 : index
      %12 = vector.load %arg3[%c0_10, %c0_11] : memref<1x128xf32, #tpu.memory_space<vmem>>, vector<1x128xf32>
      %c0_12 = arith.constant 0 : index
      %c0_13 = arith.constant 0 : index
      %13 = vector.load %arg4[%c0_12, %c0_13] : memref<1x128xf32, #tpu.memory_space<vmem>>, vector<1x128xf32>
      %cst_14 = arith.constant dense<0.000000e+00> : vector<16xf32>
      %14 = vector.multi_reduction <add>, %11, %cst_14 [1] : vector<16x128xf32> to vector<16xf32>
      %15 = vector.shape_cast %14 : vector<16xf32> to vector<16x1xf32>
      %cst_15 = arith.constant 1.280000e+02 : f32
      %16 = vector.broadcast %cst_15 : f32 to vector<16x1xf32>
      %17 = arith.divf %15, %16 : vector<16x1xf32>
      %18 = vector.broadcast %17 : vector<16x1xf32> to vector<16x128xf32>
      %19 = arith.subf %11, %18 : vector<16x128xf32>
      %20 = arith.mulf %19, %19 : vector<16x128xf32>
      %cst_16 = arith.constant dense<0.000000e+00> : vector<16xf32>
      %21 = vector.multi_reduction <add>, %20, %cst_16 [1] : vector<16x128xf32> to vector<16xf32>
      %22 = vector.shape_cast %21 : vector<16xf32> to vector<16x1xf32>
      %cst_17 = arith.constant 1.280000e+02 : f32
      %23 = vector.broadcast %cst_17 : f32 to vector<16x1xf32>
      %24 = arith.divf %22, %23 : vector<16x1xf32>
      %cst_18 = arith.constant 9.99999974E-6 : f32
      %25 = vector.broadcast %cst_18 : f32 to vector<16x1xf32>
      %26 = arith.addf %24, %25 : vector<16x1xf32>
      %27 = math.rsqrt %26 : vector<16x1xf32>
      %28 = vector.broadcast %27 : vector<16x1xf32> to vector<16x128xf32>
      %29 = arith.mulf %19, %28 : vector<16x128xf32>
      %30 = vector.broadcast %12 : vector<1x128xf32> to vector<16x128xf32>
      %31 = arith.mulf %29, %30 : vector<16x128xf32>
      %32 = vector.broadcast %13 : vector<1x128xf32> to vector<16x128xf32>
      %33 = arith.addf %31, %32 : vector<16x128xf32>
      %34 = arith.truncf %33 : vector<16x128xf32> to vector<16x128xbf16>
      %c0_19 = arith.constant 0 : index
      %c0_20 = arith.constant 0 : index
      %35 = vector.load %arg8[%c0_19, %c0_20] : memref<16x128xbf16, #tpu.memory_space<vmem>>, vector<16x128xbf16>
      tpu.vector_store %arg8[%c0_19, %c0_20], %34 {strides = array<i32>} : memref<16x128xbf16, #tpu.memory_space<vmem>>, vector<16x128xbf16>,
    } else {
    }
    %c0 = arith.constant 0 : index
    %c0_1 = arith.constant 0 : index
    %3 = vector.load %arg8[%c0, %c0_1] : memref<16x128xbf16, #tpu.memory_space<vmem>>, vector<16x128xbf16>
    %c0_2 = arith.constant 0 : index
    %c0_3 = arith.constant 0 : index
    %4 = vector.load %arg5[%c0_2, %c0_3] : memref<128x384xbf16, #tpu.memory_space<vmem>>, vector<128x384xbf16>
    %cst = arith.constant dense<0.000000e+00> : vector<16x384xf32>
    %5 = tpu.matmul %3, %4, %cst {dimension_numbers = #tpu.dot_dimension_numbers<[1], [0], [0], [1], [0, 0, 1, 1], [], []>} : vector<16x128xbf16>, vector<128x384xbf16>, vector<16x384xf32> -> vector<16x384xf32>
    %c0_4 = arith.constant 0 : index
    %c0_5 = arith.constant 0 : index
    %6 = vector.load %arg6[%c0_4, %c0_5] : memref<1x384xf32, #tpu.memory_space<vmem>>, vector<1x384xf32>
    %7 = vector.broadcast %6 : vector<1x384xf32> to vector<16x384xf32>
    %8 = arith.addf %5, %7 : vector<16x384xf32>
    %9 = arith.truncf %8 : vector<16x384xf32> to vector<16x384xbf16>
    %c0_6 = arith.constant 0 : index
    %c0_7 = arith.constant 0 : index
    %10 = vector.load %arg7[%c0_6, %c0_7] : memref<16x384xbf16, #tpu.memory_space<vmem>>, vector<16x384xbf16>
    tpu.vector_store %arg7[%c0_6, %c0_7], %9 {strides = array<i32>} : memref<16x384xbf16, #tpu.memory_space<vmem>>, vector<16x384xbf16>,
    return
  }
  func.func @transform_0(%arg0: i32, %arg1: i32) -> (i32, i32) {
    %c0_i32 = arith.constant 0 : i32
    %c0_i32_0 = arith.constant 0 : i32
    return %arg0, %c0_i32 : i32, i32
  }
  func.func @transform_1(%arg0: i32, %arg1: i32) -> (i32, i32) {
    %c0_i32 = arith.constant 0 : i32
    %c0_i32_0 = arith.constant 0 : i32
    %c0_i32_1 = arith.constant 0 : i32
    return %c0_i32, %c0_i32_0 : i32, i32
  }
  func.func @transform_2(%arg0: i32, %arg1: i32) -> (i32, i32) {
    %c0_i32 = arith.constant 0 : i32
    %c0_i32_0 = arith.constant 0 : i32
    %c0_i32_1 = arith.constant 0 : i32
    return %c0_i32, %c0_i32_0 : i32, i32
  }
  func.func @transform_3(%arg0: i32, %arg1: i32) -> (i32, i32) {
    %c0_i32 = arith.constant 0 : i32
    %c0_i32_0 = arith.constant 0 : i32
    return %c0_i32, %arg1 : i32, i32
  }
  func.func @transform_4(%arg0: i32, %arg1: i32) -> (i32, i32) {
    %c0_i32 = arith.constant 0 : i32
    %c0_i32_0 = arith.constant 0 : i32
    return %c0_i32, %arg1 : i32, i32
  }
  func.func @transform_5(%arg0: i32, %arg1: i32) -> (i32, i32) {
    %c0_i32 = arith.constant 0 : i32
    return %arg0, %arg1 : i32, i32
  }
}

module attributes {stable_mosaic.version = 11 : i64} {
  func.func @_flash_attn_kernel(%arg0: i32, %arg1: i32, %arg2: i32, %arg3: i32, %arg4: memref<1x8x128xbf16, #tpu.memory_space<vmem>>, %arg5: memref<1x8x128xbf16, #tpu.memory_space<vmem>>, %arg6: memref<1x8x128xbf16, #tpu.memory_space<vmem>>, %arg7: memref<1x8x128xbf16, #tpu.memory_space<vmem>>, %arg8: memref<2x8x1xf32, #tpu.memory_space<vmem>>, %arg9: memref<2x8x1xf32, #tpu.memory_space<vmem>>, %arg10: memref<2x8x64xf32, #tpu.memory_space<vmem>>) attributes {dimension_semantics = [#tpu.dimension_semantics<parallel>, #tpu.dimension_semantics<parallel>, #tpu.dimension_semantics<parallel>, #tpu.dimension_semantics<arbitrary>], iteration_bounds = array<i64: 2, 1, 1, 1>, scalar_prefetch = 0 : i64, scratch_operands = 3 : i64, tpu.core_type = #tpu.core_type<tc>, window_params = [{transform_indices = @transform_0, window_bounds = array<i64: 1, 8, 128>}, {transform_indices = @transform_1, window_bounds = array<i64: 1, 8, 128>}, {transform_indices = @transform_2, window_bounds = array<i64: 1, 8, 128>}, {transform_indices = @transform_3, window_bounds = array<i64: 1, 8, 128>}]} {
    %c0_i32 = arith.constant 0 : i32
    %0 = arith.cmpi eq, %arg3, %c0_i32 : i32
    %1 = arith.extui %0 : i1 to i32
    %c0_i32_0 = arith.constant 0 : i32
    %2 = arith.cmpi ne, %1, %c0_i32_0 : i32
    scf.if %2 {
      %cst = arith.constant -1.000000e+30 : f32
      %12 = vector.broadcast %cst : f32 to vector<2x8x1xf32>
      %c0 = arith.constant 0 : index
      %c0_5 = arith.constant 0 : index
      %c0_6 = arith.constant 0 : index
      %13 = vector.load %arg8[%c0, %c0_5, %c0_6] : memref<2x8x1xf32, #tpu.memory_space<vmem>>, vector<2x8x1xf32>
      tpu.vector_store %arg8[%c0, %c0_5, %c0_6], %12 {strides = array<i32>} : memref<2x8x1xf32, #tpu.memory_space<vmem>>, vector<2x8x1xf32>,
      %cst_7 = arith.constant 0.000000e+00 : f32
      %14 = vector.broadcast %cst_7 : f32 to vector<2x8x1xf32>
      %c0_8 = arith.constant 0 : index
      %c0_9 = arith.constant 0 : index
      %c0_10 = arith.constant 0 : index
      %15 = vector.load %arg9[%c0_8, %c0_9, %c0_10] : memref<2x8x1xf32, #tpu.memory_space<vmem>>, vector<2x8x1xf32>
      tpu.vector_store %arg9[%c0_8, %c0_9, %c0_10], %14 {strides = array<i32>} : memref<2x8x1xf32, #tpu.memory_space<vmem>>, vector<2x8x1xf32>,
      %cst_11 = arith.constant 0.000000e+00 : f32
      %16 = vector.broadcast %cst_11 : f32 to vector<2x8x64xf32>
      %c0_12 = arith.constant 0 : index
      %c0_13 = arith.constant 0 : index
      %c0_14 = arith.constant 0 : index
      %17 = vector.load %arg10[%c0_12, %c0_13, %c0_14] : memref<2x8x64xf32, #tpu.memory_space<vmem>>, vector<2x8x64xf32>
      tpu.vector_store %arg10[%c0_12, %c0_13, %c0_14], %16 {strides = array<i32>} : memref<2x8x64xf32, #tpu.memory_space<vmem>>, vector<2x8x64xf32>,
    } else {
    }
    %c8_i32 = arith.constant 8 : i32
    %3 = arith.muli %arg2, %c8_i32 : i32
    %c7_i32 = arith.constant 7 : i32
    %4 = arith.addi %3, %c7_i32 : i32
    %c8_i32_1 = arith.constant 8 : i32
    %5 = arith.muli %arg3, %c8_i32_1 : i32
    %6 = arith.cmpi sge, %4, %5 : i32
    %7 = arith.extui %6 : i1 to i32
    %c0_i32_2 = arith.constant 0 : i32
    %8 = arith.cmpi ne, %7, %c0_i32_2 : i32
    scf.if %8 {
      %c0 = arith.constant 0 : index
      %c0_5 = arith.constant 0 : index
      %c0_6 = arith.constant 0 : index
      %12 = vector.load %arg4[%c0, %c0_5, %c0_6] : memref<1x8x128xbf16, #tpu.memory_space<vmem>>, vector<1x8x128xbf16>
      %13 = vector.shape_cast %12 : vector<1x8x128xbf16> to vector<8x128xbf16>
      %c0_7 = arith.constant 0 : index
      %c0_8 = arith.constant 0 : index
      %c0_9 = arith.constant 0 : index
      %14 = vector.load %arg5[%c0_7, %c0_8, %c0_9] : memref<1x8x128xbf16, #tpu.memory_space<vmem>>, vector<1x8x128xbf16>
      %15 = vector.shape_cast %14 : vector<1x8x128xbf16> to vector<8x128xbf16>
      %c0_10 = arith.constant 0 : index
      %c0_11 = arith.constant 0 : index
      %c0_12 = arith.constant 0 : index
      %16 = vector.load %arg6[%c0_10, %c0_11, %c0_12] : memref<1x8x128xbf16, #tpu.memory_space<vmem>>, vector<1x8x128xbf16>
      %17 = vector.shape_cast %16 : vector<1x8x128xbf16> to vector<8x128xbf16>
      %c8_i32_13 = arith.constant 8 : i32
      %18 = arith.muli %arg2, %c8_i32_13 : i32
      %19 = tpu.iota {dimensions = array<i32: 0>} : vector<8x8xi32>
      %20 = vector.broadcast %18 : i32 to vector<8x8xi32>
      %21 = arith.addi %20, %19 : vector<8x8xi32>
      %c8_i32_14 = arith.constant 8 : i32
      %22 = arith.muli %arg3, %c8_i32_14 : i32
      %23 = tpu.iota {dimensions = array<i32: 1>} : vector<8x8xi32>
      %24 = vector.broadcast %22 : i32 to vector<8x8xi32>
      %25 = arith.addi %24, %23 : vector<8x8xi32>
      %26 = arith.cmpi sle, %25, %21 : vector<8x8xi32>
      %27 = vector.extract_strided_slice %13 {offsets = [0, 0], sizes = [8, 64], strides = [1, 1]} : vector<8x128xbf16> to vector<8x64xbf16>
      %28 = vector.extract_strided_slice %15 {offsets = [0, 0], sizes = [8, 64], strides = [1, 1]} : vector<8x128xbf16> to vector<8x64xbf16>
      %cst = arith.constant dense<0.000000e+00> : vector<8x8xf32>
      %29 = tpu.matmul %27, %28, %cst {dimension_numbers = #tpu.dot_dimension_numbers<[1], [1], [0], [0], [0, 0, 1, 0], [], []>} : vector<8x64xbf16>, vector<8x64xbf16>, vector<8x8xf32> -> vector<8x8xf32>
      %cst_15 = arith.constant -1.000000e+30 : f32
      %30 = vector.broadcast %cst_15 : f32 to vector<8x8xf32>
      %31 = arith.select %26, %29, %30 : vector<8x8xi1>, vector<8x8xf32>
      %c0_16 = arith.constant 0 : index
      %c0_17 = arith.constant 0 : index
      %c0_18 = arith.constant 0 : index
      %32 = vector.load %arg8[%c0_16, %c0_17, %c0_18] : memref<2x8x1xf32, #tpu.memory_space<vmem>>, vector<1x8x1xf32>
      %33 = vector.shape_cast %32 : vector<1x8x1xf32> to vector<8x1xf32>
      %cst_19 = arith.constant dense<0xFF800000> : vector<8xf32>
      %34 = vector.multi_reduction <maximumf>, %31, %cst_19 [1] : vector<8x8xf32> to vector<8xf32>
      %35 = vector.shape_cast %34 : vector<8xf32> to vector<8x1xf32>
      %36 = arith.maximumf %33, %35 : vector<8x1xf32>
      %37 = arith.subf %33, %36 : vector<8x1xf32>
      %38 = math.exp %37 : vector<8x1xf32>
      %39 = vector.broadcast %36 : vector<8x1xf32> to vector<8x8xf32>
      %40 = arith.subf %31, %39 : vector<8x8xf32>
      %41 = math.exp %40 : vector<8x8xf32>
      %c0_20 = arith.constant 0 : index
      %c0_21 = arith.constant 0 : index
      %c0_22 = arith.constant 0 : index
      %42 = vector.load %arg9[%c0_20, %c0_21, %c0_22] : memref<2x8x1xf32, #tpu.memory_space<vmem>>, vector<1x8x1xf32>
      %43 = vector.shape_cast %42 : vector<1x8x1xf32> to vector<8x1xf32>
      %44 = arith.mulf %38, %43 : vector<8x1xf32>
      %cst_23 = arith.constant dense<0.000000e+00> : vector<8xf32>
      %45 = vector.multi_reduction <add>, %41, %cst_23 [1] : vector<8x8xf32> to vector<8xf32>
      %46 = vector.shape_cast %45 : vector<8xf32> to vector<8x1xf32>
      %47 = arith.addf %44, %46 : vector<8x1xf32>
      %c0_24 = arith.constant 0 : index
      %c0_25 = arith.constant 0 : index
      %c0_26 = arith.constant 0 : index
      %48 = vector.load %arg9[%c0_24, %c0_25, %c0_26] : memref<2x8x1xf32, #tpu.memory_space<vmem>>, vector<1x8x1xf32>
      %49 = vector.shape_cast %48 : vector<1x8x1xf32> to vector<8x1xf32>
      %50 = vector.shape_cast %47 : vector<8x1xf32> to vector<1x8x1xf32>
      tpu.vector_store %arg9[%c0_24, %c0_25, %c0_26], %50 {strides = array<i32>} : memref<2x8x1xf32, #tpu.memory_space<vmem>>, vector<1x8x1xf32>,
      %c0_27 = arith.constant 0 : index
      %c0_28 = arith.constant 0 : index
      %c0_29 = arith.constant 0 : index
      %51 = vector.load %arg10[%c0_27, %c0_28, %c0_29] : memref<2x8x64xf32, #tpu.memory_space<vmem>>, vector<1x8x64xf32>
      %52 = vector.shape_cast %51 : vector<1x8x64xf32> to vector<8x64xf32>
      %53 = vector.broadcast %38 : vector<8x1xf32> to vector<8x64xf32>
      %54 = arith.mulf %53, %52 : vector<8x64xf32>
      %55 = arith.truncf %41 : vector<8x8xf32> to vector<8x8xbf16>
      %56 = vector.extract_strided_slice %17 {offsets = [0, 0], sizes = [8, 64], strides = [1, 1]} : vector<8x128xbf16> to vector<8x64xbf16>
      %cst_30 = arith.constant dense<0.000000e+00> : vector<8x64xf32>
      %57 = tpu.matmul %55, %56, %cst_30 {dimension_numbers = #tpu.dot_dimension_numbers<[1], [0], [0], [1], [0, 0, 1, 1], [], []>} : vector<8x8xbf16>, vector<8x64xbf16>, vector<8x64xf32> -> vector<8x64xf32>
      %58 = arith.addf %54, %57 : vector<8x64xf32>
      %c0_31 = arith.constant 0 : index
      %c0_32 = arith.constant 0 : index
      %c0_33 = arith.constant 0 : index
      %59 = vector.load %arg10[%c0_31, %c0_32, %c0_33] : memref<2x8x64xf32, #tpu.memory_space<vmem>>, vector<1x8x64xf32>
      %60 = vector.shape_cast %59 : vector<1x8x64xf32> to vector<8x64xf32>
      %61 = vector.shape_cast %58 : vector<8x64xf32> to vector<1x8x64xf32>
      tpu.vector_store %arg10[%c0_31, %c0_32, %c0_33], %61 {strides = array<i32>} : memref<2x8x64xf32, #tpu.memory_space<vmem>>, vector<1x8x64xf32>,
      %c0_34 = arith.constant 0 : index
      %c0_35 = arith.constant 0 : index
      %c0_36 = arith.constant 0 : index
      %62 = vector.load %arg8[%c0_34, %c0_35, %c0_36] : memref<2x8x1xf32, #tpu.memory_space<vmem>>, vector<1x8x1xf32>
      %63 = vector.shape_cast %62 : vector<1x8x1xf32> to vector<8x1xf32>
      %64 = vector.shape_cast %36 : vector<8x1xf32> to vector<1x8x1xf32>
      tpu.vector_store %arg8[%c0_34, %c0_35, %c0_36], %64 {strides = array<i32>} : memref<2x8x1xf32, #tpu.memory_space<vmem>>, vector<1x8x1xf32>,
      %65 = vector.extract_strided_slice %13 {offsets = [0, 64], sizes = [8, 64], strides = [1, 1]} : vector<8x128xbf16> to vector<8x64xbf16>
      %66 = vector.extract_strided_slice %15 {offsets = [0, 64], sizes = [8, 64], strides = [1, 1]} : vector<8x128xbf16> to vector<8x64xbf16>
      %cst_37 = arith.constant dense<0.000000e+00> : vector<8x8xf32>
      %67 = tpu.matmul %65, %66, %cst_37 {dimension_numbers = #tpu.dot_dimension_numbers<[1], [1], [0], [0], [0, 0, 1, 0], [], []>} : vector<8x64xbf16>, vector<8x64xbf16>, vector<8x8xf32> -> vector<8x8xf32>
      %cst_38 = arith.constant -1.000000e+30 : f32
      %68 = vector.broadcast %cst_38 : f32 to vector<8x8xf32>
      %69 = arith.select %26, %67, %68 : vector<8x8xi1>, vector<8x8xf32>
      %c1 = arith.constant 1 : index
      %c0_39 = arith.constant 0 : index
      %c0_40 = arith.constant 0 : index
      %70 = vector.load %arg8[%c1, %c0_39, %c0_40] : memref<2x8x1xf32, #tpu.memory_space<vmem>>, vector<1x8x1xf32>
      %71 = vector.shape_cast %70 : vector<1x8x1xf32> to vector<8x1xf32>
      %cst_41 = arith.constant dense<0xFF800000> : vector<8xf32>
      %72 = vector.multi_reduction <maximumf>, %69, %cst_41 [1] : vector<8x8xf32> to vector<8xf32>
      %73 = vector.shape_cast %72 : vector<8xf32> to vector<8x1xf32>
      %74 = arith.maximumf %71, %73 : vector<8x1xf32>
      %75 = arith.subf %71, %74 : vector<8x1xf32>
      %76 = math.exp %75 : vector<8x1xf32>
      %77 = vector.broadcast %74 : vector<8x1xf32> to vector<8x8xf32>
      %78 = arith.subf %69, %77 : vector<8x8xf32>
      %79 = math.exp %78 : vector<8x8xf32>
      %c1_42 = arith.constant 1 : index
      %c0_43 = arith.constant 0 : index
      %c0_44 = arith.constant 0 : index
      %80 = vector.load %arg9[%c1_42, %c0_43, %c0_44] : memref<2x8x1xf32, #tpu.memory_space<vmem>>, vector<1x8x1xf32>
      %81 = vector.shape_cast %80 : vector<1x8x1xf32> to vector<8x1xf32>
      %82 = arith.mulf %76, %81 : vector<8x1xf32>
      %cst_45 = arith.constant dense<0.000000e+00> : vector<8xf32>
      %83 = vector.multi_reduction <add>, %79, %cst_45 [1] : vector<8x8xf32> to vector<8xf32>
      %84 = vector.shape_cast %83 : vector<8xf32> to vector<8x1xf32>
      %85 = arith.addf %82, %84 : vector<8x1xf32>
      %c1_46 = arith.constant 1 : index
      %c0_47 = arith.constant 0 : index
      %c0_48 = arith.constant 0 : index
      %86 = vector.load %arg9[%c1_46, %c0_47, %c0_48] : memref<2x8x1xf32, #tpu.memory_space<vmem>>, vector<1x8x1xf32>
      %87 = vector.shape_cast %86 : vector<1x8x1xf32> to vector<8x1xf32>
      %88 = vector.shape_cast %85 : vector<8x1xf32> to vector<1x8x1xf32>
      tpu.vector_store %arg9[%c1_46, %c0_47, %c0_48], %88 {strides = array<i32>} : memref<2x8x1xf32, #tpu.memory_space<vmem>>, vector<1x8x1xf32>,
      %c1_49 = arith.constant 1 : index
      %c0_50 = arith.constant 0 : index
      %c0_51 = arith.constant 0 : index
      %89 = vector.load %arg10[%c1_49, %c0_50, %c0_51] : memref<2x8x64xf32, #tpu.memory_space<vmem>>, vector<1x8x64xf32>
      %90 = vector.shape_cast %89 : vector<1x8x64xf32> to vector<8x64xf32>
      %91 = vector.broadcast %76 : vector<8x1xf32> to vector<8x64xf32>
      %92 = arith.mulf %91, %90 : vector<8x64xf32>
      %93 = arith.truncf %79 : vector<8x8xf32> to vector<8x8xbf16>
      %94 = vector.extract_strided_slice %17 {offsets = [0, 64], sizes = [8, 64], strides = [1, 1]} : vector<8x128xbf16> to vector<8x64xbf16>
      %cst_52 = arith.constant dense<0.000000e+00> : vector<8x64xf32>
      %95 = tpu.matmul %93, %94, %cst_52 {dimension_numbers = #tpu.dot_dimension_numbers<[1], [0], [0], [1], [0, 0, 1, 1], [], []>} : vector<8x8xbf16>, vector<8x64xbf16>, vector<8x64xf32> -> vector<8x64xf32>
      %96 = arith.addf %92, %95 : vector<8x64xf32>
      %c1_53 = arith.constant 1 : index
      %c0_54 = arith.constant 0 : index
      %c0_55 = arith.constant 0 : index
      %97 = vector.load %arg10[%c1_53, %c0_54, %c0_55] : memref<2x8x64xf32, #tpu.memory_space<vmem>>, vector<1x8x64xf32>
      %98 = vector.shape_cast %97 : vector<1x8x64xf32> to vector<8x64xf32>
      %99 = vector.shape_cast %96 : vector<8x64xf32> to vector<1x8x64xf32>
      tpu.vector_store %arg10[%c1_53, %c0_54, %c0_55], %99 {strides = array<i32>} : memref<2x8x64xf32, #tpu.memory_space<vmem>>, vector<1x8x64xf32>,
      %c1_56 = arith.constant 1 : index
      %c0_57 = arith.constant 0 : index
      %c0_58 = arith.constant 0 : index
      %100 = vector.load %arg8[%c1_56, %c0_57, %c0_58] : memref<2x8x1xf32, #tpu.memory_space<vmem>>, vector<1x8x1xf32>
      %101 = vector.shape_cast %100 : vector<1x8x1xf32> to vector<8x1xf32>
      %102 = vector.shape_cast %74 : vector<8x1xf32> to vector<1x8x1xf32>
      tpu.vector_store %arg8[%c1_56, %c0_57, %c0_58], %102 {strides = array<i32>} : memref<2x8x1xf32, #tpu.memory_space<vmem>>, vector<1x8x1xf32>,
    } else {
    }
    %c0_i32_3 = arith.constant 0 : i32
    %9 = arith.cmpi eq, %arg3, %c0_i32_3 : i32
    %10 = arith.extui %9 : i1 to i32
    %c0_i32_4 = arith.constant 0 : i32
    %11 = arith.cmpi ne, %10, %c0_i32_4 : i32
    scf.if %11 {
      %c0 = arith.constant 0 : index
      %c0_5 = arith.constant 0 : index
      %c0_6 = arith.constant 0 : index
      %12 = vector.load %arg10[%c0, %c0_5, %c0_6] : memref<2x8x64xf32, #tpu.memory_space<vmem>>, vector<1x8x64xf32>
      %13 = vector.shape_cast %12 : vector<1x8x64xf32> to vector<8x64xf32>
      %c0_7 = arith.constant 0 : index
      %c0_8 = arith.constant 0 : index
      %c0_9 = arith.constant 0 : index
      %14 = vector.load %arg9[%c0_7, %c0_8, %c0_9] : memref<2x8x1xf32, #tpu.memory_space<vmem>>, vector<1x8x1xf32>
      %15 = vector.shape_cast %14 : vector<1x8x1xf32> to vector<8x1xf32>
      %16 = tpu.reciprocal %15 {approx = true} : vector<8x1xf32> -> vector<8x1xf32>
      %17 = vector.broadcast %16 : vector<8x1xf32> to vector<8x64xf32>
      %18 = arith.mulf %13, %17 : vector<8x64xf32>
      %c1 = arith.constant 1 : index
      %c0_10 = arith.constant 0 : index
      %c0_11 = arith.constant 0 : index
      %19 = vector.load %arg10[%c1, %c0_10, %c0_11] : memref<2x8x64xf32, #tpu.memory_space<vmem>>, vector<1x8x64xf32>
      %20 = vector.shape_cast %19 : vector<1x8x64xf32> to vector<8x64xf32>
      %c1_12 = arith.constant 1 : index
      %c0_13 = arith.constant 0 : index
      %c0_14 = arith.constant 0 : index
      %21 = vector.load %arg9[%c1_12, %c0_13, %c0_14] : memref<2x8x1xf32, #tpu.memory_space<vmem>>, vector<1x8x1xf32>
      %22 = vector.shape_cast %21 : vector<1x8x1xf32> to vector<8x1xf32>
      %23 = tpu.reciprocal %22 {approx = true} : vector<8x1xf32> -> vector<8x1xf32>
      %24 = vector.broadcast %23 : vector<8x1xf32> to vector<8x64xf32>
      %25 = arith.mulf %20, %24 : vector<8x64xf32>
      %26 = tpu.concatenate %18, %25 in 1 : vector<8x64xf32>, vector<8x64xf32> -> vector<8x128xf32>
      %27 = arith.truncf %26 : vector<8x128xf32> to vector<8x128xbf16>
      %c0_15 = arith.constant 0 : index
      %c0_16 = arith.constant 0 : index
      %c0_17 = arith.constant 0 : index
      %28 = vector.load %arg7[%c0_15, %c0_16, %c0_17] : memref<1x8x128xbf16, #tpu.memory_space<vmem>>, vector<1x8x128xbf16>
      %29 = vector.shape_cast %28 : vector<1x8x128xbf16> to vector<8x128xbf16>
      %30 = vector.shape_cast %27 : vector<8x128xbf16> to vector<1x8x128xbf16>
      tpu.vector_store %arg7[%c0_15, %c0_16, %c0_17], %30 {strides = array<i32>} : memref<1x8x128xbf16, #tpu.memory_space<vmem>>, vector<1x8x128xbf16>,
    } else {
    }
    return
  }
  func.func @transform_0(%arg0: i32, %arg1: i32, %arg2: i32, %arg3: i32) -> (i32, i32, i32) {
    %c0_i32 = arith.constant 0 : i32
    return %arg0, %arg2, %arg1 : i32, i32, i32
  }
  func.func @transform_1(%arg0: i32, %arg1: i32, %arg2: i32, %arg3: i32) -> (i32, i32, i32) {
    %c1_i32 = arith.constant 1 : i32
    %0 = arith.addi %c1_i32, %arg1 : i32
    %c0_i32 = arith.constant 0 : i32
    return %arg0, %arg3, %0 : i32, i32, i32
  }
  func.func @transform_2(%arg0: i32, %arg1: i32, %arg2: i32, %arg3: i32) -> (i32, i32, i32) {
    %c2_i32 = arith.constant 2 : i32
    %0 = arith.addi %c2_i32, %arg1 : i32
    %c0_i32 = arith.constant 0 : i32
    return %arg0, %arg3, %0 : i32, i32, i32
  }
  func.func @transform_3(%arg0: i32, %arg1: i32, %arg2: i32, %arg3: i32) -> (i32, i32, i32) {
    %c0_i32 = arith.constant 0 : i32
    return %arg0, %arg2, %arg1 : i32, i32, i32
  }
}

module attributes {stable_mosaic.version = 11 : i64} {
  func.func @_ln_linear_kernel(%arg0: i32, %arg1: i32, %arg2: memref<16x128xf32, #tpu.memory_space<vmem>>, %arg3: memref<1x128xf32, #tpu.memory_space<vmem>>, %arg4: memref<1x128xf32, #tpu.memory_space<vmem>>, %arg5: memref<128x128xbf16, #tpu.memory_space<vmem>>, %arg6: memref<1x128xf32, #tpu.memory_space<vmem>>, %arg7: memref<16x128xbf16, #tpu.memory_space<vmem>>, %arg8: memref<16x128xbf16, #tpu.memory_space<vmem>>) attributes {dimension_semantics = [#tpu.dimension_semantics<parallel>, #tpu.dimension_semantics<arbitrary>], iteration_bounds = array<i64: 1, 1>, scalar_prefetch = 0 : i64, scratch_operands = 1 : i64, tpu.core_type = #tpu.core_type<tc>, window_params = [{transform_indices = @transform_0, window_bounds = array<i64: 16, 128>}, {pipeline_mode = #tpu.pipeline_mode<synchronous>, transform_indices = @transform_1, window_bounds = array<i64: 1, 128>}, {pipeline_mode = #tpu.pipeline_mode<synchronous>, transform_indices = @transform_2, window_bounds = array<i64: 1, 128>}, {transform_indices = @transform_3, window_bounds = array<i64: 128, 128>}, {transform_indices = @transform_4, window_bounds = array<i64: 1, 128>}, {transform_indices = @transform_5, window_bounds = array<i64: 16, 128>}]} {
    %c0_i32 = arith.constant 0 : i32
    %0 = arith.cmpi eq, %arg1, %c0_i32 : i32
    %1 = arith.extui %0 : i1 to i32
    %c0_i32_0 = arith.constant 0 : i32
    %2 = arith.cmpi ne, %1, %c0_i32_0 : i32
    scf.if %2 {
      %c0_8 = arith.constant 0 : index
      %c0_9 = arith.constant 0 : index
      %11 = vector.load %arg2[%c0_8, %c0_9] : memref<16x128xf32, #tpu.memory_space<vmem>>, vector<16x128xf32>
      %c0_10 = arith.constant 0 : index
      %c0_11 = arith.constant 0 : index
      %12 = vector.load %arg3[%c0_10, %c0_11] : memref<1x128xf32, #tpu.memory_space<vmem>>, vector<1x128xf32>
      %c0_12 = arith.constant 0 : index
      %c0_13 = arith.constant 0 : index
      %13 = vector.load %arg4[%c0_12, %c0_13] : memref<1x128xf32, #tpu.memory_space<vmem>>, vector<1x128xf32>
      %cst_14 = arith.constant dense<0.000000e+00> : vector<16xf32>
      %14 = vector.multi_reduction <add>, %11, %cst_14 [1] : vector<16x128xf32> to vector<16xf32>
      %15 = vector.shape_cast %14 : vector<16xf32> to vector<16x1xf32>
      %cst_15 = arith.constant 1.280000e+02 : f32
      %16 = vector.broadcast %cst_15 : f32 to vector<16x1xf32>
      %17 = arith.divf %15, %16 : vector<16x1xf32>
      %18 = vector.broadcast %17 : vector<16x1xf32> to vector<16x128xf32>
      %19 = arith.subf %11, %18 : vector<16x128xf32>
      %20 = arith.mulf %19, %19 : vector<16x128xf32>
      %cst_16 = arith.constant dense<0.000000e+00> : vector<16xf32>
      %21 = vector.multi_reduction <add>, %20, %cst_16 [1] : vector<16x128xf32> to vector<16xf32>
      %22 = vector.shape_cast %21 : vector<16xf32> to vector<16x1xf32>
      %cst_17 = arith.constant 1.280000e+02 : f32
      %23 = vector.broadcast %cst_17 : f32 to vector<16x1xf32>
      %24 = arith.divf %22, %23 : vector<16x1xf32>
      %cst_18 = arith.constant 9.99999974E-6 : f32
      %25 = vector.broadcast %cst_18 : f32 to vector<16x1xf32>
      %26 = arith.addf %24, %25 : vector<16x1xf32>
      %27 = math.rsqrt %26 : vector<16x1xf32>
      %28 = vector.broadcast %27 : vector<16x1xf32> to vector<16x128xf32>
      %29 = arith.mulf %19, %28 : vector<16x128xf32>
      %30 = vector.broadcast %12 : vector<1x128xf32> to vector<16x128xf32>
      %31 = arith.mulf %29, %30 : vector<16x128xf32>
      %32 = vector.broadcast %13 : vector<1x128xf32> to vector<16x128xf32>
      %33 = arith.addf %31, %32 : vector<16x128xf32>
      %34 = arith.truncf %33 : vector<16x128xf32> to vector<16x128xbf16>
      %c0_19 = arith.constant 0 : index
      %c0_20 = arith.constant 0 : index
      %35 = vector.load %arg8[%c0_19, %c0_20] : memref<16x128xbf16, #tpu.memory_space<vmem>>, vector<16x128xbf16>
      tpu.vector_store %arg8[%c0_19, %c0_20], %34 {strides = array<i32>} : memref<16x128xbf16, #tpu.memory_space<vmem>>, vector<16x128xbf16>,
    } else {
    }
    %c0 = arith.constant 0 : index
    %c0_1 = arith.constant 0 : index
    %3 = vector.load %arg8[%c0, %c0_1] : memref<16x128xbf16, #tpu.memory_space<vmem>>, vector<16x128xbf16>
    %c0_2 = arith.constant 0 : index
    %c0_3 = arith.constant 0 : index
    %4 = vector.load %arg5[%c0_2, %c0_3] : memref<128x128xbf16, #tpu.memory_space<vmem>>, vector<128x128xbf16>
    %cst = arith.constant dense<0.000000e+00> : vector<16x128xf32>
    %5 = tpu.matmul %3, %4, %cst {dimension_numbers = #tpu.dot_dimension_numbers<[1], [0], [0], [1], [0, 0, 1, 1], [], []>} : vector<16x128xbf16>, vector<128x128xbf16>, vector<16x128xf32> -> vector<16x128xf32>
    %c0_4 = arith.constant 0 : index
    %c0_5 = arith.constant 0 : index
    %6 = vector.load %arg6[%c0_4, %c0_5] : memref<1x128xf32, #tpu.memory_space<vmem>>, vector<1x128xf32>
    %7 = vector.broadcast %6 : vector<1x128xf32> to vector<16x128xf32>
    %8 = arith.addf %5, %7 : vector<16x128xf32>
    %9 = arith.truncf %8 : vector<16x128xf32> to vector<16x128xbf16>
    %c0_6 = arith.constant 0 : index
    %c0_7 = arith.constant 0 : index
    %10 = vector.load %arg7[%c0_6, %c0_7] : memref<16x128xbf16, #tpu.memory_space<vmem>>, vector<16x128xbf16>
    tpu.vector_store %arg7[%c0_6, %c0_7], %9 {strides = array<i32>} : memref<16x128xbf16, #tpu.memory_space<vmem>>, vector<16x128xbf16>,
    return
  }
  func.func @transform_0(%arg0: i32, %arg1: i32) -> (i32, i32) {
    %c0_i32 = arith.constant 0 : i32
    %c0_i32_0 = arith.constant 0 : i32
    return %arg0, %c0_i32 : i32, i32
  }
  func.func @transform_1(%arg0: i32, %arg1: i32) -> (i32, i32) {
    %c0_i32 = arith.constant 0 : i32
    %c0_i32_0 = arith.constant 0 : i32
    %c0_i32_1 = arith.constant 0 : i32
    return %c0_i32, %c0_i32_0 : i32, i32
  }
  func.func @transform_2(%arg0: i32, %arg1: i32) -> (i32, i32) {
    %c0_i32 = arith.constant 0 : i32
    %c0_i32_0 = arith.constant 0 : i32
    %c0_i32_1 = arith.constant 0 : i32
    return %c0_i32, %c0_i32_0 : i32, i32
  }
  func.func @transform_3(%arg0: i32, %arg1: i32) -> (i32, i32) {
    %c0_i32 = arith.constant 0 : i32
    %c0_i32_0 = arith.constant 0 : i32
    return %c0_i32, %arg1 : i32, i32
  }
  func.func @transform_4(%arg0: i32, %arg1: i32) -> (i32, i32) {
    %c0_i32 = arith.constant 0 : i32
    %c0_i32_0 = arith.constant 0 : i32
    return %c0_i32, %arg1 : i32, i32
  }
  func.func @transform_5(%arg0: i32, %arg1: i32) -> (i32, i32) {
    %c0_i32 = arith.constant 0 : i32
    return %arg0, %arg1 : i32, i32
  }
}

module attributes {stable_mosaic.version = 11 : i64} {
  func.func @_linear_resid_kernel(%arg0: i32, %arg1: i32, %arg2: memref<16x128xbf16, #tpu.memory_space<vmem>>, %arg3: memref<16x128xf32, #tpu.memory_space<vmem>>, %arg4: memref<128x128xbf16, #tpu.memory_space<vmem>>, %arg5: memref<1x128xf32, #tpu.memory_space<vmem>>, %arg6: memref<16x128xf32, #tpu.memory_space<vmem>>) attributes {dimension_semantics = [#tpu.dimension_semantics<parallel>, #tpu.dimension_semantics<parallel>], iteration_bounds = array<i64: 1, 1>, scalar_prefetch = 0 : i64, scratch_operands = 0 : i64, tpu.core_type = #tpu.core_type<tc>, window_params = [{transform_indices = @transform_0, window_bounds = array<i64: 16, 128>}, {transform_indices = @transform_1, window_bounds = array<i64: 16, 128>}, {transform_indices = @transform_2, window_bounds = array<i64: 128, 128>}, {transform_indices = @transform_3, window_bounds = array<i64: 1, 128>}, {transform_indices = @transform_4, window_bounds = array<i64: 16, 128>}]} {
    %c0 = arith.constant 0 : index
    %c0_0 = arith.constant 0 : index
    %0 = vector.load %arg3[%c0, %c0_0] : memref<16x128xf32, #tpu.memory_space<vmem>>, vector<16x128xf32>
    %c0_1 = arith.constant 0 : index
    %c0_2 = arith.constant 0 : index
    %1 = vector.load %arg2[%c0_1, %c0_2] : memref<16x128xbf16, #tpu.memory_space<vmem>>, vector<16x128xbf16>
    %c0_3 = arith.constant 0 : index
    %c0_4 = arith.constant 0 : index
    %2 = vector.load %arg4[%c0_3, %c0_4] : memref<128x128xbf16, #tpu.memory_space<vmem>>, vector<128x128xbf16>
    %cst = arith.constant dense<0.000000e+00> : vector<16x128xf32>
    %3 = tpu.matmul %1, %2, %cst {dimension_numbers = #tpu.dot_dimension_numbers<[1], [0], [0], [1], [0, 0, 1, 1], [], []>} : vector<16x128xbf16>, vector<128x128xbf16>, vector<16x128xf32> -> vector<16x128xf32>
    %4 = arith.addf %0, %3 : vector<16x128xf32>
    %c0_5 = arith.constant 0 : index
    %c0_6 = arith.constant 0 : index
    %5 = vector.load %arg5[%c0_5, %c0_6] : memref<1x128xf32, #tpu.memory_space<vmem>>, vector<1x128xf32>
    %6 = vector.broadcast %5 : vector<1x128xf32> to vector<16x128xf32>
    %7 = arith.addf %4, %6 : vector<16x128xf32>
    %c0_7 = arith.constant 0 : index
    %c0_8 = arith.constant 0 : index
    %8 = vector.load %arg6[%c0_7, %c0_8] : memref<16x128xf32, #tpu.memory_space<vmem>>, vector<16x128xf32>
    tpu.vector_store %arg6[%c0_7, %c0_8], %7 {strides = array<i32>} : memref<16x128xf32, #tpu.memory_space<vmem>>, vector<16x128xf32>,
    return
  }
  func.func @transform_0(%arg0: i32, %arg1: i32) -> (i32, i32) {
    %c0_i32 = arith.constant 0 : i32
    %c0_i32_0 = arith.constant 0 : i32
    return %arg0, %c0_i32 : i32, i32
  }
  func.func @transform_1(%arg0: i32, %arg1: i32) -> (i32, i32) {
    %c0_i32 = arith.constant 0 : i32
    return %arg0, %arg1 : i32, i32
  }
  func.func @transform_2(%arg0: i32, %arg1: i32) -> (i32, i32) {
    %c0_i32 = arith.constant 0 : i32
    %c0_i32_0 = arith.constant 0 : i32
    return %c0_i32, %arg1 : i32, i32
  }
  func.func @transform_3(%arg0: i32, %arg1: i32) -> (i32, i32) {
    %c0_i32 = arith.constant 0 : i32
    %c0_i32_0 = arith.constant 0 : i32
    return %c0_i32, %arg1 : i32, i32
  }
  func.func @transform_4(%arg0: i32, %arg1: i32) -> (i32, i32) {
    %c0_i32 = arith.constant 0 : i32
    return %arg0, %arg1 : i32, i32
  }
}

module attributes {stable_mosaic.version = 11 : i64} {
  func.func @_linear_kernel(%arg0: i32, %arg1: i32, %arg2: memref<16x128xf32, #tpu.memory_space<vmem>>, %arg3: memref<128x256xbf16, #tpu.memory_space<vmem>>, %arg4: memref<1x256xf32, #tpu.memory_space<vmem>>, %arg5: memref<16x256xbf16, #tpu.memory_space<vmem>>) attributes {dimension_semantics = [#tpu.dimension_semantics<parallel>, #tpu.dimension_semantics<parallel>], iteration_bounds = array<i64: 1, 1>, scalar_prefetch = 0 : i64, scratch_operands = 0 : i64, tpu.core_type = #tpu.core_type<tc>, window_params = [{transform_indices = @transform_0, window_bounds = array<i64: 16, 128>}, {transform_indices = @transform_1, window_bounds = array<i64: 128, 256>}, {transform_indices = @transform_2, window_bounds = array<i64: 1, 256>}, {transform_indices = @transform_3, window_bounds = array<i64: 16, 256>}]} {
    %c0 = arith.constant 0 : index
    %c0_0 = arith.constant 0 : index
    %0 = vector.load %arg2[%c0, %c0_0] : memref<16x128xf32, #tpu.memory_space<vmem>>, vector<16x128xf32>
    %1 = arith.truncf %0 : vector<16x128xf32> to vector<16x128xbf16>
    %c0_1 = arith.constant 0 : index
    %c0_2 = arith.constant 0 : index
    %2 = vector.load %arg3[%c0_1, %c0_2] : memref<128x256xbf16, #tpu.memory_space<vmem>>, vector<128x256xbf16>
    %cst = arith.constant dense<0.000000e+00> : vector<16x256xf32>
    %3 = tpu.matmul %1, %2, %cst {dimension_numbers = #tpu.dot_dimension_numbers<[1], [0], [0], [1], [0, 0, 1, 1], [], []>} : vector<16x128xbf16>, vector<128x256xbf16>, vector<16x256xf32> -> vector<16x256xf32>
    %c0_3 = arith.constant 0 : index
    %c0_4 = arith.constant 0 : index
    %4 = vector.load %arg4[%c0_3, %c0_4] : memref<1x256xf32, #tpu.memory_space<vmem>>, vector<1x256xf32>
    %5 = vector.broadcast %4 : vector<1x256xf32> to vector<16x256xf32>
    %6 = arith.addf %3, %5 : vector<16x256xf32>
    %7 = arith.truncf %6 : vector<16x256xf32> to vector<16x256xbf16>
    %c0_5 = arith.constant 0 : index
    %c0_6 = arith.constant 0 : index
    %8 = vector.load %arg5[%c0_5, %c0_6] : memref<16x256xbf16, #tpu.memory_space<vmem>>, vector<16x256xbf16>
    tpu.vector_store %arg5[%c0_5, %c0_6], %7 {strides = array<i32>} : memref<16x256xbf16, #tpu.memory_space<vmem>>, vector<16x256xbf16>,
    return
  }
  func.func @transform_0(%arg0: i32, %arg1: i32) -> (i32, i32) {
    %c0_i32 = arith.constant 0 : i32
    %c0_i32_0 = arith.constant 0 : i32
    return %arg0, %c0_i32 : i32, i32
  }
  func.func @transform_1(%arg0: i32, %arg1: i32) -> (i32, i32) {
    %c0_i32 = arith.constant 0 : i32
    %c0_i32_0 = arith.constant 0 : i32
    return %c0_i32, %arg1 : i32, i32
  }
  func.func @transform_2(%arg0: i32, %arg1: i32) -> (i32, i32) {
    %c0_i32 = arith.constant 0 : i32
    %c0_i32_0 = arith.constant 0 : i32
    return %c0_i32, %arg1 : i32, i32
  }
  func.func @transform_3(%arg0: i32, %arg1: i32) -> (i32, i32) {
    %c0_i32 = arith.constant 0 : i32
    return %arg0, %arg1 : i32, i32
  }
}

module attributes {stable_mosaic.version = 11 : i64} {
  func.func @_ln_mlp_kernel(%arg0: i32, %arg1: i32, %arg2: memref<16x128xf32, #tpu.memory_space<vmem>>, %arg3: memref<1x128xf32, #tpu.memory_space<vmem>>, %arg4: memref<1x128xf32, #tpu.memory_space<vmem>>, %arg5: memref<128x512xbf16, #tpu.memory_space<vmem>>, %arg6: memref<1x512xf32, #tpu.memory_space<vmem>>, %arg7: memref<512x128xbf16, #tpu.memory_space<vmem>>, %arg8: memref<1x128xf32, #tpu.memory_space<vmem>>, %arg9: memref<16x128xf32, #tpu.memory_space<vmem>>, %arg10: memref<16x128xbf16, #tpu.memory_space<vmem>>, %arg11: memref<16x128xf32, #tpu.memory_space<vmem>>) attributes {dimension_semantics = [#tpu.dimension_semantics<parallel>, #tpu.dimension_semantics<arbitrary>], iteration_bounds = array<i64: 1, 1>, scalar_prefetch = 0 : i64, scratch_operands = 2 : i64, tpu.core_type = #tpu.core_type<tc>, window_params = [{transform_indices = @transform_0, window_bounds = array<i64: 16, 128>}, {pipeline_mode = #tpu.pipeline_mode<synchronous>, transform_indices = @transform_1, window_bounds = array<i64: 1, 128>}, {pipeline_mode = #tpu.pipeline_mode<synchronous>, transform_indices = @transform_2, window_bounds = array<i64: 1, 128>}, {transform_indices = @transform_3, window_bounds = array<i64: 128, 512>}, {transform_indices = @transform_4, window_bounds = array<i64: 1, 512>}, {transform_indices = @transform_5, window_bounds = array<i64: 512, 128>}, {pipeline_mode = #tpu.pipeline_mode<synchronous>, transform_indices = @transform_6, window_bounds = array<i64: 1, 128>}, {transform_indices = @transform_7, window_bounds = array<i64: 16, 128>}]} {
    %c0_i32 = arith.constant 0 : i32
    %0 = arith.cmpi eq, %arg1, %c0_i32 : i32
    %1 = arith.extui %0 : i1 to i32
    %c0_i32_0 = arith.constant 0 : i32
    %2 = arith.cmpi ne, %1, %c0_i32_0 : i32
    scf.if %2 {
      %c0_19 = arith.constant 0 : index
      %c0_20 = arith.constant 0 : index
      %31 = vector.load %arg2[%c0_19, %c0_20] : memref<16x128xf32, #tpu.memory_space<vmem>>, vector<16x128xf32>
      %c0_21 = arith.constant 0 : index
      %c0_22 = arith.constant 0 : index
      %32 = vector.load %arg3[%c0_21, %c0_22] : memref<1x128xf32, #tpu.memory_space<vmem>>, vector<1x128xf32>
      %c0_23 = arith.constant 0 : index
      %c0_24 = arith.constant 0 : index
      %33 = vector.load %arg4[%c0_23, %c0_24] : memref<1x128xf32, #tpu.memory_space<vmem>>, vector<1x128xf32>
      %cst_25 = arith.constant dense<0.000000e+00> : vector<16xf32>
      %34 = vector.multi_reduction <add>, %31, %cst_25 [1] : vector<16x128xf32> to vector<16xf32>
      %35 = vector.shape_cast %34 : vector<16xf32> to vector<16x1xf32>
      %cst_26 = arith.constant 1.280000e+02 : f32
      %36 = vector.broadcast %cst_26 : f32 to vector<16x1xf32>
      %37 = arith.divf %35, %36 : vector<16x1xf32>
      %38 = vector.broadcast %37 : vector<16x1xf32> to vector<16x128xf32>
      %39 = arith.subf %31, %38 : vector<16x128xf32>
      %40 = arith.mulf %39, %39 : vector<16x128xf32>
      %cst_27 = arith.constant dense<0.000000e+00> : vector<16xf32>
      %41 = vector.multi_reduction <add>, %40, %cst_27 [1] : vector<16x128xf32> to vector<16xf32>
      %42 = vector.shape_cast %41 : vector<16xf32> to vector<16x1xf32>
      %cst_28 = arith.constant 1.280000e+02 : f32
      %43 = vector.broadcast %cst_28 : f32 to vector<16x1xf32>
      %44 = arith.divf %42, %43 : vector<16x1xf32>
      %cst_29 = arith.constant 9.99999974E-6 : f32
      %45 = vector.broadcast %cst_29 : f32 to vector<16x1xf32>
      %46 = arith.addf %44, %45 : vector<16x1xf32>
      %47 = math.rsqrt %46 : vector<16x1xf32>
      %48 = vector.broadcast %47 : vector<16x1xf32> to vector<16x128xf32>
      %49 = arith.mulf %39, %48 : vector<16x128xf32>
      %50 = vector.broadcast %32 : vector<1x128xf32> to vector<16x128xf32>
      %51 = arith.mulf %49, %50 : vector<16x128xf32>
      %52 = vector.broadcast %33 : vector<1x128xf32> to vector<16x128xf32>
      %53 = arith.addf %51, %52 : vector<16x128xf32>
      %54 = arith.truncf %53 : vector<16x128xf32> to vector<16x128xbf16>
      %c0_30 = arith.constant 0 : index
      %c0_31 = arith.constant 0 : index
      %55 = vector.load %arg10[%c0_30, %c0_31] : memref<16x128xbf16, #tpu.memory_space<vmem>>, vector<16x128xbf16>
      tpu.vector_store %arg10[%c0_30, %c0_31], %54 {strides = array<i32>} : memref<16x128xbf16, #tpu.memory_space<vmem>>, vector<16x128xbf16>,
      %cst_32 = arith.constant 0.000000e+00 : f32
      %56 = vector.broadcast %cst_32 : f32 to vector<16x128xf32>
      %c0_33 = arith.constant 0 : index
      %c0_34 = arith.constant 0 : index
      %57 = vector.load %arg11[%c0_33, %c0_34] : memref<16x128xf32, #tpu.memory_space<vmem>>, vector<16x128xf32>
      tpu.vector_store %arg11[%c0_33, %c0_34], %56 {strides = array<i32>} : memref<16x128xf32, #tpu.memory_space<vmem>>, vector<16x128xf32>,
    } else {
    }
    %c0 = arith.constant 0 : index
    %c0_1 = arith.constant 0 : index
    %3 = vector.load %arg10[%c0, %c0_1] : memref<16x128xbf16, #tpu.memory_space<vmem>>, vector<16x128xbf16>
    %c0_2 = arith.constant 0 : index
    %c0_3 = arith.constant 0 : index
    %4 = vector.load %arg5[%c0_2, %c0_3] : memref<128x512xbf16, #tpu.memory_space<vmem>>, vector<128x512xbf16>
    %cst = arith.constant dense<0.000000e+00> : vector<16x512xf32>
    %5 = tpu.matmul %3, %4, %cst {dimension_numbers = #tpu.dot_dimension_numbers<[1], [0], [0], [1], [0, 0, 1, 1], [], []>} : vector<16x128xbf16>, vector<128x512xbf16>, vector<16x512xf32> -> vector<16x512xf32>
    %c0_4 = arith.constant 0 : index
    %c0_5 = arith.constant 0 : index
    %6 = vector.load %arg6[%c0_4, %c0_5] : memref<1x512xf32, #tpu.memory_space<vmem>>, vector<1x512xf32>
    %7 = vector.broadcast %6 : vector<1x512xf32> to vector<16x512xf32>
    %8 = arith.addf %5, %7 : vector<16x512xf32>
    %cst_6 = arith.constant 5.000000e-01 : f32
    %9 = vector.broadcast %cst_6 : f32 to vector<16x512xf32>
    %10 = arith.mulf %9, %8 : vector<16x512xf32>
    %cst_7 = arith.constant 4.471500e-02 : f32
    %11 = vector.broadcast %cst_7 : f32 to vector<16x512xf32>
    %12 = arith.mulf %11, %8 : vector<16x512xf32>
    %13 = arith.mulf %12, %8 : vector<16x512xf32>
    %14 = arith.mulf %13, %8 : vector<16x512xf32>
    %15 = arith.addf %8, %14 : vector<16x512xf32>
    %cst_8 = arith.constant 0.797884583 : f32
    %16 = vector.broadcast %cst_8 : f32 to vector<16x512xf32>
    %17 = arith.mulf %16, %15 : vector<16x512xf32>
    %18 = math.tanh %17 : vector<16x512xf32>
    %cst_9 = arith.constant 1.000000e+00 : f32
    %19 = vector.broadcast %cst_9 : f32 to vector<16x512xf32>
    %20 = arith.addf %19, %18 : vector<16x512xf32>
    %21 = arith.mulf %10, %20 : vector<16x512xf32>
    %c0_10 = arith.constant 0 : index
    %c0_11 = arith.constant 0 : index
    %22 = vector.load %arg11[%c0_10, %c0_11] : memref<16x128xf32, #tpu.memory_space<vmem>>, vector<16x128xf32>
    %23 = arith.truncf %21 : vector<16x512xf32> to vector<16x512xbf16>
    %c0_12 = arith.constant 0 : index
    %c0_13 = arith.constant 0 : index
    %24 = vector.load %arg7[%c0_12, %c0_13] : memref<512x128xbf16, #tpu.memory_space<vmem>>, vector<512x128xbf16>
    %cst_14 = arith.constant dense<0.000000e+00> : vector<16x128xf32>
    %25 = tpu.matmul %23, %24, %cst_14 {dimension_numbers = #tpu.dot_dimension_numbers<[1], [0], [0], [1], [0, 0, 1, 1], [], []>} : vector<16x512xbf16>, vector<512x128xbf16>, vector<16x128xf32> -> vector<16x128xf32>
    %26 = arith.addf %22, %25 : vector<16x128xf32>
    %c0_15 = arith.constant 0 : index
    %c0_16 = arith.constant 0 : index
    %27 = vector.load %arg11[%c0_15, %c0_16] : memref<16x128xf32, #tpu.memory_space<vmem>>, vector<16x128xf32>
    tpu.vector_store %arg11[%c0_15, %c0_16], %26 {strides = array<i32>} : memref<16x128xf32, #tpu.memory_space<vmem>>, vector<16x128xf32>,
    %c0_i32_17 = arith.constant 0 : i32
    %28 = arith.cmpi eq, %arg1, %c0_i32_17 : i32
    %29 = arith.extui %28 : i1 to i32
    %c0_i32_18 = arith.constant 0 : i32
    %30 = arith.cmpi ne, %29, %c0_i32_18 : i32
    scf.if %30 {
      %c0_19 = arith.constant 0 : index
      %c0_20 = arith.constant 0 : index
      %31 = vector.load %arg2[%c0_19, %c0_20] : memref<16x128xf32, #tpu.memory_space<vmem>>, vector<16x128xf32>
      %c0_21 = arith.constant 0 : index
      %c0_22 = arith.constant 0 : index
      %32 = vector.load %arg11[%c0_21, %c0_22] : memref<16x128xf32, #tpu.memory_space<vmem>>, vector<16x128xf32>
      %33 = arith.addf %31, %32 : vector<16x128xf32>
      %c0_23 = arith.constant 0 : index
      %c0_24 = arith.constant 0 : index
      %34 = vector.load %arg8[%c0_23, %c0_24] : memref<1x128xf32, #tpu.memory_space<vmem>>, vector<1x128xf32>
      %35 = vector.broadcast %34 : vector<1x128xf32> to vector<16x128xf32>
      %36 = arith.addf %33, %35 : vector<16x128xf32>
      %c0_25 = arith.constant 0 : index
      %c0_26 = arith.constant 0 : index
      %37 = vector.load %arg9[%c0_25, %c0_26] : memref<16x128xf32, #tpu.memory_space<vmem>>, vector<16x128xf32>
      tpu.vector_store %arg9[%c0_25, %c0_26], %36 {strides = array<i32>} : memref<16x128xf32, #tpu.memory_space<vmem>>, vector<16x128xf32>,
    } else {
    }
    return
  }
  func.func @transform_0(%arg0: i32, %arg1: i32) -> (i32, i32) {
    %c0_i32 = arith.constant 0 : i32
    %c0_i32_0 = arith.constant 0 : i32
    return %arg0, %c0_i32 : i32, i32
  }
  func.func @transform_1(%arg0: i32, %arg1: i32) -> (i32, i32) {
    %c0_i32 = arith.constant 0 : i32
    %c0_i32_0 = arith.constant 0 : i32
    %c0_i32_1 = arith.constant 0 : i32
    return %c0_i32, %c0_i32_0 : i32, i32
  }
  func.func @transform_2(%arg0: i32, %arg1: i32) -> (i32, i32) {
    %c0_i32 = arith.constant 0 : i32
    %c0_i32_0 = arith.constant 0 : i32
    %c0_i32_1 = arith.constant 0 : i32
    return %c0_i32, %c0_i32_0 : i32, i32
  }
  func.func @transform_3(%arg0: i32, %arg1: i32) -> (i32, i32) {
    %c0_i32 = arith.constant 0 : i32
    %c0_i32_0 = arith.constant 0 : i32
    return %c0_i32, %arg1 : i32, i32
  }
  func.func @transform_4(%arg0: i32, %arg1: i32) -> (i32, i32) {
    %c0_i32 = arith.constant 0 : i32
    %c0_i32_0 = arith.constant 0 : i32
    return %c0_i32, %arg1 : i32, i32
  }
  func.func @transform_5(%arg0: i32, %arg1: i32) -> (i32, i32) {
    %c0_i32 = arith.constant 0 : i32
    %c0_i32_0 = arith.constant 0 : i32
    return %arg1, %c0_i32 : i32, i32
  }
  func.func @transform_6(%arg0: i32, %arg1: i32) -> (i32, i32) {
    %c0_i32 = arith.constant 0 : i32
    %c0_i32_0 = arith.constant 0 : i32
    %c0_i32_1 = arith.constant 0 : i32
    return %c0_i32, %c0_i32_0 : i32, i32
  }
  func.func @transform_7(%arg0: i32, %arg1: i32) -> (i32, i32) {
    %c0_i32 = arith.constant 0 : i32
    %c0_i32_0 = arith.constant 0 : i32
    return %arg0, %c0_i32 : i32, i32
  }
}

module attributes {stable_mosaic.version = 11 : i64} {
  func.func @_flash_attn_kernel(%arg0: i32, %arg1: i32, %arg2: i32, %arg3: i32, %arg4: memref<1x8x128xbf16, #tpu.memory_space<vmem>>, %arg5: memref<1x8x128xbf16, #tpu.memory_space<vmem>>, %arg6: memref<1x8x128xbf16, #tpu.memory_space<vmem>>, %arg7: memref<1x8x128xbf16, #tpu.memory_space<vmem>>, %arg8: memref<2x8x1xf32, #tpu.memory_space<vmem>>, %arg9: memref<2x8x1xf32, #tpu.memory_space<vmem>>, %arg10: memref<2x8x64xf32, #tpu.memory_space<vmem>>) attributes {dimension_semantics = [#tpu.dimension_semantics<parallel>, #tpu.dimension_semantics<parallel>, #tpu.dimension_semantics<parallel>, #tpu.dimension_semantics<arbitrary>], iteration_bounds = array<i64: 2, 1, 1, 1>, scalar_prefetch = 0 : i64, scratch_operands = 3 : i64, tpu.core_type = #tpu.core_type<tc>, window_params = [{transform_indices = @transform_0, window_bounds = array<i64: 1, 8, 128>}, {transform_indices = @transform_1, window_bounds = array<i64: 1, 8, 128>}, {transform_indices = @transform_2, window_bounds = array<i64: 1, 8, 128>}, {transform_indices = @transform_3, window_bounds = array<i64: 1, 8, 128>}]} {
    %c0_i32 = arith.constant 0 : i32
    %0 = arith.cmpi eq, %arg3, %c0_i32 : i32
    %1 = arith.extui %0 : i1 to i32
    %c0_i32_0 = arith.constant 0 : i32
    %2 = arith.cmpi ne, %1, %c0_i32_0 : i32
    scf.if %2 {
      %cst_53 = arith.constant -1.000000e+30 : f32
      %84 = vector.broadcast %cst_53 : f32 to vector<2x8x1xf32>
      %c0_54 = arith.constant 0 : index
      %c0_55 = arith.constant 0 : index
      %c0_56 = arith.constant 0 : index
      %85 = vector.load %arg8[%c0_54, %c0_55, %c0_56] : memref<2x8x1xf32, #tpu.memory_space<vmem>>, vector<2x8x1xf32>
      tpu.vector_store %arg8[%c0_54, %c0_55, %c0_56], %84 {strides = array<i32>} : memref<2x8x1xf32, #tpu.memory_space<vmem>>, vector<2x8x1xf32>,
      %cst_57 = arith.constant 0.000000e+00 : f32
      %86 = vector.broadcast %cst_57 : f32 to vector<2x8x1xf32>
      %c0_58 = arith.constant 0 : index
      %c0_59 = arith.constant 0 : index
      %c0_60 = arith.constant 0 : index
      %87 = vector.load %arg9[%c0_58, %c0_59, %c0_60] : memref<2x8x1xf32, #tpu.memory_space<vmem>>, vector<2x8x1xf32>
      tpu.vector_store %arg9[%c0_58, %c0_59, %c0_60], %86 {strides = array<i32>} : memref<2x8x1xf32, #tpu.memory_space<vmem>>, vector<2x8x1xf32>,
      %cst_61 = arith.constant 0.000000e+00 : f32
      %88 = vector.broadcast %cst_61 : f32 to vector<2x8x64xf32>
      %c0_62 = arith.constant 0 : index
      %c0_63 = arith.constant 0 : index
      %c0_64 = arith.constant 0 : index
      %89 = vector.load %arg10[%c0_62, %c0_63, %c0_64] : memref<2x8x64xf32, #tpu.memory_space<vmem>>, vector<2x8x64xf32>
      tpu.vector_store %arg10[%c0_62, %c0_63, %c0_64], %88 {strides = array<i32>} : memref<2x8x64xf32, #tpu.memory_space<vmem>>, vector<2x8x64xf32>,
    } else {
    }
    %c0 = arith.constant 0 : index
    %c0_1 = arith.constant 0 : index
    %c0_2 = arith.constant 0 : index
    %3 = vector.load %arg4[%c0, %c0_1, %c0_2] : memref<1x8x128xbf16, #tpu.memory_space<vmem>>, vector<1x8x128xbf16>
    %4 = vector.shape_cast %3 : vector<1x8x128xbf16> to vector<8x128xbf16>
    %c0_3 = arith.constant 0 : index
    %c0_4 = arith.constant 0 : index
    %c0_5 = arith.constant 0 : index
    %5 = vector.load %arg5[%c0_3, %c0_4, %c0_5] : memref<1x8x128xbf16, #tpu.memory_space<vmem>>, vector<1x8x128xbf16>
    %6 = vector.shape_cast %5 : vector<1x8x128xbf16> to vector<8x128xbf16>
    %c0_6 = arith.constant 0 : index
    %c0_7 = arith.constant 0 : index
    %c0_8 = arith.constant 0 : index
    %7 = vector.load %arg6[%c0_6, %c0_7, %c0_8] : memref<1x8x128xbf16, #tpu.memory_space<vmem>>, vector<1x8x128xbf16>
    %8 = vector.shape_cast %7 : vector<1x8x128xbf16> to vector<8x128xbf16>
    %9 = vector.extract_strided_slice %4 {offsets = [0, 0], sizes = [8, 64], strides = [1, 1]} : vector<8x128xbf16> to vector<8x64xbf16>
    %10 = vector.extract_strided_slice %6 {offsets = [0, 0], sizes = [8, 64], strides = [1, 1]} : vector<8x128xbf16> to vector<8x64xbf16>
    %cst = arith.constant dense<0.000000e+00> : vector<8x8xf32>
    %11 = tpu.matmul %9, %10, %cst {dimension_numbers = #tpu.dot_dimension_numbers<[1], [1], [0], [0], [0, 0, 1, 0], [], []>} : vector<8x64xbf16>, vector<8x64xbf16>, vector<8x8xf32> -> vector<8x8xf32>
    %c0_9 = arith.constant 0 : index
    %c0_10 = arith.constant 0 : index
    %c0_11 = arith.constant 0 : index
    %12 = vector.load %arg8[%c0_9, %c0_10, %c0_11] : memref<2x8x1xf32, #tpu.memory_space<vmem>>, vector<1x8x1xf32>
    %13 = vector.shape_cast %12 : vector<1x8x1xf32> to vector<8x1xf32>
    %cst_12 = arith.constant dense<0xFF800000> : vector<8xf32>
    %14 = vector.multi_reduction <maximumf>, %11, %cst_12 [1] : vector<8x8xf32> to vector<8xf32>
    %15 = vector.shape_cast %14 : vector<8xf32> to vector<8x1xf32>
    %16 = arith.maximumf %13, %15 : vector<8x1xf32>
    %17 = arith.subf %13, %16 : vector<8x1xf32>
    %18 = math.exp %17 : vector<8x1xf32>
    %19 = vector.broadcast %16 : vector<8x1xf32> to vector<8x8xf32>
    %20 = arith.subf %11, %19 : vector<8x8xf32>
    %21 = math.exp %20 : vector<8x8xf32>
    %c0_13 = arith.constant 0 : index
    %c0_14 = arith.constant 0 : index
    %c0_15 = arith.constant 0 : index
    %22 = vector.load %arg9[%c0_13, %c0_14, %c0_15] : memref<2x8x1xf32, #tpu.memory_space<vmem>>, vector<1x8x1xf32>
    %23 = vector.shape_cast %22 : vector<1x8x1xf32> to vector<8x1xf32>
    %24 = arith.mulf %18, %23 : vector<8x1xf32>
    %cst_16 = arith.constant dense<0.000000e+00> : vector<8xf32>
    %25 = vector.multi_reduction <add>, %21, %cst_16 [1] : vector<8x8xf32> to vector<8xf32>
    %26 = vector.shape_cast %25 : vector<8xf32> to vector<8x1xf32>
    %27 = arith.addf %24, %26 : vector<8x1xf32>
    %c0_17 = arith.constant 0 : index
    %c0_18 = arith.constant 0 : index
    %c0_19 = arith.constant 0 : index
    %28 = vector.load %arg9[%c0_17, %c0_18, %c0_19] : memref<2x8x1xf32, #tpu.memory_space<vmem>>, vector<1x8x1xf32>
    %29 = vector.shape_cast %28 : vector<1x8x1xf32> to vector<8x1xf32>
    %30 = vector.shape_cast %27 : vector<8x1xf32> to vector<1x8x1xf32>
    tpu.vector_store %arg9[%c0_17, %c0_18, %c0_19], %30 {strides = array<i32>} : memref<2x8x1xf32, #tpu.memory_space<vmem>>, vector<1x8x1xf32>,
    %c0_20 = arith.constant 0 : index
    %c0_21 = arith.constant 0 : index
    %c0_22 = arith.constant 0 : index
    %31 = vector.load %arg10[%c0_20, %c0_21, %c0_22] : memref<2x8x64xf32, #tpu.memory_space<vmem>>, vector<1x8x64xf32>
    %32 = vector.shape_cast %31 : vector<1x8x64xf32> to vector<8x64xf32>
    %33 = vector.broadcast %18 : vector<8x1xf32> to vector<8x64xf32>
    %34 = arith.mulf %33, %32 : vector<8x64xf32>
    %35 = arith.truncf %21 : vector<8x8xf32> to vector<8x8xbf16>
    %36 = vector.extract_strided_slice %8 {offsets = [0, 0], sizes = [8, 64], strides = [1, 1]} : vector<8x128xbf16> to vector<8x64xbf16>
    %cst_23 = arith.constant dense<0.000000e+00> : vector<8x64xf32>
    %37 = tpu.matmul %35, %36, %cst_23 {dimension_numbers = #tpu.dot_dimension_numbers<[1], [0], [0], [1], [0, 0, 1, 1], [], []>} : vector<8x8xbf16>, vector<8x64xbf16>, vector<8x64xf32> -> vector<8x64xf32>
    %38 = arith.addf %34, %37 : vector<8x64xf32>
    %c0_24 = arith.constant 0 : index
    %c0_25 = arith.constant 0 : index
    %c0_26 = arith.constant 0 : index
    %39 = vector.load %arg10[%c0_24, %c0_25, %c0_26] : memref<2x8x64xf32, #tpu.memory_space<vmem>>, vector<1x8x64xf32>
    %40 = vector.shape_cast %39 : vector<1x8x64xf32> to vector<8x64xf32>
    %41 = vector.shape_cast %38 : vector<8x64xf32> to vector<1x8x64xf32>
    tpu.vector_store %arg10[%c0_24, %c0_25, %c0_26], %41 {strides = array<i32>} : memref<2x8x64xf32, #tpu.memory_space<vmem>>, vector<1x8x64xf32>,
    %c0_27 = arith.constant 0 : index
    %c0_28 = arith.constant 0 : index
    %c0_29 = arith.constant 0 : index
    %42 = vector.load %arg8[%c0_27, %c0_28, %c0_29] : memref<2x8x1xf32, #tpu.memory_space<vmem>>, vector<1x8x1xf32>
    %43 = vector.shape_cast %42 : vector<1x8x1xf32> to vector<8x1xf32>
    %44 = vector.shape_cast %16 : vector<8x1xf32> to vector<1x8x1xf32>
    tpu.vector_store %arg8[%c0_27, %c0_28, %c0_29], %44 {strides = array<i32>} : memref<2x8x1xf32, #tpu.memory_space<vmem>>, vector<1x8x1xf32>,
    %45 = vector.extract_strided_slice %4 {offsets = [0, 64], sizes = [8, 64], strides = [1, 1]} : vector<8x128xbf16> to vector<8x64xbf16>
    %46 = vector.extract_strided_slice %6 {offsets = [0, 64], sizes = [8, 64], strides = [1, 1]} : vector<8x128xbf16> to vector<8x64xbf16>
    %cst_30 = arith.constant dense<0.000000e+00> : vector<8x8xf32>
    %47 = tpu.matmul %45, %46, %cst_30 {dimension_numbers = #tpu.dot_dimension_numbers<[1], [1], [0], [0], [0, 0, 1, 0], [], []>} : vector<8x64xbf16>, vector<8x64xbf16>, vector<8x8xf32> -> vector<8x8xf32>
    %c1 = arith.constant 1 : index
    %c0_31 = arith.constant 0 : index
    %c0_32 = arith.constant 0 : index
    %48 = vector.load %arg8[%c1, %c0_31, %c0_32] : memref<2x8x1xf32, #tpu.memory_space<vmem>>, vector<1x8x1xf32>
    %49 = vector.shape_cast %48 : vector<1x8x1xf32> to vector<8x1xf32>
    %cst_33 = arith.constant dense<0xFF800000> : vector<8xf32>
    %50 = vector.multi_reduction <maximumf>, %47, %cst_33 [1] : vector<8x8xf32> to vector<8xf32>
    %51 = vector.shape_cast %50 : vector<8xf32> to vector<8x1xf32>
    %52 = arith.maximumf %49, %51 : vector<8x1xf32>
    %53 = arith.subf %49, %52 : vector<8x1xf32>
    %54 = math.exp %53 : vector<8x1xf32>
    %55 = vector.broadcast %52 : vector<8x1xf32> to vector<8x8xf32>
    %56 = arith.subf %47, %55 : vector<8x8xf32>
    %57 = math.exp %56 : vector<8x8xf32>
    %c1_34 = arith.constant 1 : index
    %c0_35 = arith.constant 0 : index
    %c0_36 = arith.constant 0 : index
    %58 = vector.load %arg9[%c1_34, %c0_35, %c0_36] : memref<2x8x1xf32, #tpu.memory_space<vmem>>, vector<1x8x1xf32>
    %59 = vector.shape_cast %58 : vector<1x8x1xf32> to vector<8x1xf32>
    %60 = arith.mulf %54, %59 : vector<8x1xf32>
    %cst_37 = arith.constant dense<0.000000e+00> : vector<8xf32>
    %61 = vector.multi_reduction <add>, %57, %cst_37 [1] : vector<8x8xf32> to vector<8xf32>
    %62 = vector.shape_cast %61 : vector<8xf32> to vector<8x1xf32>
    %63 = arith.addf %60, %62 : vector<8x1xf32>
    %c1_38 = arith.constant 1 : index
    %c0_39 = arith.constant 0 : index
    %c0_40 = arith.constant 0 : index
    %64 = vector.load %arg9[%c1_38, %c0_39, %c0_40] : memref<2x8x1xf32, #tpu.memory_space<vmem>>, vector<1x8x1xf32>
    %65 = vector.shape_cast %64 : vector<1x8x1xf32> to vector<8x1xf32>
    %66 = vector.shape_cast %63 : vector<8x1xf32> to vector<1x8x1xf32>
    tpu.vector_store %arg9[%c1_38, %c0_39, %c0_40], %66 {strides = array<i32>} : memref<2x8x1xf32, #tpu.memory_space<vmem>>, vector<1x8x1xf32>,
    %c1_41 = arith.constant 1 : index
    %c0_42 = arith.constant 0 : index
    %c0_43 = arith.constant 0 : index
    %67 = vector.load %arg10[%c1_41, %c0_42, %c0_43] : memref<2x8x64xf32, #tpu.memory_space<vmem>>, vector<1x8x64xf32>
    %68 = vector.shape_cast %67 : vector<1x8x64xf32> to vector<8x64xf32>
    %69 = vector.broadcast %54 : vector<8x1xf32> to vector<8x64xf32>
    %70 = arith.mulf %69, %68 : vector<8x64xf32>
    %71 = arith.truncf %57 : vector<8x8xf32> to vector<8x8xbf16>
    %72 = vector.extract_strided_slice %8 {offsets = [0, 64], sizes = [8, 64], strides = [1, 1]} : vector<8x128xbf16> to vector<8x64xbf16>
    %cst_44 = arith.constant dense<0.000000e+00> : vector<8x64xf32>
    %73 = tpu.matmul %71, %72, %cst_44 {dimension_numbers = #tpu.dot_dimension_numbers<[1], [0], [0], [1], [0, 0, 1, 1], [], []>} : vector<8x8xbf16>, vector<8x64xbf16>, vector<8x64xf32> -> vector<8x64xf32>
    %74 = arith.addf %70, %73 : vector<8x64xf32>
    %c1_45 = arith.constant 1 : index
    %c0_46 = arith.constant 0 : index
    %c0_47 = arith.constant 0 : index
    %75 = vector.load %arg10[%c1_45, %c0_46, %c0_47] : memref<2x8x64xf32, #tpu.memory_space<vmem>>, vector<1x8x64xf32>
    %76 = vector.shape_cast %75 : vector<1x8x64xf32> to vector<8x64xf32>
    %77 = vector.shape_cast %74 : vector<8x64xf32> to vector<1x8x64xf32>
    tpu.vector_store %arg10[%c1_45, %c0_46, %c0_47], %77 {strides = array<i32>} : memref<2x8x64xf32, #tpu.memory_space<vmem>>, vector<1x8x64xf32>,
    %c1_48 = arith.constant 1 : index
    %c0_49 = arith.constant 0 : index
    %c0_50 = arith.constant 0 : index
    %78 = vector.load %arg8[%c1_48, %c0_49, %c0_50] : memref<2x8x1xf32, #tpu.memory_space<vmem>>, vector<1x8x1xf32>
    %79 = vector.shape_cast %78 : vector<1x8x1xf32> to vector<8x1xf32>
    %80 = vector.shape_cast %52 : vector<8x1xf32> to vector<1x8x1xf32>
    tpu.vector_store %arg8[%c1_48, %c0_49, %c0_50], %80 {strides = array<i32>} : memref<2x8x1xf32, #tpu.memory_space<vmem>>, vector<1x8x1xf32>,
    %c0_i32_51 = arith.constant 0 : i32
    %81 = arith.cmpi eq, %arg3, %c0_i32_51 : i32
    %82 = arith.extui %81 : i1 to i32
    %c0_i32_52 = arith.constant 0 : i32
    %83 = arith.cmpi ne, %82, %c0_i32_52 : i32
    scf.if %83 {
      %c0_53 = arith.constant 0 : index
      %c0_54 = arith.constant 0 : index
      %c0_55 = arith.constant 0 : index
      %84 = vector.load %arg10[%c0_53, %c0_54, %c0_55] : memref<2x8x64xf32, #tpu.memory_space<vmem>>, vector<1x8x64xf32>
      %85 = vector.shape_cast %84 : vector<1x8x64xf32> to vector<8x64xf32>
      %c0_56 = arith.constant 0 : index
      %c0_57 = arith.constant 0 : index
      %c0_58 = arith.constant 0 : index
      %86 = vector.load %arg9[%c0_56, %c0_57, %c0_58] : memref<2x8x1xf32, #tpu.memory_space<vmem>>, vector<1x8x1xf32>
      %87 = vector.shape_cast %86 : vector<1x8x1xf32> to vector<8x1xf32>
      %88 = tpu.reciprocal %87 {approx = true} : vector<8x1xf32> -> vector<8x1xf32>
      %89 = vector.broadcast %88 : vector<8x1xf32> to vector<8x64xf32>
      %90 = arith.mulf %85, %89 : vector<8x64xf32>
      %c1_59 = arith.constant 1 : index
      %c0_60 = arith.constant 0 : index
      %c0_61 = arith.constant 0 : index
      %91 = vector.load %arg10[%c1_59, %c0_60, %c0_61] : memref<2x8x64xf32, #tpu.memory_space<vmem>>, vector<1x8x64xf32>
      %92 = vector.shape_cast %91 : vector<1x8x64xf32> to vector<8x64xf32>
      %c1_62 = arith.constant 1 : index
      %c0_63 = arith.constant 0 : index
      %c0_64 = arith.constant 0 : index
      %93 = vector.load %arg9[%c1_62, %c0_63, %c0_64] : memref<2x8x1xf32, #tpu.memory_space<vmem>>, vector<1x8x1xf32>
      %94 = vector.shape_cast %93 : vector<1x8x1xf32> to vector<8x1xf32>
      %95 = tpu.reciprocal %94 {approx = true} : vector<8x1xf32> -> vector<8x1xf32>
      %96 = vector.broadcast %95 : vector<8x1xf32> to vector<8x64xf32>
      %97 = arith.mulf %92, %96 : vector<8x64xf32>
      %98 = tpu.concatenate %90, %97 in 1 : vector<8x64xf32>, vector<8x64xf32> -> vector<8x128xf32>
      %99 = arith.truncf %98 : vector<8x128xf32> to vector<8x128xbf16>
      %c0_65 = arith.constant 0 : index
      %c0_66 = arith.constant 0 : index
      %c0_67 = arith.constant 0 : index
      %100 = vector.load %arg7[%c0_65, %c0_66, %c0_67] : memref<1x8x128xbf16, #tpu.memory_space<vmem>>, vector<1x8x128xbf16>
      %101 = vector.shape_cast %100 : vector<1x8x128xbf16> to vector<8x128xbf16>
      %102 = vector.shape_cast %99 : vector<8x128xbf16> to vector<1x8x128xbf16>
      tpu.vector_store %arg7[%c0_65, %c0_66, %c0_67], %102 {strides = array<i32>} : memref<1x8x128xbf16, #tpu.memory_space<vmem>>, vector<1x8x128xbf16>,
    } else {
    }
    return
  }
  func.func @transform_0(%arg0: i32, %arg1: i32, %arg2: i32, %arg3: i32) -> (i32, i32, i32) {
    %c0_i32 = arith.constant 0 : i32
    return %arg0, %arg2, %arg1 : i32, i32, i32
  }
  func.func @transform_1(%arg0: i32, %arg1: i32, %arg2: i32, %arg3: i32) -> (i32, i32, i32) {
    %c0_i32 = arith.constant 0 : i32
    %0 = arith.addi %c0_i32, %arg1 : i32
    %c0_i32_0 = arith.constant 0 : i32
    return %arg0, %arg3, %0 : i32, i32, i32
  }
  func.func @transform_2(%arg0: i32, %arg1: i32, %arg2: i32, %arg3: i32) -> (i32, i32, i32) {
    %c1_i32 = arith.constant 1 : i32
    %0 = arith.addi %c1_i32, %arg1 : i32
    %c0_i32 = arith.constant 0 : i32
    return %arg0, %arg3, %0 : i32, i32, i32
  }
  func.func @transform_3(%arg0: i32, %arg1: i32, %arg2: i32, %arg3: i32) -> (i32, i32, i32) {
    %c0_i32 = arith.constant 0 : i32
    return %arg0, %arg2, %arg1 : i32, i32, i32
  }
}

module attributes {stable_mosaic.version = 11 : i64} {
  func.func @_ln_logits_kernel(%arg0: i32, %arg1: i32, %arg2: memref<16x128xf32, #tpu.memory_space<vmem>>, %arg3: memref<1x128xf32, #tpu.memory_space<vmem>>, %arg4: memref<1x128xf32, #tpu.memory_space<vmem>>, %arg5: memref<128x128xbf16, #tpu.memory_space<vmem>>, %arg6: memref<16x128xf32, #tpu.memory_space<vmem>>, %arg7: memref<16x128xbf16, #tpu.memory_space<vmem>>) attributes {dimension_semantics = [#tpu.dimension_semantics<parallel>, #tpu.dimension_semantics<arbitrary>], iteration_bounds = array<i64: 1, 1>, scalar_prefetch = 0 : i64, scratch_operands = 1 : i64, tpu.core_type = #tpu.core_type<tc>, window_params = [{transform_indices = @transform_0, window_bounds = array<i64: 16, 128>}, {pipeline_mode = #tpu.pipeline_mode<synchronous>, transform_indices = @transform_1, window_bounds = array<i64: 1, 128>}, {pipeline_mode = #tpu.pipeline_mode<synchronous>, transform_indices = @transform_2, window_bounds = array<i64: 1, 128>}, {transform_indices = @transform_3, window_bounds = array<i64: 128, 128>}, {transform_indices = @transform_4, window_bounds = array<i64: 16, 128>}]} {
    %c0_i32 = arith.constant 0 : i32
    %0 = arith.cmpi eq, %arg1, %c0_i32 : i32
    %1 = arith.extui %0 : i1 to i32
    %c0_i32_0 = arith.constant 0 : i32
    %2 = arith.cmpi ne, %1, %c0_i32_0 : i32
    scf.if %2 {
      %c0_6 = arith.constant 0 : index
      %c0_7 = arith.constant 0 : index
      %7 = vector.load %arg2[%c0_6, %c0_7] : memref<16x128xf32, #tpu.memory_space<vmem>>, vector<16x128xf32>
      %c0_8 = arith.constant 0 : index
      %c0_9 = arith.constant 0 : index
      %8 = vector.load %arg3[%c0_8, %c0_9] : memref<1x128xf32, #tpu.memory_space<vmem>>, vector<1x128xf32>
      %c0_10 = arith.constant 0 : index
      %c0_11 = arith.constant 0 : index
      %9 = vector.load %arg4[%c0_10, %c0_11] : memref<1x128xf32, #tpu.memory_space<vmem>>, vector<1x128xf32>
      %cst_12 = arith.constant dense<0.000000e+00> : vector<16xf32>
      %10 = vector.multi_reduction <add>, %7, %cst_12 [1] : vector<16x128xf32> to vector<16xf32>
      %11 = vector.shape_cast %10 : vector<16xf32> to vector<16x1xf32>
      %cst_13 = arith.constant 1.280000e+02 : f32
      %12 = vector.broadcast %cst_13 : f32 to vector<16x1xf32>
      %13 = arith.divf %11, %12 : vector<16x1xf32>
      %14 = vector.broadcast %13 : vector<16x1xf32> to vector<16x128xf32>
      %15 = arith.subf %7, %14 : vector<16x128xf32>
      %16 = arith.mulf %15, %15 : vector<16x128xf32>
      %cst_14 = arith.constant dense<0.000000e+00> : vector<16xf32>
      %17 = vector.multi_reduction <add>, %16, %cst_14 [1] : vector<16x128xf32> to vector<16xf32>
      %18 = vector.shape_cast %17 : vector<16xf32> to vector<16x1xf32>
      %cst_15 = arith.constant 1.280000e+02 : f32
      %19 = vector.broadcast %cst_15 : f32 to vector<16x1xf32>
      %20 = arith.divf %18, %19 : vector<16x1xf32>
      %cst_16 = arith.constant 9.99999974E-6 : f32
      %21 = vector.broadcast %cst_16 : f32 to vector<16x1xf32>
      %22 = arith.addf %20, %21 : vector<16x1xf32>
      %23 = math.rsqrt %22 : vector<16x1xf32>
      %24 = vector.broadcast %23 : vector<16x1xf32> to vector<16x128xf32>
      %25 = arith.mulf %15, %24 : vector<16x128xf32>
      %26 = vector.broadcast %8 : vector<1x128xf32> to vector<16x128xf32>
      %27 = arith.mulf %25, %26 : vector<16x128xf32>
      %28 = vector.broadcast %9 : vector<1x128xf32> to vector<16x128xf32>
      %29 = arith.addf %27, %28 : vector<16x128xf32>
      %30 = arith.truncf %29 : vector<16x128xf32> to vector<16x128xbf16>
      %c0_17 = arith.constant 0 : index
      %c0_18 = arith.constant 0 : index
      %31 = vector.load %arg7[%c0_17, %c0_18] : memref<16x128xbf16, #tpu.memory_space<vmem>>, vector<16x128xbf16>
      tpu.vector_store %arg7[%c0_17, %c0_18], %30 {strides = array<i32>} : memref<16x128xbf16, #tpu.memory_space<vmem>>, vector<16x128xbf16>,
    } else {
    }
    %c0 = arith.constant 0 : index
    %c0_1 = arith.constant 0 : index
    %3 = vector.load %arg7[%c0, %c0_1] : memref<16x128xbf16, #tpu.memory_space<vmem>>, vector<16x128xbf16>
    %c0_2 = arith.constant 0 : index
    %c0_3 = arith.constant 0 : index
    %4 = vector.load %arg5[%c0_2, %c0_3] : memref<128x128xbf16, #tpu.memory_space<vmem>>, vector<128x128xbf16>
    %cst = arith.constant dense<0.000000e+00> : vector<16x128xf32>
    %5 = tpu.matmul %3, %4, %cst {dimension_numbers = #tpu.dot_dimension_numbers<[1], [0], [0], [1], [0, 0, 1, 1], [], []>} : vector<16x128xbf16>, vector<128x128xbf16>, vector<16x128xf32> -> vector<16x128xf32>
    %c0_4 = arith.constant 0 : index
    %c0_5 = arith.constant 0 : index
    %6 = vector.load %arg6[%c0_4, %c0_5] : memref<16x128xf32, #tpu.memory_space<vmem>>, vector<16x128xf32>
    tpu.vector_store %arg6[%c0_4, %c0_5], %5 {strides = array<i32>} : memref<16x128xf32, #tpu.memory_space<vmem>>, vector<16x128xf32>,
    return
  }
  func.func @transform_0(%arg0: i32, %arg1: i32) -> (i32, i32) {
    %c0_i32 = arith.constant 0 : i32
    %c0_i32_0 = arith.constant 0 : i32
    return %arg0, %c0_i32 : i32, i32
  }
  func.func @transform_1(%arg0: i32, %arg1: i32) -> (i32, i32) {
    %c0_i32 = arith.constant 0 : i32
    %c0_i32_0 = arith.constant 0 : i32
    %c0_i32_1 = arith.constant 0 : i32
    return %c0_i32, %c0_i32_0 : i32, i32
  }
  func.func @transform_2(%arg0: i32, %arg1: i32) -> (i32, i32) {
    %c0_i32 = arith.constant 0 : i32
    %c0_i32_0 = arith.constant 0 : i32
    %c0_i32_1 = arith.constant 0 : i32
    return %c0_i32, %c0_i32_0 : i32, i32
  }
  func.func @transform_3(%arg0: i32, %arg1: i32) -> (i32, i32) {
    %c0_i32 = arith.constant 0 : i32
    %c0_i32_0 = arith.constant 0 : i32
    return %c0_i32, %arg1 : i32, i32
  }
  func.func @transform_4(%arg0: i32, %arg1: i32) -> (i32, i32) {
    %c0_i32 = arith.constant 0 : i32
    return %arg0, %arg1 : i32, i32
  }
}

</mosaic_0001>

<bundles_post_ra>
// kernel: text_decoder_forward.20
= control target key start
LH: loop header
LB: loop body
LE: loop exit
PB: predicated region body
PF: predicated region fallthrough
CT: control target
= control target key end

     0   :  { %v200_v0 = vmov 0.0   ;;  %vm201_vm0 = vmmov 0   ;;  %s269_s2 = inlined_call_operand.vmem [shape: bf16[128,128], index: 2, kind: input, shape index: {}]   ;;  %s270_s0 = inlined_call_operand.vmem [shape: bf16[16,128], index: 0, kind: input, shape index: {}]   ;;  %s271_s1 = inlined_call_operand.vmem [shape: f32[16,128], index: 1, kind: input, shape index: {}]   ;;  %s272_s3 = inlined_call_operand.vmem [shape: f32[1,128], index: 3, kind: input, shape index: {}]   ;;  %s273_s4 = inlined_call_operand.vmem [shape: f32[16,128], index: 4, kind: output, shape index: {}]  }
   0x1   :  { %169 = vmatprep.subr.bf16.mxu0 %v200_v0  ;;  %v191_v1 = vld [vmem:[%s269_s2 + $0x38] sm:$0xff]   ;;  %185 = vmatprep.mubr.msk.bf16.mxu0 %vm201_vm0, %v200_v0  ;;  %v192_v2 = vld [vmem:[%s269_s2 + $0x30] sm:$0xff]   ;;  %v193_v3 = vld [vmem:[%s269_s2 + $0x28] sm:$0xff]  }
   0x2   :  { %170 = vmatpush3.bf16.msra.mxu0 %v191_v1  ;;  %v194_v4 = vld [vmem:[%s269_s2 + $0x20] sm:$0xff]   ;;  %v195_v5 = vld [vmem:[%s269_s2 + $0x18] sm:$0xff]   ;;  %v196_v6 = vld [vmem:[%s269_s2 + $0x10] sm:$0xff]  }
   0x3   :  { %171 = vmatprep.subr.bf16.mxu0 %v200_v0  ;;  %v197_v7 = vld [vmem:[%s269_s2 + $0x8] sm:$0xff]   ;;  %v198_v8 = vld [vmem:[%s269_s2] sm:$0xff]  }
   0x4   :  { %v199_v9 = vld [vmem:[%s270_s0] sm:$0xff]   ;;  %v19_v15 = vld [vmem:[%s271_s1 + $0x8] sm:$0xff] }
   0x5   :  { %v18_v10 = vld [vmem:[%s271_s1] sm:$0xff] }
   0x6   :  { %172 = vmatpush3.bf16.msra.mxu0 %v192_v2  ;;  %v159_v12 = vld [vmem:[%s272_s3] ss:$0 sm:$0xff] }
   0x7   :  { %173 = vmatprep.subr.bf16.mxu0 %v200_v0 }
   0xa   :  { %174 = vmatpush3.bf16.msra.mxu0 %v193_v3 }
   0xb   :  { %175 = vmatprep.subr.bf16.mxu0 %v200_v0 }
   0xe   :  { %176 = vmatpush3.bf16.msra.mxu0 %v194_v4 }
   0xf   :  { %177 = vmatprep.subr.bf16.mxu0 %v200_v0 }
  0x12   :  { %178 = vmatpush3.bf16.msra.mxu0 %v195_v5 }
  0x13   :  { %179 = vmatprep.subr.bf16.mxu0 %v200_v0 }
  0x16   :  { %180 = vmatpush3.bf16.msra.mxu0 %v196_v6 }
  0x17   :  { %181 = vmatprep.subr.bf16.mxu0 %v200_v0 }
  0x1a   :  { %182 = vmatpush3.bf16.msra.mxu0 %v197_v7 }
  0x1b   :  { %183 = vmatprep.subr.bf16.mxu0 %v200_v0 }
  0x1e   :  { %184 = vmatpush3.bf16.msra.mxu0 %v198_v8 }
  0x21   :  { %186 = vmatmul.mubr.bf16.vlgmr.msra.gmra.mxu0 %v199_v9 }
  0xe1   :  { %v126_v11 = vpop.f32.mrf.mxu0 }
  0xe2   :  { %v133_v13 = vadd.f32 %v126_v11, %v18_v10 }
  0xe3   :  { %v187_v14 = vpop.f32.mrf.mxu0 }
  0xe4   :  { %v142_v16 = vadd.f32 %v159_v12, %v133_v13 }
  0xe5   :  { %v129_v17 = vpop.f32.mrf.mxu0 }
  0xe6   :  { %144 = vst [vmem:[%s273_s4] sm:$0xff] %v142_v16  ;;  %v134_v18 = vadd.f32 %v129_v17, %v19_v15 }
  0xe7   :  { %v188_v19 = vpop.f32.mrf.mxu0 }
  0xe8   :  { %v143_v20 = vadd.f32 %v159_v12, %v134_v18 }
  0xea   :  { %145 = vst [vmem:[%s273_s4 + $0x8] sm:$0xff] %v143_v20 }

// kernel: text_decoder_forward.21
= control target key start
LH: loop header
LB: loop body
LE: loop exit
PB: predicated region body
PF: predicated region fallthrough
CT: control target
= control target key end

     0   :  { %v286_v11 = vmov 0.0   ;;  %vm287_vm0 = vmmov 0   ;;  %s360_s0 = inlined_call_operand.vmem [shape: f32[16,128], index: 0, kind: input, shape index: {}]   ;;  %s361_s3 = inlined_call_operand.vmem [shape: bf16[128,128], index: 3, kind: input, shape index: {}]   ;;  %s362_s1 = inlined_call_operand.vmem [shape: f32[1,128], index: 1, kind: input, shape index: {}]   ;;  %s363_s2 = inlined_call_operand.vmem [shape: f32[1,128], index: 2, kind: input, shape index: {}]   ;;  %s364_s4 = inlined_call_operand.vmem [shape: f32[1,128], index: 4, kind: input, shape index: {}]   ;;  %s365_s5 = inlined_call_operand.vmem [shape: bf16[16,128], index: 5, kind: output, shape index: {}]  }
   0x1   :  { %v25_v0 = vld [vmem:[%s360_s0] sm:$0xff]  ;;  %v26_v1 = vld [vmem:[%s360_s0 + $0x8] sm:$0xff]  ;;  %v273_v10 = vld [vmem:[%s361_s3 + $0x38] sm:$0xff]   ;;  %251 = vmatprep.subr.bf16.mxu0 %v286_v11  ;;  %267 = vmatprep.mubr.msk.bf16.mxu0 %vm287_vm0, %v286_v11 }
   0x2   :  { %29 = vadd.xlane.f32.xlu0 %v25_v0  ;;  %252 = vmatpush3.bf16.msra.mxu0 %v273_v10  ;;  %v274_v12 = vld [vmem:[%s361_s3 + $0x30] sm:$0xff]   ;;  %v275_v13 = vld [vmem:[%s361_s3 + $0x28] sm:$0xff]   ;;  %v276_v14 = vld [vmem:[%s361_s3 + $0x20] sm:$0xff]  }
   0x3   :  { %253 = vmatprep.subr.bf16.mxu0 %v286_v11  ;;  %v277_v15 = vld [vmem:[%s361_s3 + $0x18] sm:$0xff]   ;;  %v278_v16 = vld [vmem:[%s361_s3 + $0x10] sm:$0xff]   ;;  %v279_v17 = vld [vmem:[%s361_s3 + $0x8] sm:$0xff]  }
   0x4   :  { %v280_v18 = vld [vmem:[%s361_s3] sm:$0xff]  }
   0x5   :  { %v212_v27 = vld [vmem:[%s362_s1] ss:$0 sm:$0xff] }
   0x6   :  { %31 = vadd.xlane.f32.xlu0 %v26_v1  ;;  %254 = vmatpush3.bf16.msra.mxu0 %v274_v12  ;;  %v213_v31 = vld [vmem:[%s363_s2] ss:$0 sm:$0xff] }
   0x7   :  { %255 = vmatprep.subr.bf16.mxu0 %v286_v11  ;;  %v216_v38 = vld [vmem:[%s364_s4] ss:$0 sm:$0xff] }
   0xa   :  { %256 = vmatpush3.bf16.msra.mxu0 %v275_v13 }
   0xb   :  { %257 = vmatprep.subr.bf16.mxu0 %v286_v11 }
   0xe   :  { %258 = vmatpush3.bf16.msra.mxu0 %v276_v14 }
   0xf   :  { %259 = vmatprep.subr.bf16.mxu0 %v286_v11 }
  0x12   :  { %260 = vmatpush3.bf16.msra.mxu0 %v277_v15 }
  0x13   :  { %261 = vmatprep.subr.bf16.mxu0 %v286_v11 }
  0x16   :  { %262 = vmatpush3.bf16.msra.mxu0 %v278_v16 }
  0x17   :  { %263 = vmatprep.subr.bf16.mxu0 %v286_v11 }
  0x1a   :  { %264 = vmatpush3.bf16.msra.mxu0 %v279_v17 }
  0x1b   :  { %265 = vmatprep.subr.bf16.mxu0 %v286_v11 }
  0x1e   :  { %266 = vmatpush3.bf16.msra.mxu0 %v280_v18 }
  0x8b   :  { %v30_v2 = vpop.xlane.xlu0 %29 }
  0x8c   :  { %v34_v3 = vmul.f32 0.0078125, %v30_v2 }
  0x8e   :  { %v36_v4 = vsub.f32 %v25_v0, %v34_v3 }
  0x8f   :  { %v32_v5 = vpop.xlane.xlu0 %31 }
  0x90   :  { %v35_v6 = vmul.f32 0.0078125, %v32_v5  ;;  %v38_v7 = vmul.f32 %v36_v4, %v36_v4 }
  0x92   :  { %v37_v8 = vsub.f32 %v26_v1, %v35_v6  ;;  %40 = vadd.xlane.f32.xlu1 %v38_v7 }
  0x94   :  { %v39_v9 = vmul.f32 %v37_v8, %v37_v8 }
  0x96   :  { %42 = vadd.xlane.f32.xlu1 %v39_v9 }
 0x11b   :  { %v41_v19 = vpop.xlane.xlu1 %40 }
 0x11c   :  { %v44_v20 = vmul.f32 0.0078125, %v41_v19 }
 0x11e   :  { %v46_v21 = vadd.f32 1e-05, %v44_v20 }
 0x11f   :  { %v43_v22 = vpop.xlane.xlu1 %42 }
 0x120   :  { %282 = vrsqrt.f32 %v46_v21  ;;  %v45_v23 = vmul.f32 0.0078125, %v43_v22 }
 0x122   :  { %v47_v24 = vadd.f32 1e-05, %v45_v23 }
 0x124   :  { %284 = vrsqrt.f32 %v47_v24 }
 0x12d   :  { %v283_v25 = vpop.eup %282 }
 0x12e   :  { %v50_v26 = vmul.f32 %v283_v25, %v36_v4 }
 0x130   :  { %v58_v29 = vmul.f32 %v212_v27, %v50_v26 }
 0x131   :  { %v285_v28 = vpop.eup %284 }
 0x132   :  { %v51_v30 = vmul.f32 %v285_v28, %v37_v8  ;;  %v66_v33 = vadd.f32 %v213_v31, %v58_v29 }
 0x134   :  { %v59_v32 = vmul.f32 %v212_v27, %v51_v30 }
 0x136   :  { %v67_v34 = vadd.f32 %v213_v31, %v59_v32 }
 0x138   :  { %v235_v35 = vpack.c.bf16 %v67_v34, %v66_v33 }
 0x13a   :  { %236 = vst [vmem:[#allocation2] sm:$0xff] %v235_v35  }
 0x141   :  { %v281_v36 = vld [vmem:[#allocation2] sm:$0xff]  }
 0x142   :  { %268 = vmatmul.mubr.bf16.vlgmr.msra.gmra.mxu0 %v281_v36 }
 0x202   :  { %v191_v37 = vpop.f32.mrf.mxu0 }
 0x203   :  { %v192_v41 = vadd.f32 %v216_v38, %v191_v37 }
 0x204   :  { %v269_v39 = vpop.f32.mrf.mxu0 }
 0x206   :  { %v194_v40 = vpop.f32.mrf.mxu0 }
 0x207   :  { %v195_v42 = vadd.f32 %v216_v38, %v194_v40 }
 0x208   :  { %v270_v43 = vpop.f32.mrf.mxu0 }
 0x209   :  { %v240_v44 = vpack.c.bf16 %v195_v42, %v192_v41 }
 0x20b   :  { %241 = vst [vmem:[%s365_s5] sm:$0xff] %v240_v44  }

// kernel: text_decoder_forward.18
= control target key start
LH: loop header
LB: loop body
LE: loop exit
PB: predicated region body
PF: predicated region fallthrough
CT: control target
= control target key end

     0   :  { %v488_v12 = vmov 0.0   ;;  %v489_v34 = vmov 0   ;;  %vm490_vm0 = vmmov 0   ;;  %v114_v54 = vlaneseq  ;;  %s630_s0 = inlined_call_operand.vmem [shape: f32[16,128], index: 0, kind: input, shape index: {}]   ;;  %s631_s3 = inlined_call_operand.vmem [shape: bf16[128,384], index: 3, kind: input, shape index: {}]   ;;  %s632_s1 = inlined_call_operand.vmem [shape: f32[1,128], index: 1, kind: input, shape index: {}]   ;;  %s633_s2 = inlined_call_operand.vmem [shape: f32[1,128], index: 2, kind: input, shape index: {}]   ;;  %s634_s4 = inlined_call_operand.vmem [shape: f32[1,384], index: 4, kind: input, shape index: {}]   ;;  %s635_s5 = inlined_call_operand.vmem [shape: bf16[16,384], index: 5, kind: output, shape index: {}]  }
   0x1   :  { %v25_v0 = vld [vmem:[%s630_s0] sm:$0xff]  ;;  %v26_v1 = vld [vmem:[%s630_s0 + $0x8] sm:$0xff]  ;;  %428 = vmatprep.subr.bf16.mxu1 %v488_v12  ;;  %v454_v13 = vld [vmem:[%s631_s3 + $0xb0] ss:$12 sps:$4 sm:$0xff]   ;;  %295 = vmatprep.mubr.bf16.mxu0 %v489_v34 }
   0x2   :  { %29 = vadd.xlane.f32.xlu0 %v25_v0  ;;  %v451_v10 = vld [vmem:[%s631_s3 + $0xac] ss:$12 sps:$4 sm:$0xff]   ;;  %v453_v11 = vld [vmem:[%s631_s3 + $0xa8] ss:$12 sps:$4 sm:$0xff]   ;;  %429 = vmatpush3.bf16.msra.mxu1 %v454_v13  ;;  %v457_v15 = vld [vmem:[%s631_s3 + $0x90] ss:$12 sps:$4 sm:$0xff]  }
   0x3   :  { %263 = vmatprep.subr.bf16.mxu0 %v451_v10  ;;  %v455_v14 = vld [vmem:[%s631_s3 + $0x94] ss:$12 sps:$4 sm:$0xff]   ;;  %430 = vmatprep.subr.bf16.mxu1 %v488_v12  ;;  %v458_v16 = vld [vmem:[%s631_s3 + $0x98] ss:$12 sps:$4 sm:$0xff]   ;;  %v459_v17 = vld [vmem:[%s631_s3 + $0x7c] ss:$12 sps:$4 sm:$0xff]  }
   0x4   :  { %264 = vmatpush1.bf16.msra.mxu0 %v453_v11  ;;  %v461_v18 = vld [vmem:[%s631_s3 + $0x78] ss:$12 sps:$4 sm:$0xff]   ;;  %v462_v19 = vld [vmem:[%s631_s3 + $0x80] ss:$12 sps:$4 sm:$0xff]   ;;  %v466_v22 = vld [vmem:[%s631_s3 + $0x68] ss:$12 sps:$4 sm:$0xff]   ;;  %444 = vmatprep.mubr.msk.bf16.mxu1 %vm490_vm0, %v488_v12 }
   0x5   :  { %265 = vmatprep.subr.bf16.mxu0 %v455_v14  ;;  %v463_v20 = vld [vmem:[%s631_s3 + $0x64] ss:$12 sps:$4 sm:$0xff]   ;;  %v465_v21 = vld [vmem:[%s631_s3 + $0x60] ss:$12 sps:$4 sm:$0xff]   ;;  %v469_v24 = vld [vmem:[%s631_s3 + $0x48] ss:$12 sps:$4 sm:$0xff]  }
   0x6   :  { %31 = vadd.xlane.f32.xlu0 %v26_v1  ;;  %431 = vmatpush3.bf16.msra.mxu1 %v458_v16  ;;  %v467_v23 = vld [vmem:[%s631_s3 + $0x4c] ss:$12 sps:$4 sm:$0xff]   ;;  %v470_v25 = vld [vmem:[%s631_s3 + $0x50] ss:$12 sps:$4 sm:$0xff]   ;;  %v471_v26 = vld [vmem:[%s631_s3 + $0x34] ss:$12 sps:$4 sm:$0xff]  }
   0x7   :  { %432 = vmatprep.subr.bf16.mxu1 %v488_v12  ;;  %v473_v27 = vld [vmem:[%s631_s3 + $0x30] ss:$12 sps:$4 sm:$0xff]   ;;  %v474_v28 = vld [vmem:[%s631_s3 + $0x38] ss:$12 sps:$4 sm:$0xff]   ;;  %v478_v31 = vld [vmem:[%s631_s3 + $0x20] ss:$12 sps:$4 sm:$0xff]  }
   0x8   :  { %266 = vmatpush1.bf16.msra.mxu0 %v457_v15  ;;  %v475_v29 = vld [vmem:[%s631_s3 + $0x1c] ss:$12 sps:$4 sm:$0xff]   ;;  %v477_v30 = vld [vmem:[%s631_s3 + $0x18] ss:$12 sps:$4 sm:$0xff]   ;;  %v481_v33 = vld [vmem:[%s631_s3] ss:$12 sps:$4 sm:$0xff]  }
   0x9   :  { %267 = vmatprep.subr.bf16.mxu0 %v459_v17  ;;  %v479_v32 = vld [vmem:[%s631_s3 + $0x4] ss:$12 sps:$4 sm:$0xff]   ;;  %v482_v35 = vld [vmem:[%s631_s3 + $0x8] ss:$12 sps:$4 sm:$0xff]   ;;  %v375_v44 = vld [vmem:[%s632_s1] ss:$0 sm:$0xff] }
   0xa   :  { %433 = vmatpush3.bf16.msra.mxu1 %v462_v19  ;;  %v376_v48 = vld [vmem:[%s633_s2] ss:$0 sm:$0xff]  ;;  %v115_v55 = vshrl.u32 %v114_v54, 7 }
   0xb   :  { %434 = vmatprep.subr.bf16.mxu1 %v488_v12  ;;  %v112_v57 = vld [vmem:[%s634_s4] sm:$0x7] }
   0xc   :  { %268 = vmatpush1.bf16.msra.mxu0 %v461_v18  ;;  %v124_v56 = vsub.s32 2, %v115_v55  ;;  %v116_v58 = vsub.s32 0, %v115_v55  ;;  %v120_v59 = vsub.s32 1, %v115_v55 }
   0xd   :  { %269 = vmatprep.subr.bf16.mxu0 %v463_v20 }
   0xe   :  { %435 = vmatpush3.bf16.msra.mxu1 %v466_v22  ;;  %v125_v60 = vrot.slane %v112_v57, %v124_v56  ;;  %v117_v61 = vrot.slane %v112_v57, %v116_v58  ;;  %v121_v62 = vrot.slane %v112_v57, %v120_v59 }
   0xf   :  { %436 = vmatprep.subr.bf16.mxu1 %v488_v12 }
  0x10   :  { %270 = vmatpush1.bf16.msra.mxu0 %v465_v21 }
  0x11   :  { %271 = vmatprep.subr.bf16.mxu0 %v467_v23 }
  0x12   :  { %437 = vmatpush3.bf16.msra.mxu1 %v470_v25 }
  0x13   :  { %438 = vmatprep.subr.bf16.mxu1 %v488_v12 }
  0x14   :  { %272 = vmatpush1.bf16.msra.mxu0 %v469_v24 }
  0x15   :  { %273 = vmatprep.subr.bf16.mxu0 %v471_v26 }
  0x16   :  { %439 = vmatpush3.bf16.msra.mxu1 %v474_v28 }
  0x17   :  { %440 = vmatprep.subr.bf16.mxu1 %v488_v12 }
  0x18   :  { %274 = vmatpush1.bf16.msra.mxu0 %v473_v27 }
  0x19   :  { %275 = vmatprep.subr.bf16.mxu0 %v475_v29 }
  0x1a   :  { %441 = vmatpush3.bf16.msra.mxu1 %v478_v31 }
  0x1b   :  { %442 = vmatprep.subr.bf16.mxu1 %v488_v12 }
  0x1c   :  { %276 = vmatpush1.bf16.msra.mxu0 %v477_v30 }
  0x1d   :  { %277 = vmatprep.subr.bf16.mxu0 %v479_v32 }
  0x1e   :  { %443 = vmatpush3.bf16.msra.mxu1 %v482_v35 }
  0x20   :  { %278 = vmatpush1.bf16.msra.mxu0 %v481_v33 }
  0x8b   :  { %v30_v2 = vpop.xlane.xlu0 %29 }
  0x8c   :  { %v34_v3 = vmul.f32 0.0078125, %v30_v2 }
  0x8e   :  { %v527_v4 = vsub.f32 %v25_v0, %v34_v3 }
  0x8f   :  { %v32_v5 = vpop.xlane.xlu0 %31 }
  0x90   :  { %v35_v6 = vmul.f32 0.0078125, %v32_v5  ;;  %v38_v7 = vmul.f32 %v527_v4, %v527_v4 }
  0x92   :  { %v531_v8 = vsub.f32 %v26_v1, %v35_v6  ;;  %40 = vadd.xlane.f32.xlu1 %v38_v7 }
  0x94   :  { %v39_v9 = vmul.f32 %v531_v8, %v531_v8 }
  0x96   :  { %42 = vadd.xlane.f32.xlu1 %v39_v9 }
 0x11b   :  { %v41_v36 = vpop.xlane.xlu1 %40 }
 0x11c   :  { %v44_v37 = vmul.f32 0.0078125, %v41_v36 }
 0x11e   :  { %v46_v38 = vadd.f32 1e-05, %v44_v37 }
 0x11f   :  { %v43_v39 = vpop.xlane.xlu1 %42 }
 0x120   :  { %484 = vrsqrt.f32 %v46_v38  ;;  %v45_v40 = vmul.f32 0.0078125, %v43_v39 }
 0x122   :  { %v47_v41 = vadd.f32 1e-05, %v45_v40 }
 0x124   :  { %486 = vrsqrt.f32 %v47_v41 }
 0x12d   :  { %v485_v42 = vpop.eup %484 }
 0x12e   :  { %v50_v43 = vmul.f32 %v485_v42, %v527_v4 }
 0x130   :  { %v58_v46 = vmul.f32 %v375_v44, %v50_v43 }
 0x131   :  { %v487_v45 = vpop.eup %486 }
 0x132   :  { %v51_v47 = vmul.f32 %v487_v45, %v531_v8  ;;  %v66_v50 = vadd.f32 %v376_v48, %v58_v46 }
 0x134   :  { %v59_v49 = vmul.f32 %v375_v44, %v51_v47 }
 0x136   :  { %v67_v51 = vadd.f32 %v376_v48, %v59_v49 }
 0x138   :  { %v417_v52 = vpack.c.bf16 %v67_v51, %v66_v50 }
 0x13a   :  { %418 = vst [vmem:[#allocation2] sm:$0xff] %v417_v52  }
 0x141   :  { %v483_v53 = vld [vmem:[#allocation2] sm:$0xff]  }
 0x142   :  { %296 = vmatmul.mubr.bf16.vlgmr.msra.gmra.mxu0 %v483_v53  ;;  %445 = vmatmul.mubr.bf16.vlgmr.msra.gmra.mxu1 %v483_v53 }
 0x202   :  { %v297_v63 = vpop.f32.mrf.mxu0  ;;  %v340_v0 = vpop.f32.mrf.mxu1 }
 0x203   :  { %v341_v1 = vadd.f32 %v340_v0, %v125_v60  ;;  %v298_v4 = vadd.f32 %v297_v63, %v117_v61 }
 0x204   :  { %v299_v2 = vpop.f32.mrf.mxu0  ;;  %v446_v3 = vpop.f32.mrf.mxu1 }
 0x205   :  { %v411_v5 = vpack.c.bf16 %v341_v1, %v341_v1  ;;  %v300_v6 = vadd.f32 %v299_v2, %v121_v62 }
 0x206   :  { %v301_v7 = vpop.f32.mrf.mxu0  ;;  %v343_v8 = vpop.f32.mrf.mxu1 }
 0x207   :  { %368 = vst [vmem:[%s635_s5 + $0x8] sm:$0xf] %v411_v5  ;;  %v410_v9 = vpack.c.bf16 %v300_v6, %v298_v4  ;;  %v344_v10 = vadd.f32 %v343_v8, %v125_v60  ;;  %v302_v13 = vadd.f32 %v301_v7, %v117_v61 }
 0x208   :  { %v303_v11 = vpop.f32.mrf.mxu0  ;;  %v447_v12 = vpop.f32.mrf.mxu1 }
 0x209   :  { %367 = vst [vmem:[%s635_s5] sm:$0xff] %v410_v9  ;;  %v413_v14 = vpack.c.bf16 %v344_v10, %v344_v10  ;;  %v304_v15 = vadd.f32 %v303_v11, %v121_v62 }
 0x20b   :  { %370 = vst [vmem:[%s635_s5 + $0x14] sm:$0xf] %v413_v14  ;;  %v412_v16 = vpack.c.bf16 %v304_v15, %v302_v13 }
 0x20d   :  { %369 = vst [vmem:[%s635_s5 + $0xc] sm:$0xff] %v412_v16 }

// kernel: text_decoder_forward.19
= control target key start
LH: loop header
LB: loop body
LE: loop exit
PB: predicated region body
PF: predicated region fallthrough
CT: control target
= control target key end

     0   :  { %s976_s12 = smov 0   ;;  %s978_s13 = smov 0   ;;  %s1071_s0 = inlined_call_operand.vmem [shape: bf16[2,8,384], index: 0, kind: input, shape index: {}, may-alias: {0,1,2}]   ;;  %s1072_s1 = inlined_call_operand.vmem [shape: bf16[2,8,384], index: 1, kind: input, shape index: {}, may-alias: {0,1,2}]   ;;  %s1073_s2 = inlined_call_operand.vmem [shape: bf16[2,8,384], index: 2, kind: input, shape index: {}, may-alias: {0,1,2}]   ;;  %s1074_s3 = inlined_call_operand.vmem [shape: bf16[2,8,128], index: 3, kind: output, shape index: {}]  }
   0x1   :  { %s980_s14 = smov 0  }
   0x2 LB: > { %s39_s15 = sadd.s32 1, %s945_s13  ;;  %p830_p0 = scmp.ge.s32.totalorder %s949_s14, 1  ;;  %s949_s14 = sphi %s980_s14, %s13_s14   ;;  %s945_s13 = sphi %s978_s13, %s1076_s13   ;;  %s941_s12 = sphi %s976_s12, %s1075_s12  }
   0x3   : > { %p41_p1 = scmp.ge.s32.totalorder %s39_s15, 2  ;;  %p228_p2 = scmp.lt.s32.totalorder %s949_s14, 3 }
   0x5   : > { %s1078_s15 = smov (%p41_p1, %s39_s15), 0  ;;  %p229_p3 = pnand %p830_p0, %p228_p2 }
   0x6   : > { %p290_p4 = scmp.lt.s32.totalorder (!%p229_p3), %s941_s12, 1  ;;  %s955_s24 = smov (!%p229_p3), 64  }
   0x7   : > { %232 = sbr.rel (%p229_p3) target bundleno = 1398 (0x576), region = 32 }
   0xc   : > { %vm350_vm0 = vcmask 523264   ;;  %v951_v0 = vmov 0.0   ;;  %vm952_vm1 = vmmov 0   ;;  %s1080_s12 = smov (!%p290_p4, %s941_s12), 1  ;;  %vm345_vm2 = vcmask 7168  }
   0xd   : > { %856 = vmatprep.subr.bf16.mxu0 %v951_v0  ;;  %351 = vst.msk [vmem:[#allocation4] sm:$0xff] %vm350_vm0, %v951_v0  ;;  %352 = vst.msk [vmem:[#allocation4 + $0x8] sm:$0xff] %vm350_vm0, %v951_v0  ;;  %858 = vmatprep.mubr.msk.bf16.mxu0 %vm952_vm1, %v951_v0  ;;  %s1007_s16 = smul.u32 12, %s1080_s12  ;;  %v953_v4 = vmov -1e+30   ;;  %v363_v5 = vlaneseq  ;;  %vm421_vm4 = vcmask 64512  }
   0xe   : > { %862 = vmatprep.subr.bf16.mxu1 %v951_v0  ;;  %864 = vmatprep.mubr.msk.bf16.mxu1 %vm952_vm1, %v951_v0  ;;  %346 = vst.msk [vmem:[#allocation2] sm:$0xff] %vm345_vm2, %v953_v4  ;;  %347 = vst.msk [vmem:[#allocation2 + $0x8] sm:$0xff] %vm345_vm2, %v953_v4  ;;  %v954_v14 = vmov 0   ;;  %vm456_vm5 = vcmask 1043456   ;;  %s834_s29 = sshll.u32 %s1080_s12, 2 }
   0xf   : > { %s845_s17 = sadd.s32 4, %s1007_s16  ;;  %s301_s23 = scalar_lea.vmem %s1071_s0, %s1007_s16  ;;  %348 = vst.msk [vmem:[#allocation3] sm:$0xff] %vm345_vm2, %v951_v0  ;;  %349 = vst.msk [vmem:[#allocation3 + $0x8] sm:$0xff] %vm345_vm2, %v951_v0  ;;  %v364_v6 = vshrl.u32 %v363_v5, 7  ;;  %v368_v7 = vand.u32 127, %v363_v5  ;;  %912 = vset.pattern.permute.xlu0 %v954_v14  ;;  %913 = vset.pattern.permute.xlu1 %v954_v14 }
  0x10   : > { %s314_s20 = scalar_lea.vmem %s1072_s1, %s845_s17  ;;  %v360_v3 = vld [vmem:[%s301_s23] sm:$0xf]  ;;  %s847_s25 = sadd.s32 8, %s1007_s16 }
  0x11   : > { %v361_v1 = vld [vmem:[%s314_s20] sm:$0xf]  ;;  %vm371_vm3 = vcmp.le.s32.totalorder %v368_v7, %v364_v6  ;;  %v837_v16 = vcombine.low %v360_v3, %v360_v3  ;;  %s328_s28 = scalar_lea.vmem %s1073_s2, %s847_s25  ;;  %s339_s5 = scalar_lea.vmem %s1074_s3, %s834_s29 }
  0x12   : > { %v377_v2 = vsel %vm350_vm0, %v361_v1, 0  ;;  %v838_v15 = vcombine.low %v361_v1, %v361_v1  ;;  %v362_v21 = vld [vmem:[%s328_s28] sm:$0xf] }
  0x13   : > { %857 = vmatpush3.bf16.xpose.msra.mxu0 %v377_v2  ;;  %v458_v22 = vsel %vm456_vm5, %v362_v21, 0  ;;  %v840_v23 = vcombine.low %v362_v21, %v362_v21 }
  0x14   : > { %874 = vmatprep.subr.bf16.mxu0 %v951_v0  ;;  %511 = vrot.lane.b32.xlu1 %v838_v15, %s955_s24  ;;  %v445_v6 = vld [vmem:[#allocation4] sm:$0xff] }
  0x15   : > { %v420_v17 = vld [vmem:[#allocation2] sm:$0xff]  ;;  %863 = vmatpush3.bf16.msra.mxu1 %v458_v22  ;;  %v561_v42 = vld [vmem:[#allocation2 + $0x8] sm:$0xff] }
  0x16   : > { %868 = vmatprep.subr.bf16.mxu1 %v951_v0  ;;  %v437_v59 = vld [vmem:[#allocation3] sm:$0xff]  ;;  %v578_v1 = vld [vmem:[#allocation3 + $0x8] sm:$0xff] }
  0x18   : > { %506 = vrot.lane.b32.xlu1 %v837_v16, %s955_s24 }
  0x1a   : > { %859 = vmatmul.mubr.msk.bf16.vlgmr.msra.gmra.mxu0 %vm350_vm0, %v360_v3 }
  0x1b   : > { %876 = vmatprep.mubr.msk.bf16.mxu0 %vm952_vm1, %v951_v0 }
  0x86   : > { %v512_v27 = vpop.permute.xlu1 %511 }
  0x87   : > { %v517_v29 = vsel %vm350_vm0, %v512_v27, 0 }
  0x8a   : > { %v507_v31 = vpop.permute.xlu1 %506 }
  0xda   : > { %v413_v8 = vpop.f32.mrf.mxu0 }
  0xdb   : > { %v419_v9 = vsel %vm371_vm3, %v413_v8, -1e+30 }
  0xdc   : > { %v860_v10 = vpop.f32.mrf.mxu0  ;;  %v422_v11 = vsel %vm421_vm4, %v419_v9, -inf }
  0xdd   : > { %423 = vmax.xlane.f32.xlu0 %v422_v11 }
  0xde   : > { %v416_v12 = vpop.f32.mrf.mxu0 }
  0xdf   : > { %v586_v12 = vld [vmem:[#allocation4 + $0x8] sm:$0xff] }
  0xe0   : > { %v861_v13 = vpop.f32.mrf.mxu0 }
 0x166   : > { %v424_v18 = vpop.xlane.xlu0 %423 }
 0x167   : > { %v425_v19 = vmax.f32 %v420_v17, %v424_v18 }
 0x169   : > { %v426_v20 = vsub.f32 %v420_v17, %v425_v19  ;;  %502 = vst.msk [vmem:[#allocation2] sm:$0xff] %vm345_vm2, %v425_v19  ;;  %431 = vperm.xlu0 %912, %v425_v19  }
 0x16b   : > { %v427_v56 = vmul.f32 1.442695, %v426_v20 }
 0x16d   : > { %597 = vrot.lane.b32.xlu0 %v840_v23, %s955_s24 }
 0x1e4   : > { %v432_v24 = vpop.permute.xlu0 %431 }
 0x1e5   : > { %v434_v25 = vsub.f32 %v419_v9, %v432_v24 }
 0x1e7   : > { %v435_v26 = vmul.f32 1.442695, %v434_v25 }
 0x1e8   : > { %v598_v46 = vpop.permute.xlu0 %597 }
 0x1e9   : > { %915 = vpow2.f32 %v435_v26  ;;  %v603_v47 = vsel %vm456_vm5, %v598_v46, 0 }
 0x1ea   : > { %875 = vmatpush3.bf16.msra.mxu0 %v603_v47 }
 0x1f6   : > { %v916_v28 = vpop.eup %915 }
 0x1f7   : > { %v452_v30 = vpack.c.bf16 %v916_v28, %v916_v28  ;;  %v439_v48 = vsel %vm421_vm4, %v916_v28, 0.0 }
 0x1f9   : > { %865 = vmatmul.mubr.msk.bf16.vlgmr.msra.gmra.mxu1 %vm421_vm4, %v452_v30 }
 0x1fa   : > { %869 = vmatpush3.bf16.xpose.msra.mxu1 %v517_v29  ;;  %870 = vmatprep.mubr.msk.bf16.mxu1 %vm952_vm1, %v951_v0 }
 0x201   : > { %871 = vmatmul.mubr.msk.bf16.vlgmr.msra.gmra.mxu1 %vm350_vm0, %v507_v31 }
 0x2b9   : > { %v494_v32 = vpop.f32.mrf.mxu1 }
 0x2bb   : > { %v866_v33 = vpop.f32.mrf.mxu1 }
 0x2bd   : > { %v497_v34 = vpop.f32.mrf.mxu1 }
 0x2bf   : > { %v867_v35 = vpop.f32.mrf.mxu1 }
 0x2c1   : > { %v553_v36 = vpop.f32.mrf.mxu1 }
 0x2c2   : > { %v559_v37 = vsel %vm371_vm3, %v553_v36, -1e+30 }
 0x2c3   : > { %v872_v38 = vpop.f32.mrf.mxu1  ;;  %v562_v39 = vsel %vm421_vm4, %v559_v37, -inf }
 0x2c4   : > { %563 = vmax.xlane.f32.xlu1 %v562_v39 }
 0x2c5   : > { %v556_v40 = vpop.f32.mrf.mxu1 }
 0x2c7   : > { %v873_v41 = vpop.f32.mrf.mxu1 }
 0x34d   : > { %v564_v43 = vpop.xlane.xlu1 %563 }
 0x34e   : > { %v565_v44 = vmax.f32 %v561_v42, %v564_v43 }
 0x350   : > { %v566_v45 = vsub.f32 %v561_v42, %v565_v44  ;;  %647 = vst.msk [vmem:[#allocation2 + $0x8] sm:$0xff] %vm345_vm2, %v565_v44  ;;  %571 = vperm.xlu1 %913, %v565_v44  }
 0x352   : > { %v567_v55 = vmul.f32 1.442695, %v566_v45 }
 0x374   : > { %440 = vadd.xlane.f32.xlu1 %v439_v48 }
 0x3cb   : > { %v572_v49 = vpop.permute.xlu1 %571 }
 0x3cc   : > { %v574_v50 = vsub.f32 %v559_v37, %v572_v49 }
 0x3ce   : > { %v575_v51 = vmul.f32 1.442695, %v574_v50 }
 0x3d0   : > { %917 = vpow2.f32 %v575_v51 }
 0x3d1   : > { %919 = vpow2.f32 %v567_v55 }
 0x3d2   : > { %921 = vpow2.f32 %v427_v56 }
 0x3dd   : > { %v918_v52 = vpop.eup %917 }
 0x3de   : > { %v580_v53 = vsel %vm421_vm4, %v918_v52, 0.0  ;;  %v593_v54 = vpack.c.bf16 %v918_v52, %v918_v52  ;;  %v920_v57 = vpop.eup %919 }
 0x3df   : > { %581 = vadd.xlane.f32.xlu0 %v580_v53  ;;  %v922_v58 = vpop.eup %921  ;;  %v579_v2 = vmul.f32 %v920_v57, %v578_v1 }
 0x3e0   : > { %877 = vmatmul.mubr.msk.bf16.vlgmr.msra.gmra.mxu0 %vm421_vm4, %v593_v54  ;;  %v438_v60 = vmul.f32 %v922_v58, %v437_v59 }
 0x3f5   : > { %589 = vperm.xlu0 %912, %v920_v57  }
 0x3f9   : > { %448 = vperm.xlu0 %912, %v922_v58  }
 0x3fd   : > { %v441_v61 = vpop.xlane.xlu1 %440 }
 0x3fe   : > { %v442_v62 = vadd.f32 %v441_v61, %v438_v60 }
 0x400   : > { %444 = vst.msk [vmem:[#allocation3] sm:$0xff] %vm345_vm2, %v442_v62 }
 0x407   : > { %v652_v63 = vld [vmem:[#allocation3] sm:$0xff] }
 0x408   : > { %923 = vrcp.f32 %v652_v63 }
 0x415   : > { %v924_v0 = vpop.eup %923 }
 0x416   : > { %656 = vperm.xlu0 %912, %v924_v0  }
 0x468   : > { %v582_v3 = vpop.xlane.xlu0 %581 }
 0x469   : > { %v583_v4 = vadd.f32 %v582_v3, %v579_v2 }
 0x46b   : > { %584 = vst.msk [vmem:[#allocation3 + $0x8] sm:$0xff] %vm345_vm2, %v583_v4 }
 0x470   : > { %v590_v5 = vpop.permute.xlu0 %589 }
 0x471   : > { %v592_v13 = vmul.f32 %v590_v5, %v586_v12 }
 0x472   : > { %v663_v7 = vld [vmem:[#allocation3 + $0x8] sm:$0xff] }
 0x473   : > { %925 = vrcp.f32 %v663_v7 }
 0x474   : > { %v449_v8 = vpop.permute.xlu0 %448 }
 0x475   : > { %v451_v9 = vmul.f32 %v449_v8, %v445_v6 }
 0x477   : > { %v500_v10 = vadd.f32 %v494_v32, %v451_v9 }
 0x479   : > { %501 = vst.msk [vmem:[#allocation4] sm:$0xff] %vm350_vm0, %v500_v10 }
 0x480   : > { %v926_v11 = vpop.eup %925  ;;  %v651_v23 = vld [vmem:[#allocation4] sm:$0xff] }
 0x481   : > { %667 = vperm.xlu1 %913, %v926_v11  }
 0x491   : > { %v657_v22 = vpop.permute.xlu0 %656 }
 0x492   : > { %v659_v24 = vmul.f32 %v657_v22, %v651_v23 }
 0x4a0   : > { %v639_v14 = vpop.f32.mrf.mxu0 }
 0x4a1   : > { %v645_v15 = vadd.f32 %v639_v14, %v592_v13 }
 0x4a2   : > { %v878_v16 = vpop.f32.mrf.mxu0 }
 0x4a3   : > { %646 = vst.msk [vmem:[#allocation4 + $0x8] sm:$0xff] %vm350_vm0, %v645_v15 }
 0x4a4   : > { %v642_v17 = vpop.f32.mrf.mxu0 }
 0x4a6   : > { %v879_v18 = vpop.f32.mrf.mxu0 }
 0x4aa   : > { %v661_v20 = vld [vmem:[#allocation4 + $0x8] sm:$0xff] }
 0x4fc   : > { %v668_v19 = vpop.permute.xlu1 %667 }
 0x4fd   : > { %v670_v21 = vmul.f32 %v668_v19, %v661_v20 }
 0x4ff   : > { %672 = vrot.lane.b32.xlu0 %v670_v21, %s955_s24 }
 0x571   : > { %v673_v25 = vpop.permute.xlu0 %672 }
 0x572   : > { %v676_v26 = vsel %vm350_vm0, %v659_v24, %v673_v25 }
 0x573   : > { %v677_v27 = vpack.c.bf16 %v676_v26, %v676_v26 }
 0x575   : > { %678 = vst [vmem:[%s339_s5] sm:$0xf] %v677_v27 }
 0x576 PF: > { %s13_s14 = sadd.s32 1, %s949_s14   ;;  %s1075_s12 = smov %s945_s13 }
 0x577   : > { %p10_p5 = scmp.ge.s32.totalorder %s13_s14, 4   ;;  %s1076_s13 = smov %s1078_s15 }
 0x579   :  { %12 = sbr.rel (!%p10_p5) target bundleno = 2 (0x2), region = 85 }

// kernel: text_decoder_forward.17
= control target key start
LH: loop header
LB: loop body
LE: loop exit
PB: predicated region body
PF: predicated region fallthrough
CT: control target
= control target key end

     0   :  { %v232_v1 = vmov 0   ;;  %v36_v20 = vlaneseq  ;;  %s316_s1 = inlined_call_operand.vmem [shape: bf16[128,256], index: 1, kind: input, shape index: {}]   ;;  %s317_s0 = inlined_call_operand.vmem [shape: f32[16,128], index: 0, kind: input, shape index: {}]   ;;  %s318_s2 = inlined_call_operand.vmem [shape: f32[1,256], index: 2, kind: input, shape index: {}]   ;;  %s319_s3 = inlined_call_operand.vmem [shape: bf16[16,256], index: 3, kind: output, shape index: {}]  }
   0x1   :  { %v208_v0 = vld [vmem:[%s316_s1 + $0x74] ss:$8 sps:$4 sm:$0xff]   ;;  %158 = vmatprep.mubr.bf16.mxu0 %v232_v1  ;;  %v210_v2 = vld [vmem:[%s316_s1 + $0x70] ss:$8 sps:$4 sm:$0xff]   ;;  %v211_v3 = vld [vmem:[%s316_s1 + $0x64] ss:$8 sps:$4 sm:$0xff]  }
   0x2   :  { %126 = vmatprep.subr.bf16.mxu0 %v208_v0  ;;  %v213_v4 = vld [vmem:[%s316_s1 + $0x60] ss:$8 sps:$4 sm:$0xff]   ;;  %v214_v5 = vld [vmem:[%s316_s1 + $0x54] ss:$8 sps:$4 sm:$0xff]   ;;  %v216_v6 = vld [vmem:[%s316_s1 + $0x50] ss:$8 sps:$4 sm:$0xff]  }
   0x3   :  { %127 = vmatpush1.bf16.msra.mxu0 %v210_v2  ;;  %v217_v7 = vld [vmem:[%s316_s1 + $0x44] ss:$8 sps:$4 sm:$0xff]   ;;  %v219_v8 = vld [vmem:[%s316_s1 + $0x40] ss:$8 sps:$4 sm:$0xff]   ;;  %v220_v9 = vld [vmem:[%s316_s1 + $0x34] ss:$8 sps:$4 sm:$0xff]  }
   0x4   :  { %128 = vmatprep.subr.bf16.mxu0 %v211_v3  ;;  %v222_v10 = vld [vmem:[%s316_s1 + $0x30] ss:$8 sps:$4 sm:$0xff]   ;;  %v223_v11 = vld [vmem:[%s316_s1 + $0x24] ss:$8 sps:$4 sm:$0xff]   ;;  %v225_v12 = vld [vmem:[%s316_s1 + $0x20] ss:$8 sps:$4 sm:$0xff]  }
   0x5   :  { %v226_v13 = vld [vmem:[%s316_s1 + $0x14] ss:$8 sps:$4 sm:$0xff]   ;;  %v228_v14 = vld [vmem:[%s316_s1 + $0x10] ss:$8 sps:$4 sm:$0xff]   ;;  %v229_v15 = vld [vmem:[%s316_s1 + $0x4] ss:$8 sps:$4 sm:$0xff]  }
   0x6   :  { %v231_v16 = vld [vmem:[%s316_s1] ss:$8 sps:$4 sm:$0xff]   ;;  %v37_v21 = vshrl.u32 %v36_v20, 7 }
   0x7   :  { %129 = vmatpush1.bf16.msra.mxu0 %v213_v4  ;;  %v15_v17 = vld [vmem:[%s317_s0] sm:$0xff]  ;;  %v16_v18 = vld [vmem:[%s317_s0 + $0x8] sm:$0xff] }
   0x8   :  { %130 = vmatprep.subr.bf16.mxu0 %v214_v5  ;;  %v17_v19 = vpack.c.bf16 %v16_v18, %v15_v17  ;;  %v38_v22 = vsub.s32 0, %v37_v21  ;;  %v42_v23 = vsub.s32 1, %v37_v21  ;;  %v34_v24 = vld [vmem:[%s318_s2] sm:$0x3] }
   0xa   :  { %v39_v25 = vrot.slane %v34_v24, %v38_v22  ;;  %v43_v26 = vrot.slane %v34_v24, %v42_v23 }
   0xb   :  { %131 = vmatpush1.bf16.msra.mxu0 %v216_v6 }
   0xc   :  { %132 = vmatprep.subr.bf16.mxu0 %v217_v7 }
   0xf   :  { %133 = vmatpush1.bf16.msra.mxu0 %v219_v8 }
  0x10   :  { %134 = vmatprep.subr.bf16.mxu0 %v220_v9 }
  0x13   :  { %135 = vmatpush1.bf16.msra.mxu0 %v222_v10 }
  0x14   :  { %136 = vmatprep.subr.bf16.mxu0 %v223_v11 }
  0x17   :  { %137 = vmatpush1.bf16.msra.mxu0 %v225_v12 }
  0x18   :  { %138 = vmatprep.subr.bf16.mxu0 %v226_v13 }
  0x1b   :  { %139 = vmatpush1.bf16.msra.mxu0 %v228_v14 }
  0x1c   :  { %140 = vmatprep.subr.bf16.mxu0 %v229_v15 }
  0x1f   :  { %141 = vmatpush1.bf16.msra.mxu0 %v231_v16 }
  0x22   :  { %159 = vmatmul.mubr.bf16.vlgmr.msra.gmra.mxu0 %v17_v19 }
  0xe2   :  { %v160_v27 = vpop.f32.mrf.mxu0 }
  0xe3   :  { %v161_v29 = vadd.f32 %v160_v27, %v39_v25 }
  0xe4   :  { %v162_v28 = vpop.f32.mrf.mxu0 }
  0xe5   :  { %v163_v30 = vadd.f32 %v162_v28, %v43_v26 }
  0xe6   :  { %v164_v31 = vpop.f32.mrf.mxu0 }
  0xe7   :  { %v205_v32 = vpack.c.bf16 %v163_v30, %v161_v29  ;;  %v165_v34 = vadd.f32 %v164_v31, %v39_v25 }
  0xe8   :  { %v166_v33 = vpop.f32.mrf.mxu0 }
  0xe9   :  { %181 = vst [vmem:[%s319_s3] sm:$0xff] %v205_v32  ;;  %v167_v35 = vadd.f32 %v166_v33, %v43_v26 }
  0xeb   :  { %v206_v36 = vpack.c.bf16 %v167_v35, %v165_v34 }
  0xed   :  { %182 = vst [vmem:[%s319_s3 + $0x8] sm:$0xff] %v206_v36 }

// kernel: text_decoder_forward.33
= control target key start
LH: loop header
LB: loop body
LE: loop exit
PB: predicated region body
PF: predicated region fallthrough
CT: control target
= control target key end

     0   :  { %v258_v11 = vmov 0.0   ;;  %vm259_vm0 = vmmov 0   ;;  %s327_s0 = inlined_call_operand.vmem [shape: f32[16,128], index: 0, kind: input, shape index: {}]   ;;  %s328_s3 = inlined_call_operand.vmem [shape: bf16[128,128], index: 3, kind: input, shape index: {}]   ;;  %s329_s1 = inlined_call_operand.vmem [shape: f32[1,128], index: 1, kind: input, shape index: {}]   ;;  %s330_s2 = inlined_call_operand.vmem [shape: f32[1,128], index: 2, kind: input, shape index: {}]   ;;  %s331_s4 = inlined_call_operand.vmem [shape: f32[16,128], index: 4, kind: output, shape index: {}]  }
   0x1   :  { %v22_v0 = vld [vmem:[%s327_s0] sm:$0xff]  ;;  %v23_v1 = vld [vmem:[%s327_s0 + $0x8] sm:$0xff]  ;;  %v245_v10 = vld [vmem:[%s328_s3 + $0x38] sm:$0xff]   ;;  %223 = vmatprep.subr.bf16.mxu0 %v258_v11  ;;  %239 = vmatprep.mubr.msk.bf16.mxu0 %vm259_vm0, %v258_v11 }
   0x2   :  { %26 = vadd.xlane.f32.xlu0 %v22_v0  ;;  %224 = vmatpush3.bf16.msra.mxu0 %v245_v10  ;;  %v246_v12 = vld [vmem:[%s328_s3 + $0x30] sm:$0xff]   ;;  %v247_v13 = vld [vmem:[%s328_s3 + $0x28] sm:$0xff]   ;;  %v248_v14 = vld [vmem:[%s328_s3 + $0x20] sm:$0xff]  }
   0x3   :  { %225 = vmatprep.subr.bf16.mxu0 %v258_v11  ;;  %v249_v15 = vld [vmem:[%s328_s3 + $0x18] sm:$0xff]   ;;  %v250_v16 = vld [vmem:[%s328_s3 + $0x10] sm:$0xff]   ;;  %v251_v17 = vld [vmem:[%s328_s3 + $0x8] sm:$0xff]  }
   0x4   :  { %v252_v18 = vld [vmem:[%s328_s3] sm:$0xff]  }
   0x5   :  { %v194_v27 = vld [vmem:[%s329_s1] ss:$0 sm:$0xff] }
   0x6   :  { %28 = vadd.xlane.f32.xlu0 %v23_v1  ;;  %226 = vmatpush3.bf16.msra.mxu0 %v246_v12  ;;  %v195_v31 = vld [vmem:[%s330_s2] ss:$0 sm:$0xff] }
   0x7   :  { %227 = vmatprep.subr.bf16.mxu0 %v258_v11 }
   0xa   :  { %228 = vmatpush3.bf16.msra.mxu0 %v247_v13 }
   0xb   :  { %229 = vmatprep.subr.bf16.mxu0 %v258_v11 }
   0xe   :  { %230 = vmatpush3.bf16.msra.mxu0 %v248_v14 }
   0xf   :  { %231 = vmatprep.subr.bf16.mxu0 %v258_v11 }
  0x12   :  { %232 = vmatpush3.bf16.msra.mxu0 %v249_v15 }
  0x13   :  { %233 = vmatprep.subr.bf16.mxu0 %v258_v11 }
  0x16   :  { %234 = vmatpush3.bf16.msra.mxu0 %v250_v16 }
  0x17   :  { %235 = vmatprep.subr.bf16.mxu0 %v258_v11 }
  0x1a   :  { %236 = vmatpush3.bf16.msra.mxu0 %v251_v17 }
  0x1b   :  { %237 = vmatprep.subr.bf16.mxu0 %v258_v11 }
  0x1e   :  { %238 = vmatpush3.bf16.msra.mxu0 %v252_v18 }
  0x8b   :  { %v27_v2 = vpop.xlane.xlu0 %26 }
  0x8c   :  { %v31_v3 = vmul.f32 0.0078125, %v27_v2 }
  0x8e   :  { %v33_v4 = vsub.f32 %v22_v0, %v31_v3 }
  0x8f   :  { %v29_v5 = vpop.xlane.xlu0 %28 }
  0x90   :  { %v32_v6 = vmul.f32 0.0078125, %v29_v5  ;;  %v35_v7 = vmul.f32 %v33_v4, %v33_v4 }
  0x92   :  { %v34_v8 = vsub.f32 %v23_v1, %v32_v6  ;;  %37 = vadd.xlane.f32.xlu1 %v35_v7 }
  0x94   :  { %v36_v9 = vmul.f32 %v34_v8, %v34_v8 }
  0x96   :  { %39 = vadd.xlane.f32.xlu1 %v36_v9 }
 0x11b   :  { %v38_v19 = vpop.xlane.xlu1 %37 }
 0x11c   :  { %v41_v20 = vmul.f32 0.0078125, %v38_v19 }
 0x11e   :  { %v43_v21 = vadd.f32 1e-05, %v41_v20 }
 0x11f   :  { %v40_v22 = vpop.xlane.xlu1 %39 }
 0x120   :  { %254 = vrsqrt.f32 %v43_v21  ;;  %v42_v23 = vmul.f32 0.0078125, %v40_v22 }
 0x122   :  { %v44_v24 = vadd.f32 1e-05, %v42_v23 }
 0x124   :  { %256 = vrsqrt.f32 %v44_v24 }
 0x12d   :  { %v255_v25 = vpop.eup %254 }
 0x12e   :  { %v47_v26 = vmul.f32 %v255_v25, %v33_v4 }
 0x130   :  { %v55_v29 = vmul.f32 %v194_v27, %v47_v26 }
 0x131   :  { %v257_v28 = vpop.eup %256 }
 0x132   :  { %v48_v30 = vmul.f32 %v257_v28, %v34_v8  ;;  %v63_v33 = vadd.f32 %v195_v31, %v55_v29 }
 0x134   :  { %v56_v32 = vmul.f32 %v194_v27, %v48_v30 }
 0x136   :  { %v64_v34 = vadd.f32 %v195_v31, %v56_v32 }
 0x138   :  { %v212_v35 = vpack.c.bf16 %v64_v34, %v63_v33 }
 0x13a   :  { %213 = vst [vmem:[#allocation2] sm:$0xff] %v212_v35  }
 0x141   :  { %v253_v36 = vld [vmem:[#allocation2] sm:$0xff]  }
 0x142   :  { %240 = vmatmul.mubr.bf16.vlgmr.msra.gmra.mxu0 %v253_v36 }
 0x202   :  { %v181_v37 = vpop.f32.mrf.mxu0 }
 0x203   :  { %188 = vst [vmem:[%s331_s4] sm:$0xff] %v181_v37 }
 0x204   :  { %v241_v38 = vpop.f32.mrf.mxu0 }
 0x206   :  { %v184_v39 = vpop.f32.mrf.mxu0 }
 0x207   :  { %189 = vst [vmem:[%s331_s4 + $0x8] sm:$0xff] %v184_v39 }
 0x208   :  { %v242_v40 = vpop.f32.mrf.mxu0 }

// kernel: text_decoder_forward.22
= control target key start
LH: loop header
LB: loop body
LE: loop exit
PB: predicated region body
PF: predicated region fallthrough
CT: control target
= control target key end

     0   :  { %s935_s12 = smov 0   ;;  %s937_s13 = smov 0   ;;  %s1031_s0 = inlined_call_operand.vmem [shape: bf16[2,8,128], index: 0, kind: input, shape index: {}]   ;;  %s1032_s1 = inlined_call_operand.vmem [shape: bf16[2,8,256], index: 1, kind: input, shape index: {}, may-alias: {1,2}]   ;;  %s1033_s2 = inlined_call_operand.vmem [shape: bf16[2,8,256], index: 2, kind: input, shape index: {}, may-alias: {1,2}]   ;;  %s1034_s3 = inlined_call_operand.vmem [shape: bf16[2,8,128], index: 3, kind: output, shape index: {}]  }
   0x1   :  { %s939_s14 = smov 0  }
   0x2 LB: > { %s39_s15 = sadd.s32 1, %s904_s13  ;;  %p790_p0 = scmp.ge.s32.totalorder %s908_s14, 1  ;;  %s908_s14 = sphi %s939_s14, %s13_s14   ;;  %s904_s13 = sphi %s937_s13, %s1036_s13   ;;  %s900_s12 = sphi %s935_s12, %s1035_s12  }
   0x3   : > { %p41_p1 = scmp.ge.s32.totalorder %s39_s15, 2  ;;  %p222_p2 = scmp.lt.s32.totalorder %s908_s14, 3 }
   0x5   : > { %s1038_s15 = smov (%p41_p1, %s39_s15), 0  ;;  %p223_p3 = pnand %p790_p0, %p222_p2 }
   0x6   : > { %p281_p4 = scmp.lt.s32.totalorder (!%p223_p3), %s900_s12, 1  ;;  %s914_s24 = smov (!%p223_p3), 64  }
   0x7   : > { %226 = sbr.rel (%p223_p3) target bundleno = 1394 (0x572), region = 32 }
   0xc   : > { %vm337_vm0 = vcmask 523264   ;;  %v910_v0 = vmov 0.0   ;;  %vm911_vm1 = vmmov 0   ;;  %s1040_s12 = smov (!%p281_p4, %s900_s12), 1  ;;  %vm332_vm2 = vcmask 7168  }
   0xd   : > { %818 = vmatprep.subr.bf16.mxu0 %v910_v0  ;;  %338 = vst.msk [vmem:[#allocation4] sm:$0xff] %vm337_vm0, %v910_v0  ;;  %339 = vst.msk [vmem:[#allocation4 + $0x8] sm:$0xff] %vm337_vm0, %v910_v0  ;;  %820 = vmatprep.mubr.msk.bf16.mxu0 %vm911_vm1, %v910_v0  ;;  %s806_s16 = sshll.u32 %s1040_s12, 3  ;;  %s791_s20 = sshll.u32 %s1040_s12, 2  ;;  %v912_v4 = vmov -1e+30  }
   0xe   : > { %824 = vmatprep.subr.bf16.mxu1 %v910_v0  ;;  %826 = vmatprep.mubr.msk.bf16.mxu1 %vm911_vm1, %v910_v0  ;;  %s302_s19 = scalar_lea.vmem %s1032_s1, %s806_s16  ;;  %s290_s23 = scalar_lea.vmem %s1031_s0, %s791_s20  ;;  %333 = vst.msk [vmem:[#allocation2] sm:$0xff] %vm332_vm2, %v912_v4  ;;  %334 = vst.msk [vmem:[#allocation2 + $0x8] sm:$0xff] %vm332_vm2, %v912_v4  ;;  %vm391_vm3 = vcmask 64512   ;;  %v913_v10 = vmov 0   ;;  %vm426_vm4 = vcmask 1043456  }
   0xf   : > { %v341_v1 = vld [vmem:[%s302_s19] sm:$0xf]  ;;  %335 = vst.msk [vmem:[#allocation3] sm:$0xff] %vm332_vm2, %v910_v0  ;;  %336 = vst.msk [vmem:[#allocation3 + $0x8] sm:$0xff] %vm332_vm2, %v910_v0  ;;  %871 = vset.pattern.permute.xlu0 %v913_v10  ;;  %872 = vset.pattern.permute.xlu1 %v913_v10  ;;  %s808_s25 = sadd.s32 4, %s806_s16  ;;  %s326_s4 = scalar_lea.vmem %s1034_s3, %s791_s20 }
  0x10   : > { %v348_v2 = vsel %vm337_vm0, %v341_v1, 0  ;;  %v340_v3 = vld [vmem:[%s290_s23] sm:$0xf]  ;;  %v800_v11 = vcombine.low %v341_v1, %v341_v1  ;;  %s315_s28 = scalar_lea.vmem %s1033_s2, %s808_s25 }
  0x11   : > { %819 = vmatpush3.bf16.xpose.msra.mxu0 %v348_v2  ;;  %v799_v12 = vcombine.low %v340_v3, %v340_v3  ;;  %v342_v17 = vld [vmem:[%s315_s28] sm:$0xf] }
  0x12   : > { %836 = vmatprep.subr.bf16.mxu0 %v910_v0  ;;  %481 = vrot.lane.b32.xlu1 %v800_v11, %s914_s24  ;;  %v428_v18 = vsel %vm426_vm4, %v342_v17, 0  ;;  %v802_v19 = vcombine.low %v342_v17, %v342_v17 }
  0x13   : > { %825 = vmatpush3.bf16.msra.mxu1 %v428_v18 }
  0x14   : > { %830 = vmatprep.subr.bf16.mxu1 %v910_v0  ;;  %v415_v1 = vld [vmem:[#allocation4] sm:$0xff] }
  0x15   : > { %v390_v13 = vld [vmem:[#allocation2] sm:$0xff]  ;;  %v530_v37 = vld [vmem:[#allocation2 + $0x8] sm:$0xff] }
  0x16   : > { %476 = vrot.lane.b32.xlu1 %v799_v12, %s914_s24  ;;  %v407_v54 = vld [vmem:[#allocation3] sm:$0xff]  ;;  %v547_v60 = vld [vmem:[#allocation3 + $0x8] sm:$0xff] }
  0x18   : > { %821 = vmatmul.mubr.msk.bf16.vlgmr.msra.gmra.mxu0 %vm337_vm0, %v340_v3 }
  0x19   : > { %838 = vmatprep.mubr.msk.bf16.mxu0 %vm911_vm1, %v910_v0 }
  0x84   : > { %v482_v23 = vpop.permute.xlu1 %481 }
  0x85   : > { %v487_v25 = vsel %vm337_vm0, %v482_v23, 0 }
  0x88   : > { %v477_v27 = vpop.permute.xlu1 %476 }
  0xd8   : > { %v384_v5 = vpop.f32.mrf.mxu0 }
  0xd9   : > { %v392_v6 = vsel %vm391_vm3, %v384_v5, -inf }
  0xda   : > { %393 = vmax.xlane.f32.xlu0 %v392_v6  ;;  %v822_v7 = vpop.f32.mrf.mxu0 }
  0xdb   : > { %v555_v7 = vld [vmem:[#allocation4 + $0x8] sm:$0xff] }
  0xdc   : > { %v387_v8 = vpop.f32.mrf.mxu0 }
  0xde   : > { %v823_v9 = vpop.f32.mrf.mxu0 }
 0x163   : > { %v394_v14 = vpop.xlane.xlu0 %393 }
 0x164   : > { %v395_v15 = vmax.f32 %v390_v13, %v394_v14 }
 0x166   : > { %v396_v16 = vsub.f32 %v390_v13, %v395_v15  ;;  %472 = vst.msk [vmem:[#allocation2] sm:$0xff] %vm332_vm2, %v395_v15  ;;  %401 = vperm.xlu0 %871, %v395_v15  }
 0x168   : > { %v397_v51 = vmul.f32 1.442695, %v396_v16 }
 0x16a   : > { %566 = vrot.lane.b32.xlu0 %v802_v19, %s914_s24 }
 0x1e1   : > { %v402_v20 = vpop.permute.xlu0 %401 }
 0x1e2   : > { %v404_v21 = vsub.f32 %v384_v5, %v402_v20 }
 0x1e4   : > { %v405_v22 = vmul.f32 1.442695, %v404_v21 }
 0x1e5   : > { %v567_v41 = vpop.permute.xlu0 %566 }
 0x1e6   : > { %874 = vpow2.f32 %v405_v22  ;;  %v572_v42 = vsel %vm426_vm4, %v567_v41, 0 }
 0x1e7   : > { %837 = vmatpush3.bf16.msra.mxu0 %v572_v42 }
 0x1f3   : > { %v875_v24 = vpop.eup %874 }
 0x1f4   : > { %v422_v26 = vpack.c.bf16 %v875_v24, %v875_v24  ;;  %v409_v43 = vsel %vm391_vm3, %v875_v24, 0.0 }
 0x1f6   : > { %827 = vmatmul.mubr.msk.bf16.vlgmr.msra.gmra.mxu1 %vm391_vm3, %v422_v26 }
 0x1f7   : > { %831 = vmatpush3.bf16.xpose.msra.mxu1 %v487_v25  ;;  %832 = vmatprep.mubr.msk.bf16.mxu1 %vm911_vm1, %v910_v0 }
 0x1fe   : > { %833 = vmatmul.mubr.msk.bf16.vlgmr.msra.gmra.mxu1 %vm337_vm0, %v477_v27 }
 0x2b6   : > { %v464_v28 = vpop.f32.mrf.mxu1 }
 0x2b8   : > { %v828_v29 = vpop.f32.mrf.mxu1 }
 0x2ba   : > { %v467_v30 = vpop.f32.mrf.mxu1 }
 0x2bc   : > { %v829_v31 = vpop.f32.mrf.mxu1 }
 0x2be   : > { %v523_v32 = vpop.f32.mrf.mxu1 }
 0x2bf   : > { %v531_v33 = vsel %vm391_vm3, %v523_v32, -inf }
 0x2c0   : > { %532 = vmax.xlane.f32.xlu1 %v531_v33  ;;  %v834_v34 = vpop.f32.mrf.mxu1 }
 0x2c2   : > { %v526_v35 = vpop.f32.mrf.mxu1 }
 0x2c4   : > { %v835_v36 = vpop.f32.mrf.mxu1 }
 0x349   : > { %v533_v38 = vpop.xlane.xlu1 %532 }
 0x34a   : > { %v534_v39 = vmax.f32 %v530_v37, %v533_v38 }
 0x34c   : > { %v535_v40 = vsub.f32 %v530_v37, %v534_v39  ;;  %616 = vst.msk [vmem:[#allocation2 + $0x8] sm:$0xff] %vm332_vm2, %v534_v39  ;;  %540 = vperm.xlu1 %872, %v534_v39  }
 0x34e   : > { %v536_v50 = vmul.f32 1.442695, %v535_v40 }
 0x370   : > { %410 = vadd.xlane.f32.xlu1 %v409_v43 }
 0x3c7   : > { %v541_v44 = vpop.permute.xlu1 %540 }
 0x3c8   : > { %v543_v45 = vsub.f32 %v523_v32, %v541_v44 }
 0x3ca   : > { %v544_v46 = vmul.f32 1.442695, %v543_v45 }
 0x3cc   : > { %876 = vpow2.f32 %v544_v46 }
 0x3cd   : > { %878 = vpow2.f32 %v536_v50 }
 0x3ce   : > { %880 = vpow2.f32 %v397_v51 }
 0x3d9   : > { %v877_v47 = vpop.eup %876 }
 0x3da   : > { %v549_v48 = vsel %vm391_vm3, %v877_v47, 0.0  ;;  %v562_v49 = vpack.c.bf16 %v877_v47, %v877_v47  ;;  %v879_v52 = vpop.eup %878 }
 0x3db   : > { %550 = vadd.xlane.f32.xlu0 %v549_v48  ;;  %v881_v53 = vpop.eup %880  ;;  %v548_v61 = vmul.f32 %v879_v52, %v547_v60 }
 0x3dc   : > { %839 = vmatmul.mubr.msk.bf16.vlgmr.msra.gmra.mxu0 %vm391_vm3, %v562_v49  ;;  %v408_v55 = vmul.f32 %v881_v53, %v407_v54 }
 0x3f1   : > { %558 = vperm.xlu0 %871, %v879_v52  }
 0x3f5   : > { %418 = vperm.xlu0 %871, %v881_v53  }
 0x3f9   : > { %v411_v56 = vpop.xlane.xlu1 %410 }
 0x3fa   : > { %v412_v57 = vadd.f32 %v411_v56, %v408_v55 }
 0x3fc   : > { %414 = vst.msk [vmem:[#allocation3] sm:$0xff] %vm332_vm2, %v412_v57 }
 0x403   : > { %v621_v58 = vld [vmem:[#allocation3] sm:$0xff] }
 0x404   : > { %882 = vrcp.f32 %v621_v58 }
 0x411   : > { %v883_v59 = vpop.eup %882 }
 0x412   : > { %625 = vperm.xlu0 %871, %v883_v59  }
 0x464   : > { %v551_v62 = vpop.xlane.xlu0 %550 }
 0x465   : > { %v552_v63 = vadd.f32 %v551_v62, %v548_v61 }
 0x467   : > { %553 = vst.msk [vmem:[#allocation3 + $0x8] sm:$0xff] %vm332_vm2, %v552_v63 }
 0x46c   : > { %v559_v0 = vpop.permute.xlu0 %558 }
 0x46d   : > { %v561_v8 = vmul.f32 %v559_v0, %v555_v7 }
 0x46e   : > { %v630_v2 = vld [vmem:[#allocation3 + $0x8] sm:$0xff] }
 0x46f   : > { %884 = vrcp.f32 %v630_v2 }
 0x470   : > { %v419_v3 = vpop.permute.xlu0 %418 }
 0x471   : > { %v421_v4 = vmul.f32 %v419_v3, %v415_v1 }
 0x473   : > { %v470_v5 = vadd.f32 %v464_v28, %v421_v4 }
 0x475   : > { %471 = vst.msk [vmem:[#allocation4] sm:$0xff] %vm337_vm0, %v470_v5 }
 0x47c   : > { %v885_v6 = vpop.eup %884  ;;  %v620_v18 = vld [vmem:[#allocation4] sm:$0xff] }
 0x47d   : > { %634 = vperm.xlu1 %872, %v885_v6  }
 0x48d   : > { %v626_v17 = vpop.permute.xlu0 %625 }
 0x48e   : > { %v628_v19 = vmul.f32 %v626_v17, %v620_v18 }
 0x49c   : > { %v608_v9 = vpop.f32.mrf.mxu0 }
 0x49d   : > { %v614_v10 = vadd.f32 %v608_v9, %v561_v8 }
 0x49e   : > { %v840_v11 = vpop.f32.mrf.mxu0 }
 0x49f   : > { %615 = vst.msk [vmem:[#allocation4 + $0x8] sm:$0xff] %vm337_vm0, %v614_v10 }
 0x4a0   : > { %v611_v12 = vpop.f32.mrf.mxu0 }
 0x4a2   : > { %v841_v13 = vpop.f32.mrf.mxu0 }
 0x4a6   : > { %v629_v15 = vld [vmem:[#allocation4 + $0x8] sm:$0xff] }
 0x4f8   : > { %v635_v14 = vpop.permute.xlu1 %634 }
 0x4f9   : > { %v637_v16 = vmul.f32 %v635_v14, %v629_v15 }
 0x4fb   : > { %639 = vrot.lane.b32.xlu0 %v637_v16, %s914_s24 }
 0x56d   : > { %v640_v20 = vpop.permute.xlu0 %639 }
 0x56e   : > { %v642_v21 = vsel %vm337_vm0, %v628_v19, %v640_v20 }
 0x56f   : > { %v643_v22 = vpack.c.bf16 %v642_v21, %v642_v21 }
 0x571   : > { %644 = vst [vmem:[%s326_s4] sm:$0xf] %v643_v22 }
 0x572 PF: > { %s13_s14 = sadd.s32 1, %s908_s14   ;;  %s1035_s12 = smov %s904_s13 }
 0x573   : > { %p10_p5 = scmp.ge.s32.totalorder %s13_s14, 4   ;;  %s1036_s13 = smov %s1038_s15 }
 0x575   :  { %12 = sbr.rel (!%p10_p5) target bundleno = 2 (0x2), region = 79 }

// kernel: text_decoder_forward.24
= control target key start
LH: loop header
LB: loop body
LE: loop exit
PB: predicated region body
PF: predicated region fallthrough
CT: control target
= control target key end

     0   :  { %v1061_v42 = vmov 0   ;;  %s1366_s0 = inlined_call_operand.vmem [shape: f32[16,128], index: 0, kind: input, shape index: {}]   ;;  %s1367_s3 = inlined_call_operand.vmem [shape: bf16[128,512], index: 3, kind: input, shape index: {}]   ;;  %s1368_s1 = inlined_call_operand.vmem [shape: f32[1,128], index: 1, kind: input, shape index: {}]   ;;  %s1369_s2 = inlined_call_operand.vmem [shape: f32[1,128], index: 2, kind: input, shape index: {}]   ;;  %s1370_s5 = inlined_call_operand.vmem [shape: bf16[512,128], index: 5, kind: input, shape index: {}]   ;;  %s1371_s4 = inlined_call_operand.vmem [shape: f32[1,512], index: 4, kind: input, shape index: {}]   ;;  %s1372_s6 = inlined_call_operand.vmem [shape: f32[1,128], index: 6, kind: input, shape index: {}]   ;;  %s1373_s7 = inlined_call_operand.vmem [shape: f32[16,128], index: 7, kind: output, shape index: {}]  }
   0x1   :  { %v1105_v0 = vld [vmem:[%s1366_s0] sm:$0xff]  ;;  %v1111_v1 = vld [vmem:[%s1366_s0 + $0x8] sm:$0xff]  ;;  %340 = vmatprep.mubr.bf16.mxu0 %v1061_v42  ;;  %383 = vmatprep.mubr.bf16.mxu1 %v1061_v42  ;;  %v1009_v61 = vld [vmem:[%s1370_s5 + $0x78] sm:$0xff]  }
   0x2   :  { %35 = vadd.xlane.f32.xlu0 %v1105_v0  ;;  %v960_v10 = vld [vmem:[%s1367_s3 + $0xe4] ss:$16 sps:$4 sm:$0xff]   ;;  %v962_v11 = vld [vmem:[%s1367_s3 + $0xec] ss:$16 sps:$4 sm:$0xff]   ;;  %v964_v12 = vld [vmem:[%s1367_s3 + $0xe0] ss:$16 sps:$4 sm:$0xff]  }
   0x3   :  { %308 = vmatprep.subr.bf16.mxu0 %v960_v10  ;;  %v965_v13 = vld [vmem:[%s1367_s3 + $0xe8] ss:$16 sps:$4 sm:$0xff]   ;;  %351 = vmatprep.subr.bf16.mxu1 %v962_v11  ;;  %v966_v14 = vld [vmem:[%s1367_s3 + $0xc4] ss:$16 sps:$4 sm:$0xff]   ;;  %v968_v15 = vld [vmem:[%s1367_s3 + $0xcc] ss:$16 sps:$4 sm:$0xff]  }
   0x4   :  { %309 = vmatpush1.bf16.msra.mxu0 %v964_v12  ;;  %352 = vmatpush1.bf16.msra.mxu1 %v965_v13  ;;  %v970_v16 = vld [vmem:[%s1367_s3 + $0xc0] ss:$16 sps:$4 sm:$0xff]   ;;  %v971_v17 = vld [vmem:[%s1367_s3 + $0xc8] ss:$16 sps:$4 sm:$0xff]   ;;  %v972_v18 = vld [vmem:[%s1367_s3 + $0xa4] ss:$16 sps:$4 sm:$0xff]  }
   0x5   :  { %310 = vmatprep.subr.bf16.mxu0 %v966_v14  ;;  %353 = vmatprep.subr.bf16.mxu1 %v968_v15  ;;  %v974_v19 = vld [vmem:[%s1367_s3 + $0xac] ss:$16 sps:$4 sm:$0xff]   ;;  %v976_v20 = vld [vmem:[%s1367_s3 + $0xa0] ss:$16 sps:$4 sm:$0xff]   ;;  %v977_v21 = vld [vmem:[%s1367_s3 + $0xa8] ss:$16 sps:$4 sm:$0xff]  }
   0x6   :  { %37 = vadd.xlane.f32.xlu0 %v1111_v1  ;;  %v978_v22 = vld [vmem:[%s1367_s3 + $0x84] ss:$16 sps:$4 sm:$0xff]   ;;  %v980_v23 = vld [vmem:[%s1367_s3 + $0x8c] ss:$16 sps:$4 sm:$0xff]   ;;  %v982_v24 = vld [vmem:[%s1367_s3 + $0x80] ss:$16 sps:$4 sm:$0xff]  }
   0x7   :  { %v983_v25 = vld [vmem:[%s1367_s3 + $0x88] ss:$16 sps:$4 sm:$0xff]   ;;  %v984_v26 = vld [vmem:[%s1367_s3 + $0x64] ss:$16 sps:$4 sm:$0xff]   ;;  %v986_v27 = vld [vmem:[%s1367_s3 + $0x6c] ss:$16 sps:$4 sm:$0xff]  }
   0x8   :  { %311 = vmatpush1.bf16.msra.mxu0 %v970_v16  ;;  %354 = vmatpush1.bf16.msra.mxu1 %v971_v17  ;;  %v988_v28 = vld [vmem:[%s1367_s3 + $0x60] ss:$16 sps:$4 sm:$0xff]   ;;  %v989_v29 = vld [vmem:[%s1367_s3 + $0x68] ss:$16 sps:$4 sm:$0xff]   ;;  %v990_v30 = vld [vmem:[%s1367_s3 + $0x44] ss:$16 sps:$4 sm:$0xff]  }
   0x9   :  { %312 = vmatprep.subr.bf16.mxu0 %v972_v18  ;;  %355 = vmatprep.subr.bf16.mxu1 %v974_v19  ;;  %v992_v31 = vld [vmem:[%s1367_s3 + $0x4c] ss:$16 sps:$4 sm:$0xff]   ;;  %v994_v32 = vld [vmem:[%s1367_s3 + $0x40] ss:$16 sps:$4 sm:$0xff]   ;;  %v995_v33 = vld [vmem:[%s1367_s3 + $0x48] ss:$16 sps:$4 sm:$0xff]  }
   0xa   :  { %v996_v34 = vld [vmem:[%s1367_s3 + $0x24] ss:$16 sps:$4 sm:$0xff]   ;;  %v998_v35 = vld [vmem:[%s1367_s3 + $0x2c] ss:$16 sps:$4 sm:$0xff]   ;;  %v1000_v36 = vld [vmem:[%s1367_s3 + $0x20] ss:$16 sps:$4 sm:$0xff]  }
   0xb   :  { %v1001_v37 = vld [vmem:[%s1367_s3 + $0x28] ss:$16 sps:$4 sm:$0xff]   ;;  %v1002_v38 = vld [vmem:[%s1367_s3 + $0x4] ss:$16 sps:$4 sm:$0xff]   ;;  %v1004_v39 = vld [vmem:[%s1367_s3 + $0xc] ss:$16 sps:$4 sm:$0xff]  }
   0xc   :  { %313 = vmatpush1.bf16.msra.mxu0 %v976_v20  ;;  %356 = vmatpush1.bf16.msra.mxu1 %v977_v21  ;;  %v1006_v40 = vld [vmem:[%s1367_s3] ss:$16 sps:$4 sm:$0xff]   ;;  %v1007_v41 = vld [vmem:[%s1367_s3 + $0x8] ss:$16 sps:$4 sm:$0xff]  }
   0xd   :  { %314 = vmatprep.subr.bf16.mxu0 %v978_v22  ;;  %357 = vmatprep.subr.bf16.mxu1 %v980_v23  ;;  %v838_v51 = vld [vmem:[%s1368_s1] ss:$0 sm:$0xff]  ;;  %v1010_v62 = vld [vmem:[%s1370_s5 + $0xf8] sm:$0xff]   ;;  %v1020_v10 = vld [vmem:[%s1370_s5 + $0xa8] sm:$0xff]  }
   0xe   :  { %v839_v55 = vld [vmem:[%s1369_s2] ss:$0 sm:$0xff]  ;;  %v1011_v63 = vld [vmem:[%s1370_s5 + $0x38] sm:$0xff]   ;;  %v1029_v19 = vld [vmem:[%s1370_s5 + $0x50] sm:$0xff]  }
   0xf   :  { %v1021_v11 = vld [vmem:[%s1370_s5 + $0x60] sm:$0xff]   ;;  %v1025_v15 = vld [vmem:[%s1370_s5 + $0x58] sm:$0xff]   ;;  %v1030_v20 = vld [vmem:[%s1370_s5 + $0xd0] sm:$0xff]  }
  0x10   :  { %315 = vmatpush1.bf16.msra.mxu0 %v982_v24  ;;  %358 = vmatpush1.bf16.msra.mxu1 %v983_v25  ;;  %v1022_v12 = vld [vmem:[%s1370_s5 + $0xe0] sm:$0xff]   ;;  %v1026_v16 = vld [vmem:[%s1370_s5 + $0xd8] sm:$0xff]   ;;  %v1031_v21 = vld [vmem:[%s1370_s5 + $0x10] sm:$0xff]  }
  0x11   :  { %316 = vmatprep.subr.bf16.mxu0 %v984_v26  ;;  %359 = vmatprep.subr.bf16.mxu1 %v986_v27  ;;  %v1023_v13 = vld [vmem:[%s1370_s5 + $0x20] sm:$0xff]   ;;  %v1027_v17 = vld [vmem:[%s1370_s5 + $0x18] sm:$0xff]   ;;  %v1032_v22 = vld [vmem:[%s1370_s5 + $0x90] sm:$0xff]  }
  0x12   :  { %v1024_v14 = vld [vmem:[%s1370_s5 + $0xa0] sm:$0xff]   ;;  %v1028_v18 = vld [vmem:[%s1370_s5 + $0x98] sm:$0xff]   ;;  %v1033_v23 = vld [vmem:[%s1370_s5 + $0x48] sm:$0xff]  }
  0x13   :  { %v1034_v24 = vld [vmem:[%s1370_s5 + $0xc8] sm:$0xff]   ;;  %v1037_v27 = vld [vmem:[%s1370_s5 + $0x40] sm:$0xff]  }
  0x14   :  { %317 = vmatpush1.bf16.msra.mxu0 %v988_v28  ;;  %360 = vmatpush1.bf16.msra.mxu1 %v989_v29  ;;  %v1035_v25 = vld [vmem:[%s1370_s5 + $0x8] sm:$0xff]   ;;  %v1038_v28 = vld [vmem:[%s1370_s5 + $0xc0] sm:$0xff]  }
  0x15   :  { %318 = vmatprep.subr.bf16.mxu0 %v990_v30  ;;  %361 = vmatprep.subr.bf16.mxu1 %v992_v31  ;;  %v1036_v26 = vld [vmem:[%s1370_s5 + $0x88] sm:$0xff]   ;;  %v1039_v29 = vld [vmem:[%s1370_s5] sm:$0xff]   ;;  %v122_v31 = vlaneseq }
  0x16   :  { %v1040_v30 = vld [vmem:[%s1370_s5 + $0x80] sm:$0xff]  }
  0x18   :  { %319 = vmatpush1.bf16.msra.mxu0 %v994_v32  ;;  %362 = vmatpush1.bf16.msra.mxu1 %v995_v33  ;;  %v123_v32 = vshrl.u32 %v122_v31, 7 }
  0x19   :  { %320 = vmatprep.subr.bf16.mxu0 %v996_v34  ;;  %363 = vmatprep.subr.bf16.mxu1 %v998_v35  ;;  %v120_v35 = vld [vmem:[%s1371_s4] sm:$0xf] }
  0x1a   :  { %v124_v33 = vsub.s32 0, %v123_v32  ;;  %v132_v34 = vsub.s32 2, %v123_v32 }
  0x1c   :  { %321 = vmatpush1.bf16.msra.mxu0 %v1000_v36  ;;  %364 = vmatpush1.bf16.msra.mxu1 %v1001_v37  ;;  %v128_v36 = vsub.s32 1, %v123_v32  ;;  %v136_v37 = vsub.s32 3, %v123_v32 }
  0x1d   :  { %322 = vmatprep.subr.bf16.mxu0 %v1002_v38  ;;  %365 = vmatprep.subr.bf16.mxu1 %v1004_v39  ;;  %v125_v38 = vrot.slane %v120_v35, %v124_v33  ;;  %v133_v39 = vrot.slane %v120_v35, %v132_v34 }
  0x20   :  { %323 = vmatpush1.bf16.msra.mxu0 %v1006_v40  ;;  %366 = vmatpush1.bf16.msra.mxu1 %v1007_v41  ;;  %v129_v40 = vrot.slane %v120_v35, %v128_v36  ;;  %v137_v41 = vrot.slane %v120_v35, %v136_v37 }
  0x21   :  { %915 = vmatprep.subr.bf16.mxu0 %v1009_v61  ;;  %937 = vmatprep.subr.bf16.mxu1 %v1010_v62 }
  0x8b   :  { %v36_v2 = vpop.xlane.xlu0 %35 }
  0x8c   :  { %v40_v3 = vmul.f32 0.0078125, %v36_v2  ;;  %v1012_v2 = vld [vmem:[%s1370_s5 + $0xb8] sm:$0xff]  }
  0x8e   :  { %v1115_v4 = vsub.f32 %v1105_v0, %v40_v3  ;;  %v1013_v3 = vld [vmem:[%s1370_s5 + $0x70] sm:$0xff]  }
  0x8f   :  { %v38_v5 = vpop.xlane.xlu0 %37 }
  0x90   :  { %v41_v6 = vmul.f32 0.0078125, %v38_v5  ;;  %v44_v7 = vmul.f32 %v1115_v4, %v1115_v4  ;;  %v1015_v5 = vld [vmem:[%s1370_s5 + $0x30] sm:$0xff]  }
  0x92   :  { %v1120_v8 = vsub.f32 %v1111_v1, %v41_v6  ;;  %46 = vadd.xlane.f32.xlu1 %v44_v7  ;;  %v1016_v6 = vld [vmem:[%s1370_s5 + $0xb0] sm:$0xff]   ;;  %v1017_v7 = vld [vmem:[%s1370_s5 + $0x68] sm:$0xff]  }
  0x94   :  { %v45_v9 = vmul.f32 %v1120_v8, %v1120_v8 }
  0x96   :  { %48 = vadd.xlane.f32.xlu1 %v45_v9  ;;  %v1019_v9 = vld [vmem:[%s1370_s5 + $0x28] sm:$0xff]  }
 0x11b   :  { %v47_v43 = vpop.xlane.xlu1 %46 }
 0x11c   :  { %v50_v44 = vmul.f32 0.0078125, %v47_v43 }
 0x11e   :  { %v52_v45 = vadd.f32 1e-05, %v50_v44 }
 0x11f   :  { %v49_v46 = vpop.xlane.xlu1 %48 }
 0x120   :  { %1041 = vrsqrt.f32 %v52_v45  ;;  %v51_v47 = vmul.f32 0.0078125, %v49_v46 }
 0x122   :  { %v53_v48 = vadd.f32 1e-05, %v51_v47 }
 0x124   :  { %1043 = vrsqrt.f32 %v53_v48 }
 0x12d   :  { %v1042_v49 = vpop.eup %1041 }
 0x12e   :  { %v56_v50 = vmul.f32 %v1042_v49, %v1115_v4  ;;  %v1014_v4 = vld [vmem:[%s1370_s5 + $0xf0] sm:$0xff]  }
 0x130   :  { %v64_v53 = vmul.f32 %v838_v51, %v56_v50 }
 0x131   :  { %v1044_v52 = vpop.eup %1043 }
 0x132   :  { %v57_v54 = vmul.f32 %v1044_v52, %v1120_v8  ;;  %v72_v57 = vadd.f32 %v839_v55, %v64_v53  ;;  %v1018_v8 = vld [vmem:[%s1370_s5 + $0xe8] sm:$0xff]  }
 0x134   :  { %v65_v56 = vmul.f32 %v838_v51, %v57_v54 }
 0x136   :  { %v73_v58 = vadd.f32 %v839_v55, %v65_v56 }
 0x138   :  { %v913_v59 = vpack.c.bf16 %v73_v58, %v72_v57 }
 0x13a   :  { %914 = vst [vmem:[#allocation2] sm:$0xff] %v913_v59  }
 0x141   :  { %v1008_v60 = vld [vmem:[#allocation2] sm:$0xff]  }
 0x142   :  { %341 = vmatmul.mubr.bf16.vlgmr.msra.gmra.mxu0 %v1008_v60  ;;  %384 = vmatmul.mubr.bf16.vlgmr.msra.gmra.mxu1 %v1008_v60 }
 0x143   :  { %916 = vmatpush3.bf16.msra.mxu0 %v1011_v63  ;;  %938 = vmatpush3.bf16.msra.mxu1 %v1012_v2 }
 0x144   :  { %917 = vmatprep.subr.bf16.mxu0 %v1013_v3  ;;  %939 = vmatprep.subr.bf16.mxu1 %v1014_v4 }
 0x147   :  { %918 = vmatpush3.bf16.msra.mxu0 %v1015_v5  ;;  %940 = vmatpush3.bf16.msra.mxu1 %v1016_v6 }
 0x148   :  { %919 = vmatprep.subr.bf16.mxu0 %v1017_v7  ;;  %941 = vmatprep.subr.bf16.mxu1 %v1018_v8 }
 0x14b   :  { %920 = vmatpush3.bf16.msra.mxu0 %v1019_v9  ;;  %942 = vmatpush3.bf16.msra.mxu1 %v1020_v10 }
 0x14c   :  { %921 = vmatprep.subr.bf16.mxu0 %v1021_v11  ;;  %943 = vmatprep.subr.bf16.mxu1 %v1022_v12 }
 0x14f   :  { %922 = vmatpush3.bf16.msra.mxu0 %v1023_v13  ;;  %944 = vmatpush3.bf16.msra.mxu1 %v1024_v14 }
 0x150   :  { %923 = vmatprep.subr.bf16.mxu0 %v1025_v15  ;;  %945 = vmatprep.subr.bf16.mxu1 %v1026_v16 }
 0x153   :  { %924 = vmatpush3.bf16.msra.mxu0 %v1027_v17  ;;  %946 = vmatpush3.bf16.msra.mxu1 %v1028_v18 }
 0x154   :  { %925 = vmatprep.subr.bf16.mxu0 %v1029_v19  ;;  %947 = vmatprep.subr.bf16.mxu1 %v1030_v20 }
 0x157   :  { %926 = vmatpush3.bf16.msra.mxu0 %v1031_v21  ;;  %948 = vmatpush3.bf16.msra.mxu1 %v1032_v22 }
 0x158   :  { %927 = vmatprep.subr.bf16.mxu0 %v1033_v23  ;;  %949 = vmatprep.subr.bf16.mxu1 %v1034_v24 }
 0x15b   :  { %928 = vmatpush3.bf16.msra.mxu0 %v1035_v25  ;;  %950 = vmatpush3.bf16.msra.mxu1 %v1036_v26 }
 0x15c   :  { %929 = vmatprep.subr.bf16.mxu0 %v1037_v27  ;;  %951 = vmatprep.subr.bf16.mxu1 %v1038_v28 }
 0x15f   :  { %930 = vmatpush3.bf16.msra.mxu0 %v1039_v29  ;;  %952 = vmatpush3.bf16.msra.mxu1 %v1040_v30 }
 0x202   :  { %v342_v42 = vpop.f32.mrf.mxu0  ;;  %v385_v43 = vpop.f32.mrf.mxu1 }
 0x203   :  { %v1327_v44 = vadd.f32 %v342_v42, %v125_v38  ;;  %v1329_v45 = vadd.f32 %v385_v43, %v133_v39 }
 0x204   :  { %v344_v46 = vpop.f32.mrf.mxu0  ;;  %v387_v47 = vpop.f32.mrf.mxu1 }
 0x205   :  { %v402_v48 = vmul.f32 0.044715, %v1327_v44  ;;  %v404_v49 = vmul.f32 0.044715, %v1329_v45  ;;  %v345_v50 = vadd.f32 %v344_v46, %v129_v40  ;;  %v1333_v51 = vadd.f32 %v387_v47, %v137_v41 }
 0x206   :  { %v346_v52 = vpop.f32.mrf.mxu0  ;;  %v389_v53 = vpop.f32.mrf.mxu1  ;;  %v394_v46 = vmul.f32 0.5, %v1327_v44 }
 0x207   :  { %v410_v54 = vmul.f32 %v402_v48, %v1327_v44  ;;  %v412_v55 = vmul.f32 %v404_v49, %v1329_v45  ;;  %v403_v56 = vmul.f32 0.044715, %v345_v50  ;;  %v405_v57 = vmul.f32 0.044715, %v1333_v51 }
 0x208   :  { %v347_v58 = vadd.f32 %v346_v52, %v125_v38  ;;  %v1338_v59 = vadd.f32 %v389_v53, %v133_v39  ;;  %v348_v60 = vpop.f32.mrf.mxu0  ;;  %v391_v61 = vpop.f32.mrf.mxu1  ;;  %v395_v42 = vmul.f32 0.5, %v345_v50 }
 0x209   :  { %v418_v62 = vmul.f32 %v410_v54, %v1327_v44  ;;  %v420_v63 = vmul.f32 %v412_v55, %v1329_v45  ;;  %v411_v2 = vmul.f32 %v403_v56, %v345_v50  ;;  %v413_v3 = vmul.f32 %v405_v57, %v1333_v51 }
 0x20a   :  { %v406_v4 = vmul.f32 0.044715, %v347_v58  ;;  %v408_v5 = vmul.f32 0.044715, %v1338_v59  ;;  %v349_v6 = vadd.f32 %v348_v60, %v129_v40  ;;  %v392_v7 = vadd.f32 %v391_v61, %v137_v41 }
 0x20b   :  { %v426_v8 = vadd.f32 %v418_v62, %v1327_v44  ;;  %v428_v9 = vadd.f32 %v420_v63, %v1329_v45  ;;  %v419_v10 = vmul.f32 %v411_v2, %v345_v50  ;;  %v421_v11 = vmul.f32 %v413_v3, %v1333_v51 }
 0x20c   :  { %v414_v12 = vmul.f32 %v406_v4, %v347_v58  ;;  %v416_v13 = vmul.f32 %v408_v5, %v1338_v59  ;;  %v407_v14 = vmul.f32 0.044715, %v349_v6  ;;  %v409_v15 = vmul.f32 0.044715, %v392_v7 }
 0x20d   :  { %v434_v16 = vmul.f32 0.7978846, %v426_v8  ;;  %v436_v17 = vmul.f32 0.7978846, %v428_v9  ;;  %v427_v18 = vadd.f32 %v419_v10, %v345_v50  ;;  %v429_v24 = vadd.f32 %v421_v11, %v1333_v51 }
 0x20e   :  { %v422_v19 = vmul.f32 %v414_v12, %v347_v58  ;;  %v424_v20 = vmul.f32 %v416_v13, %v1338_v59  ;;  %v415_v21 = vmul.f32 %v407_v14, %v349_v6  ;;  %v417_v22 = vmul.f32 %v409_v15, %v392_v7 }
 0x20f   :  { %v435_v23 = vmul.f32 0.7978846, %v427_v18  ;;  %1045 = vtanh.f32 %v434_v16  ;;  %v437_v29 = vmul.f32 0.7978846, %v429_v24  ;;  %v398_v52 = vmul.f32 0.5, %v347_v58 }
 0x210   :  { %v430_v25 = vadd.f32 %v422_v19, %v347_v58  ;;  %v432_v26 = vadd.f32 %v424_v20, %v1338_v59  ;;  %v423_v27 = vmul.f32 %v415_v21, %v349_v6  ;;  %1047 = vtanh.f32 %v436_v17  ;;  %v907_v20 = vld [vmem:[%s1372_s6] ss:$0 sm:$0xff] }
 0x211   :  { %v425_v28 = vmul.f32 %v417_v22, %v392_v7  ;;  %1049 = vtanh.f32 %v435_v23  ;;  %v399_v56 = vmul.f32 0.5, %v349_v6  ;;  %v400_v60 = vmul.f32 0.5, %v1338_v59 }
 0x212   :  { %v438_v30 = vmul.f32 0.7978846, %v430_v25  ;;  %v440_v31 = vmul.f32 0.7978846, %v432_v26  ;;  %v431_v32 = vadd.f32 %v423_v27, %v349_v6  ;;  %1051 = vtanh.f32 %v437_v29 }
 0x213   :  { %v433_v33 = vadd.f32 %v425_v28, %v392_v7  ;;  %v397_v62 = vmul.f32 0.5, %v1333_v51  ;;  %v401_v63 = vmul.f32 0.5, %v392_v7  ;;  %v396_v44 = vmul.f32 0.5, %v1329_v45 }
 0x214   :  { %1053 = vtanh.f32 %v438_v30  ;;  %v439_v34 = vmul.f32 0.7978846, %v431_v32 }
 0x215   :  { %1055 = vtanh.f32 %v440_v31  ;;  %v441_v35 = vmul.f32 0.7978846, %v433_v33 }
 0x216   :  { %1057 = vtanh.f32 %v439_v34 }
 0x217   :  { %1059 = vtanh.f32 %v441_v35 }
 0x21c   :  { %v1046_v36 = vpop.eup %1045 }
 0x21d   :  { %v1048_v37 = vpop.eup %1047  ;;  %v450_v53 = vadd.f32 1.0, %v1046_v36 }
 0x21e   :  { %v1050_v38 = vpop.eup %1049  ;;  %v452_v61 = vadd.f32 1.0, %v1048_v37 }
 0x21f   :  { %v1052_v39 = vpop.eup %1051  ;;  %v451_v43 = vadd.f32 1.0, %v1050_v38  ;;  %v458_v9 = vmul.f32 %v450_v53, %v394_v46 }
 0x220   :  { %v453_v49 = vadd.f32 1.0, %v1052_v39  ;;  %v460_v11 = vmul.f32 %v452_v61, %v396_v44 }
 0x221   :  { %v1054_v40 = vpop.eup %1053  ;;  %v459_v3 = vmul.f32 %v451_v43, %v395_v42 }
 0x222   :  { %v1056_v41 = vpop.eup %1055  ;;  %v454_v47 = vadd.f32 1.0, %v1054_v40  ;;  %v461_v8 = vmul.f32 %v453_v49, %v397_v62 }
 0x223   :  { %v1058_v48 = vpop.eup %1057  ;;  %v456_v54 = vadd.f32 1.0, %v1056_v41 }
 0x224   :  { %v1060_v55 = vpop.eup %1059  ;;  %v455_v57 = vadd.f32 1.0, %v1058_v48  ;;  %v462_v50 = vmul.f32 %v454_v47, %v398_v52 }
 0x225   :  { %v457_v2 = vadd.f32 1.0, %v1060_v55  ;;  %v464_v5 = vmul.f32 %v456_v54, %v400_v60 }
 0x226   :  { %v463_v4 = vmul.f32 %v455_v57, %v399_v56  ;;  %v468_v12 = vpack.c.bf16 %v462_v50, %v458_v9 }
 0x227   :  { %v465_v58 = vmul.f32 %v457_v2, %v401_v63  ;;  %v470_v59 = vpack.c.bf16 %v464_v5, %v460_v11 }
 0x228   :  { %v469_v10 = vpack.c.bf16 %v463_v4, %v459_v3 }
 0x229   :  { %v471_v6 = vpack.c.bf16 %v465_v58, %v461_v8 }
 0x22a   :  { %760 = vmatprep.mubr.bf16.mxu0 %v469_v10 }
 0x22b   :  { %801 = vmatprep.mubr.bf16.mxu1 %v471_v6  ;;  %761 = vmatmul.mubr.bf16.vlgmr.msra.gmra.mxu0 %v468_v12 }
 0x22c   :  { %802 = vmatmul.mubr.bf16.vlgmr.msra.gmra.mxu1 %v470_v59 }
 0x2eb   :  { %v931_v51 = vpop.f32.mrf.mxu0 }
 0x2ec   :  { %v953_v7 = vpop.f32.mrf.mxu1 }
 0x2ed   :  { %v932_v13 = vpop.f32.mrf.mxu0 }
 0x2ee   :  { %v933_v14 = vadd.f32 %v932_v13, %v931_v51  ;;  %v954_v15 = vpop.f32.mrf.mxu1 }
 0x2ef   :  { %v955_v16 = vadd.f32 %v954_v15, %v953_v7  ;;  %v934_v45 = vpop.f32.mrf.mxu0 }
 0x2f0   :  { %v956_v17 = vpop.f32.mrf.mxu1 }
 0x2f1   :  { %v804_v18 = vadd.f32 %v955_v16, %v933_v14  ;;  %v935_v19 = vpop.f32.mrf.mxu0 }
 0x2f2   :  { %v936_v21 = vadd.f32 %v935_v19, %v934_v45  ;;  %v957_v22 = vpop.f32.mrf.mxu1 }
 0x2f3   :  { %v821_v23 = vadd.f32 %v804_v18, %v1105_v0  ;;  %v958_v24 = vadd.f32 %v957_v22, %v956_v17 }
 0x2f5   :  { %v830_v25 = vadd.f32 %v907_v20, %v821_v23  ;;  %v807_v26 = vadd.f32 %v958_v24, %v936_v21 }
 0x2f7   :  { %832 = vst [vmem:[%s1373_s7] sm:$0xff] %v830_v25  ;;  %v822_v27 = vadd.f32 %v807_v26, %v1111_v1 }
 0x2f9   :  { %v831_v28 = vadd.f32 %v907_v20, %v822_v27 }
 0x2fb   :  { %833 = vst [vmem:[%s1373_s7 + $0x8] sm:$0xff] %v831_v28 }

</bundles_post_ra>
